<compile_context>
chip_gen: v7x
topology: tpu7x:2x2x1
jax: 0.10.0
libtpu: 0.0.40
codegen_flags: <defaults>
</compile_context>

<pallas_src>
import functools

import jax
import jax.numpy as jnp
from jax import lax
from jax.experimental import pallas as pl
from jax.experimental.pallas import tpu as pltpu


# ----------------------------------------------------------------------------
# generation-aware VMEM sizing
# ----------------------------------------------------------------------------
def _vmem_config():
    """Returns (tile budget, vmem_limit_bytes).  v5e/v6e have 128 MiB physical
    VMEM -> large tiles; v7x has 64 MiB -> keep headroom for compiler scratch."""
    phys = 64 * 1024 * 1024
    try:
        phys = int(getattr(pltpu.get_tpu_info(), "vmem_capacity_bytes", phys))
    except Exception:
        pass
    if phys >= 100 * 1024 * 1024:                      # v5e / v6e
        return 96 * 1024 * 1024, 112 * 1024 * 1024
    return 36 * 1024 * 1024, 52 * 1024 * 1024          # v7x


def _pick_tile_rows(H, W, cin, cout, budget_bytes):
    """Largest row tile TH dividing H (multiple of 8, or H itself) whose estimated
    VMEM footprint (pipeline buffers + in-kernel temporaries) fits the budget."""
    def est(th):
        a_in  = 2 * th * W * cin * 2                 # activation in (bf16, 2 bufs)
        halos = 2 * 2 * W * cin * 2                  # two 1-row halos (2 bufs)
        a_out = 2 * th * W * cout * 2                # pre-norm out (bf16, 2 bufs)
        noise = 2 * th * W * 256                     # (TH*W, 1) bf16, worst-case tiling pad
        wts   = 9 * cin * cout * 2 + 4 * cout * 4    # weights/bias/noise-w (single buffer)
        views = 4 * (th + 2) * W * cin * 2           # xc + xl + xr (+ slack)
        accs  = 4 * th * W * cout * 4                # f32 acc + live epilogue temps
        return a_in + halos + a_out + noise + wts + views + accs + (2 << 20)

    divisors = [d for d in range(1, H + 1) if H % d == 0]
    cands = [d for d in divisors if d % 8 == 0 or d == H]
    fit = [d for d in cands if est(d) <= budget_bytes]
    if not fit:
        # best effort (e.g. H not a multiple of 8) -- may exceed the budget.
        return min(cands)
    aligned = [d for d in fit if (d * W) % 256 == 0]   # MXU M-dim alignment (v6e/v7x)
    return max(aligned) if aligned else max(fit)


# ----------------------------------------------------------------------------
# pltpu.roll direction probe (run once; safe fallback to concat-based shifts)
# ----------------------------------------------------------------------------
_ROLL_MODE = "unknown"   # True: jnp.roll-compatible, False: reversed, None: use concat


def _roll_mode():
    global _ROLL_MODE
    if _ROLL_MODE != "unknown":
        return _ROLL_MODE
    try:
        def k(x_ref, o_ref):
            o_ref[...] = pltpu.roll(x_ref[...], 1, axis=1)

        x = lax.broadcasted_iota(jnp.int32, (10, 32, 8), 1).astype(jnp.bfloat16)
        y = pl.pallas_call(k, out_shape=jax.ShapeDtypeStruct(x.shape, x.dtype))(x)
        y = jax.block_until_ready(y)
        if float(y[0, 1, 0]) == 0.0 and float(y[0, 0, 0]) == 31.0:
            _ROLL_MODE = True          # out[w] = in[w - 1]   (matches jnp.roll)
        elif float(y[0, 0, 0]) == 1.0:
            _ROLL_MODE = False         # out[w] = in[w + 1]
        else:
            _ROLL_MODE = None
    except Exception:
        _ROLL_MODE = None
    return _ROLL_MODE


def _shifted_views(xc, roll_mode):
    """xl[:, w] = xc[:, w-1] (zero at w=0); xr[:, w] = xc[:, w+1] (zero at w=W-1)."""
    n, W, Cin = xc.shape
    if roll_mode is None:
        zcol = jnp.zeros((n, 1, Cin), xc.dtype)
        xl = jnp.concatenate([zcol, xc[:, :W - 1, :]], axis=1)
        xr = jnp.concatenate([xc[:, 1:, :], zcol], axis=1)
        return xl, xr
    col = lax.broadcasted_iota(jnp.int32, (1, W, 1), 1)
    keep_l = (col != 0).astype(xc.dtype)
    keep_r = (col != W - 1).astype(xc.dtype)
    s_l = 1 if roll_mode else W - 1        # shift realizing out[w] = xc[w-1]
    s_r = W - 1 if roll_mode else 1        # shift realizing out[w] = xc[w+1]
    xl = pltpu.roll(xc, s_l, axis=1) * keep_l
    xr = pltpu.roll(xc, s_r, axis=1) * keep_r
    return xl, xr


# ----------------------------------------------------------------------------
# Pallas kernel 1: fused (input-affine) -> conv3x3 -> noise -> leaky_relu
#                  + partial InstanceNorm statistics.   grid = (B, n_row_tiles)
# ----------------------------------------------------------------------------
def _conv_stage_kernel(x_ref, xt_ref, xb_ref, nz_ref, wc_ref, bc_ref, nw_ref,
                       aff_ref, pre_ref, st_ref, *, roll_mode):
    TH, W, Cin = x_ref.shape[1], x_ref.shape[2], x_ref.shape[3]
    Cout = pre_ref.shape[3]
    t = pl.program_id(1)
    T = pl.num_programs(1)

    aff = aff_ref[0]                            # (2, Cin) f32: y = a*x + b
    a_in = aff[0:1, :].astype(jnp.bfloat16)
    b_in = aff[1:2, :].astype(jnp.bfloat16)

    # (TH+2, W, Cin) bf16 row window; input affine applied to real pixels,
    # image-boundary halo rows zeroed (== the conv's zero padding).
    gate_t = jnp.where(t > 0, 1.0, 0.0).astype(jnp.bfloat16)
    gate_b = jnp.where(t < T - 1, 1.0, 0.0).astype(jnp.bfloat16)
    mid = x_ref[0] * a_in + b_in
    top = (xt_ref[0, 0] * a_in + b_in) * gate_t
    bot = (xb_ref[0, 0] * a_in + b_in) * gate_b
    xc = jnp.concatenate([top[None], mid, bot[None]], axis=0)

    # dx-shifted views built ONCE and reused by all three dy taps.
    xl, xr = _shifted_views(xc, roll_mode)
    views = (xl, xc, xr)

    # 3x3 conv (pad=1) as 9 MXU matmuls, bf16 operands, f32 accumulation.
    acc = jnp.zeros((TH * W, Cout), jnp.float32)
    for dy in range(3):
        for dx in range(3):
            patch = views[dx][dy:dy + TH].reshape(TH * W, Cin)
            acc = acc + jnp.dot(patch, wc_ref[dy * 3 + dx],
                                preferred_element_type=jnp.float32)

    # bf16 epilogue: conv bias + per-channel-weighted noise + leaky_relu(0.2).
    # nz is sublane-major (TH*W, 1); the channel broadcast is a cheap lane splat.
    y = acc.astype(jnp.bfloat16)
    y = y + bc_ref[...].astype(jnp.bfloat16)
    y = y + nz_ref[0] * nw_ref[...].astype(jnp.bfloat16)
    y = jnp.where(y >= 0, y, y * 0.2)

    # Single-pass partial InstanceNorm statistics in f32, one store.
    yf = y.astype(jnp.float32)
    st_ref[0, 0] = jnp.concatenate(
        [jnp.sum(yf, axis=0, keepdims=True),
         jnp.sum(yf * yf, axis=0, keepdims=True)], axis=0)

    # Pre-norm activation stored bf16 for the next stage.
    pre_ref[0] = y.reshape(TH, W, Cout)


# ----------------------------------------------------------------------------
# Pallas kernel 2: final InstanceNorm + AdaIN affine (elementwise)
# ----------------------------------------------------------------------------
def _finalize_kernel(x_ref, aff_ref, o_ref):
    aff = aff_ref[0]                       # (2, C) f32
    a = aff[0:1, :]
    b = aff[1:2, :]
    x = x_ref[0].astype(jnp.float32)       # (TH, W, C)
    o_ref[0] = (x * a + b).astype(o_ref.dtype)


# ----------------------------------------------------------------------------
# pallas_call wrappers
# ----------------------------------------------------------------------------
def _conv_stage(x_bf16, in_affine, wconv_bf16, bconv, noise_w, noise_bf16,
                tile_rows, *, single_buffer_consts, vmem_limit):
    B, H, W, Cin = x_bf16.shape
    Cout = wconv_bf16.shape[-1]
    TH = tile_rows
    T = H // TH
    roll_mode = _roll_mode()

    def const_spec(shape, imap):
        # constant-per-grid operands: single-buffer them (frees VMEM, esp. v7x)
        if single_buffer_consts and hasattr(pl, "Buffered"):
            return pl.BlockSpec(shape, imap, pipeline_mode=pl.Buffered(1))
        return pl.BlockSpec(shape, imap)

    return pl.pallas_call(
        functools.partial(_conv_stage_kernel, roll_mode=roll_mode),
        out_shape=(jax.ShapeDtypeStruct((B, H, W, Cout), jnp.bfloat16),
                   jax.ShapeDtypeStruct((B, T, 2, Cout), jnp.float32)),
        grid_spec=pltpu.PrefetchScalarGridSpec(
            num_scalar_prefetch=0,
            grid=(B, T),
            in_specs=[
                # main row tile
                pl.BlockSpec((1, TH, W, Cin), lambda b, t: (b, t, 0, 0)),
                # 1-row halos (clamped row index; zeroed in-kernel at image edges)
                pl.BlockSpec((1, 1, W, Cin),
                             lambda b, t: (b, jnp.maximum(t * TH - 1, 0), 0, 0)),
                pl.BlockSpec((1, 1, W, Cin),
                             lambda b, t: (b, jnp.minimum(t * TH + TH, H - 1), 0, 0)),
                # sublane-major bf16 noise tile (pixels on sublanes, 1 lane)
                pl.BlockSpec((1, TH * W, 1), lambda b, t: (b, t, 0)),
                # conv weights (tap-major) / bias / noise weight: constants
                const_spec((9, Cin, Cout), lambda b, t: (0, 0, 0)),
                const_spec((1, Cout), lambda b, t: (0, 0)),
                const_spec((1, Cout), lambda b, t: (0, 0)),
                # folded input affine (per batch)
                pl.BlockSpec((1, 2, Cin), lambda b, t: (b, 0, 0)),
            ],
            out_specs=[
                pl.BlockSpec((1, TH, W, Cout), lambda b, t: (b, t, 0, 0)),
                pl.BlockSpec((1, 1, 2, Cout), lambda b, t: (b, t, 0, 0)),
            ],
        ),
        compiler_params=pltpu.CompilerParams(
            dimension_semantics=("parallel", "parallel"),
            vmem_limit_bytes=vmem_limit),
    )(x_bf16, x_bf16, x_bf16, noise_bf16, wconv_bf16, bconv, noise_w, in_affine)


_SINGLE_BUFFER_OK = True


def _run_conv_stage(*args, **kw):
    """Try single-buffered constant operands; fall back if this jax/Mosaic
    version rejects pipeline_mode=pl.Buffered(1)."""
    global _SINGLE_BUFFER_OK
    if _SINGLE_BUFFER_OK:
        try:
            return _conv_stage(*args, single_buffer_consts=True, **kw)
        except Exception:
            _SINGLE_BUFFER_OK = False
    return _conv_stage(*args, single_buffer_consts=False, **kw)


def _finalize(prenorm_bf16, affine, tile_rows, *, vmem_limit):
    B, H, W, C = prenorm_bf16.shape
    TH = tile_rows
    T = H // TH
    return pl.pallas_call(
        _finalize_kernel,
        out_shape=jax.ShapeDtypeStruct((B, H, W, C), jnp.float32),
        grid_spec=pltpu.PrefetchScalarGridSpec(
            num_scalar_prefetch=0,
            grid=(B, T),
            in_specs=[
                pl.BlockSpec((1, TH, W, C), lambda b, t: (b, t, 0, 0)),
                pl.BlockSpec((1, 2, C), lambda b, t: (b, 0, 0)),
            ],
            out_specs=pl.BlockSpec((1, TH, W, C), lambda b, t: (b, t, 0, 0)),
        ),
        compiler_params=pltpu.CompilerParams(
            dimension_semantics=("parallel", "parallel"),
            vmem_limit_bytes=vmem_limit),
    )(prenorm_bf16, affine)


def _stats_to_affine(stats, style_scale, style_shift, n_pix):
    """Fold InstanceNorm (biased var, eps=1e-5) + AdaIN into y = a*x + b per (b,c)."""
    s = jnp.sum(stats, axis=1)                        # (B, 2, C): sum, sum of squares
    mean = s[:, 0, :] / n_pix
    var = jnp.maximum(s[:, 1, :] / n_pix - mean * mean, 0.0)
    istd = lax.rsqrt(var + 1e-5)
    a = style_scale * istd
    b = style_shift - style_scale * mean * istd
    return jnp.stack([a, b], axis=1)                  # (B, 2, C) f32


# ----------------------------------------------------------------------------
# Plain JAX glue
# ----------------------------------------------------------------------------
# TODO(synk): fuse the 2x bilinear upsample into the stage-1 conv kernel (DMA
#             low-res rows + fixed 0.25/0.75 lerp weights); for now it runs as
#             plain JAX in bf16 so it costs half the HBM of the previous f32 pass.
def upsample2x_bilinear_nhwc(x):
    """Matches nn.Upsample(scale_factor=2, mode='bilinear') (align_corners=False).
    Runs in the input dtype (bf16 on the kernel path, f32 in the reference)."""
    B, H, W, C = x.shape
    dt = x.dtype

    def coords(n):
        src = (jnp.arange(2 * n, dtype=jnp.float32) + 0.5) / 2.0 - 0.5
        src = jnp.maximum(src, 0.0)
        i0 = jnp.floor(src).astype(jnp.int32)
        i1 = jnp.minimum(i0 + 1, n - 1)
        f = (src - i0.astype(jnp.float32)).astype(dt)
        return i0, i1, f

    h0, h1, fh = coords(H)
    w0, w1, fw = coords(W)
    one = jnp.asarray(1.0, dt)
    xh = (x[:, h0] * (one - fh)[None, :, None, None]
          + x[:, h1] * fh[None, :, None, None])
    out = (xh[:, :, w0] * (one - fw)[None, None, :, None]
           + xh[:, :, w1] * fw[None, None, :, None])
    return out


def init_params(key, w_dim, inp_channel, out_channel, ksize=3):
    ks = jax.random.split(key, 7)

    def conv_init(k, cin, cout):
        fan_in = cin * ksize * ksize
        bound = 1.0 / jnp.sqrt(jnp.float32(fan_in))
        # torch layout (cout, cin, 3, 3) -> stored tap-major as (9, cin, cout)
        wt = jax.random.uniform(k, (ksize, ksize, cin, cout), jnp.float32, -bound, bound)
        return wt.reshape(ksize * ksize, cin, cout)

    def linear_init(k, din, dout):
        bound = 1.0 / jnp.sqrt(jnp.float32(din))
        k1, k2 = jax.random.split(k)
        wt = jax.random.uniform(k1, (din, dout), jnp.float32, -bound, bound)
        bt = jax.random.uniform(k2, (1, dout), jnp.float32, -bound, bound)
        return wt, bt

    bnd1 = 1.0 / jnp.sqrt(jnp.float32(inp_channel * ksize * ksize))
    bnd2 = 1.0 / jnp.sqrt(jnp.float32(out_channel * ksize * ksize))
    scale_w, scale_b = linear_init(ks[4], w_dim, out_channel)
    shift_w, shift_b = linear_init(ks[5], w_dim, out_channel)
    return dict(
        conv1_w=conv_init(ks[0], inp_channel, out_channel),
        conv1_b=jax.random.uniform(ks[1], (1, out_channel), jnp.float32, -bnd1, bnd1),
        conv2_w=conv_init(ks[2], out_channel, out_channel),
        conv2_b=jax.random.uniform(ks[3], (1, out_channel), jnp.float32, -bnd2, bnd2),
        # PyTorch initializes the Noise weight to zeros; use small nonzero values
        # here so the fused noise path is actually exercised (deterministic).
        noise_w=0.1 * jax.random.normal(ks[6], (1, out_channel), jnp.float32),
        scale_w=scale_w, scale_b=scale_b,
        shift_w=shift_w, shift_b=shift_b,
    )


def synthesis_block_forward(img_nchw, w, params, noise_key, tile_rows=None,
                            fold_output_affine=False):
    """Equivalent of synthesis_block.forward. img_nchw: (B, Cin, H, W), w: (B, w_dim).
    With fold_output_affine=True returns (prenorm_bf16_nhwc, affine) so chained
    blocks can skip the finalize pass and fold it into the next input affine.
    Note: channel counts that are not multiples of 128 under-fill the MXU; pad
    channels in the caller for best utilization (not needed for correctness)."""
    budget, vmem_limit = _vmem_config()

    x = jnp.transpose(img_nchw.astype(jnp.bfloat16), (0, 2, 3, 1))   # NCHW -> NHWC, bf16
    x = upsample2x_bilinear_nhwc(x)                                  # bf16 upsample
    B, H, W, Cin = x.shape
    Cout = params["conv1_b"].shape[-1]

    TH = tile_rows if tile_rows is not None else _pick_tile_rows(
        H, W, max(Cin, Cout), Cout, budget)
    assert H % TH == 0 and (TH % 8 == 0 or TH == H), (H, TH)
    n_pix = H * W

    k1, k2 = jax.random.split(noise_key)
    noise1 = jax.random.normal(k1, (B, H, W), jnp.float32)   # shared across channels
    noise2 = jax.random.normal(k2, (B, H, W), jnp.float32)
    nz1 = noise1.reshape(B, H * W, 1).astype(jnp.bfloat16)   # sublane-major feed
    nz2 = noise2.reshape(B, H * W, 1).astype(jnp.bfloat16)

    # AdaIN style linears hoisted out of the kernels; the PyTorch module shares
    # one AdaIN (and one Noise weight) across both conv stages.
    style_scale = w.astype(jnp.float32) @ params["scale_w"] + params["scale_b"]
    style_shift = w.astype(jnp.float32) @ params["shift_w"] + params["shift_b"]

    w1 = params["conv1_w"].astype(jnp.bfloat16)
    w2 = params["conv2_w"].astype(jnp.bfloat16)

    # Stage 1: identity input affine (the upsampled image is used as-is).
    ident = jnp.stack([jnp.ones((B, Cin), jnp.float32),
                       jnp.zeros((B, Cin), jnp.float32)], axis=1)    # (B, 2, Cin)
    pre1, st1 = _run_conv_stage(x, ident, w1, params["conv1_b"], params["noise_w"],
                                nz1, TH, vmem_limit=vmem_limit)

    # Stage 2 consumes stage-1's InstanceNorm+AdaIN folded into its input affine.
    aff1 = _stats_to_affine(st1, style_scale, style_shift, n_pix)    # (B, 2, Cout)
    pre2, st2 = _run_conv_stage(pre1, aff1, w2, params["conv2_b"], params["noise_w"],
                                nz2, TH, vmem_limit=vmem_limit)

    aff2 = _stats_to_affine(st2, style_scale, style_shift, n_pix)
    if fold_output_affine:
        return pre2, aff2

    out = _finalize(pre2, aff2, TH, vmem_limit=vmem_limit)           # (B, H, W, Cout) f32
    return jnp.transpose(out, (0, 3, 1, 2))                          # NHWC -> NCHW


# ----------------------------------------------------------------------------
# pure-JAX f32 reference (for the correctness cross-check)
# ----------------------------------------------------------------------------
def _reference_forward(img_nchw, w, params, noise1, noise2):
    x = jnp.transpose(img_nchw, (0, 2, 3, 1)).astype(jnp.float32)
    x = upsample2x_bilinear_nhwc(x)
    ss = w.astype(jnp.float32) @ params["scale_w"] + params["scale_b"]
    sh = w.astype(jnp.float32) @ params["shift_w"] + params["shift_b"]

    def stage(x, wc, bc, noise):
        k = wc.reshape(3, 3, x.shape[-1], -1)
        y = lax.conv_general_dilated(x, k, (1, 1), ((1, 1), (1, 1)),
                                     dimension_numbers=("NHWC", "HWIO", "NHWC"),
                                     precision=lax.Precision.HIGHEST)
        y = y + bc.reshape(1, 1, 1, -1)
        y = y + params["noise_w"].reshape(1, 1, 1, -1) * noise[..., None]
        y = jnp.where(y >= 0, y, 0.2 * y)
        mean = jnp.mean(y, axis=(1, 2), keepdims=True)
        var = jnp.mean(jnp.square(y - mean), axis=(1, 2), keepdims=True)
        yn = (y - mean) * lax.rsqrt(var + 1e-5)
        return ss[:, None, None, :] * yn + sh[:, None, None, :]

    x = stage(x, params["conv1_w"], params["conv1_b"], noise1)
    x = stage(x, params["conv2_w"], params["conv2_b"], noise2)
    return jnp.transpose(x, (0, 3, 1, 2))


if __name__ == "__main__":
    B, Cin, Cout, w_dim, H0 = 2, 4, 8, 16, 16   # small shapes (defaults are 512-ch)

    key = jax.random.PRNGKey(0)
    k_img, k_w, k_params, k_noise = jax.random.split(key, 4)
    img = jax.random.normal(k_img, (B, Cin, H0, H0), jnp.float32)
    w = jax.random.normal(k_w, (B, w_dim), jnp.float32)
    params = init_params(k_params, w_dim, Cin, Cout)

    # tile_rows=8 -> 4 row tiles per 32x32 image: exercises halo + partial-stats paths.
    out = synthesis_block_forward(img, w, params, k_noise, tile_rows=8)
    out = jax.block_until_ready(out)

    assert out.shape == (B, Cout, 2 * H0, 2 * H0), out.shape
    assert bool(jnp.all(jnp.isfinite(out)))

    # cross-check against the pure-JAX f32 reference (same noise draw as the kernels;
    # loose tolerance accounts for bf16 conv operands / epilogue / inter-stage storage).
    k1, k2 = jax.random.split(k_noise)
    n1 = jax.random.normal(k1, (B, 2 * H0, 2 * H0), jnp.float32)
    n2 = jax.random.normal(k2, (B, 2 * H0, 2 * H0), jnp.float32)
    ref = _reference_forward(img, w, params, n1, n2)
    max_err = float(jnp.max(jnp.abs(out - ref)))
    assert max_err < 0.5, max_err

    print("KERNEL_OK")
</pallas_src>

<mosaic_0001>
module attributes {stable_mosaic.version = 11 : i64} {
  func.func @k(%arg0: memref<10x32x8xbf16, #tpu.memory_space<vmem>>, %arg1: memref<10x32x8xbf16, #tpu.memory_space<vmem>>) attributes {dimension_semantics = [], scalar_prefetch = 0 : i64, scratch_operands = 0 : i64, tpu.core_type = #tpu.core_type<tc>} {
    %c0 = arith.constant 0 : index
    %c0_0 = arith.constant 0 : index
    %c0_1 = arith.constant 0 : index
    %0 = vector.load %arg0[%c0, %c0_0, %c0_1] : memref<10x32x8xbf16, #tpu.memory_space<vmem>>, vector<10x32x8xbf16>
    %c1_i32 = arith.constant 1 : i32
    %1 = tpu.dynamic_rotate %0 by %c1_i32 dim 1 : vector<10x32x8xbf16>, i32 -> vector<10x32x8xbf16>
    %c0_2 = arith.constant 0 : index
    %c0_3 = arith.constant 0 : index
    %c0_4 = arith.constant 0 : index
    %2 = vector.load %arg1[%c0_2, %c0_3, %c0_4] : memref<10x32x8xbf16, #tpu.memory_space<vmem>>, vector<10x32x8xbf16>
    tpu.vector_store %arg1[%c0_2, %c0_3, %c0_4], %1 {strides = array<i32>} : memref<10x32x8xbf16, #tpu.memory_space<vmem>>, vector<10x32x8xbf16>,
    return
  }
}

module attributes {stable_mosaic.version = 11 : i64} {
  func.func @_conv_stage_kernel(%arg0: i32, %arg1: i32, %arg2: memref<1x8x32x4xbf16, #tpu.memory_space<vmem>>, %arg3: memref<1x1x32x4xbf16, #tpu.memory_space<vmem>>, %arg4: memref<1x1x32x4xbf16, #tpu.memory_space<vmem>>, %arg5: memref<1x256x1xbf16, #tpu.memory_space<vmem>>, %arg6: memref<9x4x8xbf16, #tpu.memory_space<vmem>>, %arg7: memref<1x8xf32, #tpu.memory_space<vmem>>, %arg8: memref<1x8xf32, #tpu.memory_space<vmem>>, %arg9: memref<1x2x4xf32, #tpu.memory_space<vmem>>, %arg10: memref<1x8x32x8xbf16, #tpu.memory_space<vmem>>, %arg11: memref<1x1x2x8xf32, #tpu.memory_space<vmem>>) attributes {dimension_semantics = [#tpu.dimension_semantics<parallel>, #tpu.dimension_semantics<parallel>], iteration_bounds = array<i64: 2, 4>, scalar_prefetch = 0 : i64, scratch_operands = 0 : i64, tpu.core_type = #tpu.core_type<tc>, window_params = [{transform_indices = @transform_0, window_bounds = array<i64: 1, 8, 32, 4>}, {transform_indices = @transform_1, window_bounds = array<i64: 1, 1, 32, 4>}, {transform_indices = @transform_2, window_bounds = array<i64: 1, 1, 32, 4>}, {transform_indices = @transform_3, window_bounds = array<i64: 1, 256, 1>}, {pipeline_mode = #tpu.pipeline_mode<synchronous>, transform_indices = @transform_4, window_bounds = array<i64: 9, 4, 8>}, {pipeline_mode = #tpu.pipeline_mode<synchronous>, transform_indices = @transform_5, window_bounds = array<i64: 1, 8>}, {pipeline_mode = #tpu.pipeline_mode<synchronous>, transform_indices = @transform_6, window_bounds = array<i64: 1, 8>}, {transform_indices = @transform_7, window_bounds = array<i64: 1, 2, 4>}, {transform_indices = @transform_8, window_bounds = array<i64: 1, 8, 32, 8>}, {transform_indices = @transform_9, window_bounds = array<i64: 1, 1, 2, 8>}]} {
    %c0 = arith.constant 0 : index
    %c0_0 = arith.constant 0 : index
    %c0_1 = arith.constant 0 : index
    %0 = vector.load %arg9[%c0, %c0_0, %c0_1] : memref<1x2x4xf32, #tpu.memory_space<vmem>>, vector<1x2x4xf32>
    %1 = vector.shape_cast %0 : vector<1x2x4xf32> to vector<2x4xf32>
    %2 = vector.extract_strided_slice %1 {offsets = [0, 0], sizes = [1, 4], strides = [1, 1]} : vector<2x4xf32> to vector<1x4xf32>
    %3 = arith.truncf %2 : vector<1x4xf32> to vector<1x4xbf16>
    %4 = vector.extract_strided_slice %1 {offsets = [1, 0], sizes = [1, 4], strides = [1, 1]} : vector<2x4xf32> to vector<1x4xf32>
    %5 = arith.truncf %4 : vector<1x4xf32> to vector<1x4xbf16>
    %c0_i32 = arith.constant 0 : i32
    %6 = arith.cmpi sgt, %arg1, %c0_i32 : i32
    %cst = arith.constant 1.000000e+00 : f32
    %cst_2 = arith.constant 0.000000e+00 : f32
    %7 = arith.select %6, %cst, %cst_2 : f32
    %8 = arith.truncf %7 : f32 to bf16
    %c3_i32 = arith.constant 3 : i32
    %9 = arith.cmpi slt, %arg1, %c3_i32 : i32
    %cst_3 = arith.constant 1.000000e+00 : f32
    %cst_4 = arith.constant 0.000000e+00 : f32
    %10 = arith.select %9, %cst_3, %cst_4 : f32
    %11 = arith.truncf %10 : f32 to bf16
    %c0_5 = arith.constant 0 : index
    %c0_6 = arith.constant 0 : index
    %c0_7 = arith.constant 0 : index
    %c0_8 = arith.constant 0 : index
    %12 = vector.load %arg2[%c0_5, %c0_6, %c0_7, %c0_8] : memref<1x8x32x4xbf16, #tpu.memory_space<vmem>>, vector<1x8x32x4xbf16>
    %13 = vector.shape_cast %12 : vector<1x8x32x4xbf16> to vector<8x32x4xbf16>
    %14 = vector.shape_cast %3 : vector<1x4xbf16> to vector<1x1x4xbf16>
    %15 = vector.broadcast %14 : vector<1x1x4xbf16> to vector<8x32x4xbf16>
    %16 = arith.mulf %13, %15 : vector<8x32x4xbf16>
    %17 = vector.shape_cast %5 : vector<1x4xbf16> to vector<1x1x4xbf16>
    %18 = vector.broadcast %17 : vector<1x1x4xbf16> to vector<8x32x4xbf16>
    %19 = arith.addf %16, %18 : vector<8x32x4xbf16>
    %c0_9 = arith.constant 0 : index
    %c0_10 = arith.constant 0 : index
    %c0_11 = arith.constant 0 : index
    %c0_12 = arith.constant 0 : index
    %20 = vector.load %arg3[%c0_9, %c0_10, %c0_11, %c0_12] : memref<1x1x32x4xbf16, #tpu.memory_space<vmem>>, vector<1x1x32x4xbf16>
    %21 = vector.shape_cast %20 : vector<1x1x32x4xbf16> to vector<32x4xbf16>
    %22 = vector.broadcast %3 : vector<1x4xbf16> to vector<32x4xbf16>
    %23 = arith.mulf %21, %22 : vector<32x4xbf16>
    %24 = vector.broadcast %5 : vector<1x4xbf16> to vector<32x4xbf16>
    %25 = arith.addf %23, %24 : vector<32x4xbf16>
    %26 = vector.broadcast %8 : bf16 to vector<32x4xbf16>
    %27 = arith.mulf %25, %26 : vector<32x4xbf16>
    %c0_13 = arith.constant 0 : index
    %c0_14 = arith.constant 0 : index
    %c0_15 = arith.constant 0 : index
    %c0_16 = arith.constant 0 : index
    %28 = vector.load %arg4[%c0_13, %c0_14, %c0_15, %c0_16] : memref<1x1x32x4xbf16, #tpu.memory_space<vmem>>, vector<1x1x32x4xbf16>
    %29 = vector.shape_cast %28 : vector<1x1x32x4xbf16> to vector<32x4xbf16>
    %30 = vector.broadcast %3 : vector<1x4xbf16> to vector<32x4xbf16>
    %31 = arith.mulf %29, %30 : vector<32x4xbf16>
    %32 = vector.broadcast %5 : vector<1x4xbf16> to vector<32x4xbf16>
    %33 = arith.addf %31, %32 : vector<32x4xbf16>
    %34 = vector.broadcast %11 : bf16 to vector<32x4xbf16>
    %35 = arith.mulf %33, %34 : vector<32x4xbf16>
    %36 = vector.shape_cast %27 : vector<32x4xbf16> to vector<1x32x4xbf16>
    %37 = vector.shape_cast %35 : vector<32x4xbf16> to vector<1x32x4xbf16>
    %38 = tpu.concatenate %36, %19, %37 in 0 : vector<1x32x4xbf16>, vector<8x32x4xbf16>, vector<1x32x4xbf16> -> vector<10x32x4xbf16>
    %cst_17 = arith.constant 0.000000e+00 : bf16
    %39 = vector.broadcast %cst_17 : bf16 to vector<10x1x4xbf16>
    %40 = vector.extract_strided_slice %38 {offsets = [0, 0, 0], sizes = [10, 31, 4], strides = [1, 1, 1]} : vector<10x32x4xbf16> to vector<10x31x4xbf16>
    %41 = tpu.concatenate %39, %40 in 1 : vector<10x1x4xbf16>, vector<10x31x4xbf16> -> vector<10x32x4xbf16>
    %42 = vector.extract_strided_slice %38 {offsets = [0, 1, 0], sizes = [10, 31, 4], strides = [1, 1, 1]} : vector<10x32x4xbf16> to vector<10x31x4xbf16>
    %43 = tpu.concatenate %42, %39 in 1 : vector<10x31x4xbf16>, vector<10x1x4xbf16> -> vector<10x32x4xbf16>
    %cst_18 = arith.constant 0.000000e+00 : f32
    %44 = vector.broadcast %cst_18 : f32 to vector<256x8xf32>
    %45 = vector.extract_strided_slice %41 {offsets = [0, 0, 0], sizes = [8, 32, 4], strides = [1, 1, 1]} : vector<10x32x4xbf16> to vector<8x32x4xbf16>
    %46 = vector.shape_cast %45 : vector<8x32x4xbf16> to vector<256x4xbf16>
    %c0_19 = arith.constant 0 : index
    %c0_20 = arith.constant 0 : index
    %c0_21 = arith.constant 0 : index
    %47 = vector.load %arg6[%c0_19, %c0_20, %c0_21] : memref<9x4x8xbf16, #tpu.memory_space<vmem>>, vector<1x4x8xbf16>
    %48 = vector.shape_cast %47 : vector<1x4x8xbf16> to vector<4x8xbf16>
    %cst_22 = arith.constant dense<0.000000e+00> : vector<256x8xf32>
    %49 = tpu.matmul %46, %48, %cst_22 {dimension_numbers = #tpu.dot_dimension_numbers<[1], [0], [0], [1], [0, 0, 1, 1], [], []>} : vector<256x4xbf16>, vector<4x8xbf16>, vector<256x8xf32> -> vector<256x8xf32>
    %50 = arith.addf %44, %49 : vector<256x8xf32>
    %51 = vector.extract_strided_slice %38 {offsets = [0, 0, 0], sizes = [8, 32, 4], strides = [1, 1, 1]} : vector<10x32x4xbf16> to vector<8x32x4xbf16>
    %52 = vector.shape_cast %51 : vector<8x32x4xbf16> to vector<256x4xbf16>
    %c1 = arith.constant 1 : index
    %c0_23 = arith.constant 0 : index
    %c0_24 = arith.constant 0 : index
    %53 = vector.load %arg6[%c1, %c0_23, %c0_24] : memref<9x4x8xbf16, #tpu.memory_space<vmem>>, vector<1x4x8xbf16>
    %54 = vector.shape_cast %53 : vector<1x4x8xbf16> to vector<4x8xbf16>
    %cst_25 = arith.constant dense<0.000000e+00> : vector<256x8xf32>
    %55 = tpu.matmul %52, %54, %cst_25 {dimension_numbers = #tpu.dot_dimension_numbers<[1], [0], [0], [1], [0, 0, 1, 1], [], []>} : vector<256x4xbf16>, vector<4x8xbf16>, vector<256x8xf32> -> vector<256x8xf32>
    %56 = arith.addf %50, %55 : vector<256x8xf32>
    %57 = vector.extract_strided_slice %43 {offsets = [0, 0, 0], sizes = [8, 32, 4], strides = [1, 1, 1]} : vector<10x32x4xbf16> to vector<8x32x4xbf16>
    %58 = vector.shape_cast %57 : vector<8x32x4xbf16> to vector<256x4xbf16>
    %c2 = arith.constant 2 : index
    %c0_26 = arith.constant 0 : index
    %c0_27 = arith.constant 0 : index
    %59 = vector.load %arg6[%c2, %c0_26, %c0_27] : memref<9x4x8xbf16, #tpu.memory_space<vmem>>, vector<1x4x8xbf16>
    %60 = vector.shape_cast %59 : vector<1x4x8xbf16> to vector<4x8xbf16>
    %cst_28 = arith.constant dense<0.000000e+00> : vector<256x8xf32>
    %61 = tpu.matmul %58, %60, %cst_28 {dimension_numbers = #tpu.dot_dimension_numbers<[1], [0], [0], [1], [0, 0, 1, 1], [], []>} : vector<256x4xbf16>, vector<4x8xbf16>, vector<256x8xf32> -> vector<256x8xf32>
    %62 = arith.addf %56, %61 : vector<256x8xf32>
    %63 = vector.extract_strided_slice %41 {offsets = [1, 0, 0], sizes = [8, 32, 4], strides = [1, 1, 1]} : vector<10x32x4xbf16> to vector<8x32x4xbf16>
    %64 = vector.shape_cast %63 : vector<8x32x4xbf16> to vector<256x4xbf16>
    %c3 = arith.constant 3 : index
    %c0_29 = arith.constant 0 : index
    %c0_30 = arith.constant 0 : index
    %65 = vector.load %arg6[%c3, %c0_29, %c0_30] : memref<9x4x8xbf16, #tpu.memory_space<vmem>>, vector<1x4x8xbf16>
    %66 = vector.shape_cast %65 : vector<1x4x8xbf16> to vector<4x8xbf16>
    %cst_31 = arith.constant dense<0.000000e+00> : vector<256x8xf32>
    %67 = tpu.matmul %64, %66, %cst_31 {dimension_numbers = #tpu.dot_dimension_numbers<[1], [0], [0], [1], [0, 0, 1, 1], [], []>} : vector<256x4xbf16>, vector<4x8xbf16>, vector<256x8xf32> -> vector<256x8xf32>
    %68 = arith.addf %62, %67 : vector<256x8xf32>
    %69 = vector.extract_strided_slice %38 {offsets = [1, 0, 0], sizes = [8, 32, 4], strides = [1, 1, 1]} : vector<10x32x4xbf16> to vector<8x32x4xbf16>
    %70 = vector.shape_cast %69 : vector<8x32x4xbf16> to vector<256x4xbf16>
    %c4 = arith.constant 4 : index
    %c0_32 = arith.constant 0 : index
    %c0_33 = arith.constant 0 : index
    %71 = vector.load %arg6[%c4, %c0_32, %c0_33] : memref<9x4x8xbf16, #tpu.memory_space<vmem>>, vector<1x4x8xbf16>
    %72 = vector.shape_cast %71 : vector<1x4x8xbf16> to vector<4x8xbf16>
    %cst_34 = arith.constant dense<0.000000e+00> : vector<256x8xf32>
    %73 = tpu.matmul %70, %72, %cst_34 {dimension_numbers = #tpu.dot_dimension_numbers<[1], [0], [0], [1], [0, 0, 1, 1], [], []>} : vector<256x4xbf16>, vector<4x8xbf16>, vector<256x8xf32> -> vector<256x8xf32>
    %74 = arith.addf %68, %73 : vector<256x8xf32>
    %75 = vector.extract_strided_slice %43 {offsets = [1, 0, 0], sizes = [8, 32, 4], strides = [1, 1, 1]} : vector<10x32x4xbf16> to vector<8x32x4xbf16>
    %76 = vector.shape_cast %75 : vector<8x32x4xbf16> to vector<256x4xbf16>
    %c5 = arith.constant 5 : index
    %c0_35 = arith.constant 0 : index
    %c0_36 = arith.constant 0 : index
    %77 = vector.load %arg6[%c5, %c0_35, %c0_36] : memref<9x4x8xbf16, #tpu.memory_space<vmem>>, vector<1x4x8xbf16>
    %78 = vector.shape_cast %77 : vector<1x4x8xbf16> to vector<4x8xbf16>
    %cst_37 = arith.constant dense<0.000000e+00> : vector<256x8xf32>
    %79 = tpu.matmul %76, %78, %cst_37 {dimension_numbers = #tpu.dot_dimension_numbers<[1], [0], [0], [1], [0, 0, 1, 1], [], []>} : vector<256x4xbf16>, vector<4x8xbf16>, vector<256x8xf32> -> vector<256x8xf32>
    %80 = arith.addf %74, %79 : vector<256x8xf32>
    %81 = vector.extract_strided_slice %41 {offsets = [2, 0, 0], sizes = [8, 32, 4], strides = [1, 1, 1]} : vector<10x32x4xbf16> to vector<8x32x4xbf16>
    %82 = vector.shape_cast %81 : vector<8x32x4xbf16> to vector<256x4xbf16>
    %c6 = arith.constant 6 : index
    %c0_38 = arith.constant 0 : index
    %c0_39 = arith.constant 0 : index
    %83 = vector.load %arg6[%c6, %c0_38, %c0_39] : memref<9x4x8xbf16, #tpu.memory_space<vmem>>, vector<1x4x8xbf16>
    %84 = vector.shape_cast %83 : vector<1x4x8xbf16> to vector<4x8xbf16>
    %cst_40 = arith.constant dense<0.000000e+00> : vector<256x8xf32>
    %85 = tpu.matmul %82, %84, %cst_40 {dimension_numbers = #tpu.dot_dimension_numbers<[1], [0], [0], [1], [0, 0, 1, 1], [], []>} : vector<256x4xbf16>, vector<4x8xbf16>, vector<256x8xf32> -> vector<256x8xf32>
    %86 = arith.addf %80, %85 : vector<256x8xf32>
    %87 = vector.extract_strided_slice %38 {offsets = [2, 0, 0], sizes = [8, 32, 4], strides = [1, 1, 1]} : vector<10x32x4xbf16> to vector<8x32x4xbf16>
    %88 = vector.shape_cast %87 : vector<8x32x4xbf16> to vector<256x4xbf16>
    %c7 = arith.constant 7 : index
    %c0_41 = arith.constant 0 : index
    %c0_42 = arith.constant 0 : index
    %89 = vector.load %arg6[%c7, %c0_41, %c0_42] : memref<9x4x8xbf16, #tpu.memory_space<vmem>>, vector<1x4x8xbf16>
    %90 = vector.shape_cast %89 : vector<1x4x8xbf16> to vector<4x8xbf16>
    %cst_43 = arith.constant dense<0.000000e+00> : vector<256x8xf32>
    %91 = tpu.matmul %88, %90, %cst_43 {dimension_numbers = #tpu.dot_dimension_numbers<[1], [0], [0], [1], [0, 0, 1, 1], [], []>} : vector<256x4xbf16>, vector<4x8xbf16>, vector<256x8xf32> -> vector<256x8xf32>
    %92 = arith.addf %86, %91 : vector<256x8xf32>
    %93 = vector.extract_strided_slice %43 {offsets = [2, 0, 0], sizes = [8, 32, 4], strides = [1, 1, 1]} : vector<10x32x4xbf16> to vector<8x32x4xbf16>
    %94 = vector.shape_cast %93 : vector<8x32x4xbf16> to vector<256x4xbf16>
    %c8 = arith.constant 8 : index
    %c0_44 = arith.constant 0 : index
    %c0_45 = arith.constant 0 : index
    %95 = vector.load %arg6[%c8, %c0_44, %c0_45] : memref<9x4x8xbf16, #tpu.memory_space<vmem>>, vector<1x4x8xbf16>
    %96 = vector.shape_cast %95 : vector<1x4x8xbf16> to vector<4x8xbf16>
    %cst_46 = arith.constant dense<0.000000e+00> : vector<256x8xf32>
    %97 = tpu.matmul %94, %96, %cst_46 {dimension_numbers = #tpu.dot_dimension_numbers<[1], [0], [0], [1], [0, 0, 1, 1], [], []>} : vector<256x4xbf16>, vector<4x8xbf16>, vector<256x8xf32> -> vector<256x8xf32>
    %98 = arith.addf %92, %97 : vector<256x8xf32>
    %99 = arith.truncf %98 : vector<256x8xf32> to vector<256x8xbf16>
    %c0_47 = arith.constant 0 : index
    %c0_48 = arith.constant 0 : index
    %100 = vector.load %arg7[%c0_47, %c0_48] : memref<1x8xf32, #tpu.memory_space<vmem>>, vector<1x8xf32>
    %101 = arith.truncf %100 : vector<1x8xf32> to vector<1x8xbf16>
    %102 = vector.broadcast %101 : vector<1x8xbf16> to vector<256x8xbf16>
    %103 = arith.addf %99, %102 : vector<256x8xbf16>
    %c0_49 = arith.constant 0 : index
    %c0_50 = arith.constant 0 : index
    %c0_51 = arith.constant 0 : index
    %104 = vector.load %arg5[%c0_49, %c0_50, %c0_51] : memref<1x256x1xbf16, #tpu.memory_space<vmem>>, vector<1x256x1xbf16>
    %105 = vector.shape_cast %104 : vector<1x256x1xbf16> to vector<256x1xbf16>
    %c0_52 = arith.constant 0 : index
    %c0_53 = arith.constant 0 : index
    %106 = vector.load %arg8[%c0_52, %c0_53] : memref<1x8xf32, #tpu.memory_space<vmem>>, vector<1x8xf32>
    %107 = arith.truncf %106 : vector<1x8xf32> to vector<1x8xbf16>
    %108 = vector.broadcast %105 : vector<256x1xbf16> to vector<256x8xbf16>
    %109 = vector.broadcast %107 : vector<1x8xbf16> to vector<256x8xbf16>
    %110 = arith.mulf %108, %109 : vector<256x8xbf16>
    %111 = arith.addf %103, %110 : vector<256x8xbf16>
    %cst_54 = arith.constant 0.000000e+00 : bf16
    %112 = vector.broadcast %cst_54 : bf16 to vector<256x8xbf16>
    %113 = arith.cmpf oge, %111, %112 : vector<256x8xbf16>
    %cst_55 = arith.constant 2.001950e-01 : bf16
    %114 = vector.broadcast %cst_55 : bf16 to vector<256x8xbf16>
    %115 = arith.mulf %111, %114 : vector<256x8xbf16>
    %116 = arith.select %113, %111, %115 : vector<256x8xi1>, vector<256x8xbf16>
    %117 = arith.extf %116 : vector<256x8xbf16> to vector<256x8xf32>
    %cst_56 = arith.constant dense<0.000000e+00> : vector<8xf32>
    %118 = vector.multi_reduction <add>, %117, %cst_56 [0] : vector<256x8xf32> to vector<8xf32>
    %119 = vector.shape_cast %118 : vector<8xf32> to vector<1x8xf32>
    %120 = arith.mulf %117, %117 : vector<256x8xf32>
    %cst_57 = arith.constant dense<0.000000e+00> : vector<8xf32>
    %121 = vector.multi_reduction <add>, %120, %cst_57 [0] : vector<256x8xf32> to vector<8xf32>
    %122 = vector.shape_cast %121 : vector<8xf32> to vector<1x8xf32>
    %123 = tpu.concatenate %119, %122 in 0 : vector<1x8xf32>, vector<1x8xf32> -> vector<2x8xf32>
    %c0_58 = arith.constant 0 : index
    %c0_59 = arith.constant 0 : index
    %c0_60 = arith.constant 0 : index
    %c0_61 = arith.constant 0 : index
    %124 = vector.load %arg11[%c0_58, %c0_59, %c0_60, %c0_61] : memref<1x1x2x8xf32, #tpu.memory_space<vmem>>, vector<1x1x2x8xf32>
    %125 = vector.shape_cast %124 : vector<1x1x2x8xf32> to vector<2x8xf32>
    %126 = vector.shape_cast %123 : vector<2x8xf32> to vector<1x1x2x8xf32>
    tpu.vector_store %arg11[%c0_58, %c0_59, %c0_60, %c0_61], %126 {strides = array<i32>} : memref<1x1x2x8xf32, #tpu.memory_space<vmem>>, vector<1x1x2x8xf32>,
    %127 = vector.shape_cast %116 : vector<256x8xbf16> to vector<8x32x8xbf16>
    %c0_62 = arith.constant 0 : index
    %c0_63 = arith.constant 0 : index
    %c0_64 = arith.constant 0 : index
    %c0_65 = arith.constant 0 : index
    %128 = vector.load %arg10[%c0_62, %c0_63, %c0_64, %c0_65] : memref<1x8x32x8xbf16, #tpu.memory_space<vmem>>, vector<1x8x32x8xbf16>
    %129 = vector.shape_cast %128 : vector<1x8x32x8xbf16> to vector<8x32x8xbf16>
    %130 = vector.shape_cast %127 : vector<8x32x8xbf16> to vector<1x8x32x8xbf16>
    tpu.vector_store %arg10[%c0_62, %c0_63, %c0_64, %c0_65], %130 {strides = array<i32>} : memref<1x8x32x8xbf16, #tpu.memory_space<vmem>>, vector<1x8x32x8xbf16>,
    return
  }
  func.func @transform_0(%arg0: i32, %arg1: i32) -> (i32, i32, i32, i32) {
    %c0_i32 = arith.constant 0 : i32
    %c0_i32_0 = arith.constant 0 : i32
    %c0_i32_1 = arith.constant 0 : i32
    return %arg0, %arg1, %c0_i32, %c0_i32_0 : i32, i32, i32, i32
  }
  func.func @transform_1(%arg0: i32, %arg1: i32) -> (i32, i32, i32, i32) {
    %c8_i32 = arith.constant 8 : i32
    %0 = arith.muli %arg1, %c8_i32 : i32
    %c1_i32 = arith.constant 1 : i32
    %1 = arith.subi %0, %c1_i32 : i32
    %c0_i32 = arith.constant 0 : i32
    %2 = arith.maxsi %1, %c0_i32 : i32
    %c0_i32_0 = arith.constant 0 : i32
    %c0_i32_1 = arith.constant 0 : i32
    %c0_i32_2 = arith.constant 0 : i32
    return %arg0, %2, %c0_i32_0, %c0_i32_1 : i32, i32, i32, i32
  }
  func.func @transform_2(%arg0: i32, %arg1: i32) -> (i32, i32, i32, i32) {
    %c8_i32 = arith.constant 8 : i32
    %0 = arith.muli %arg1, %c8_i32 : i32
    %c8_i32_0 = arith.constant 8 : i32
    %1 = arith.addi %0, %c8_i32_0 : i32
    %c31_i32 = arith.constant 31 : i32
    %2 = arith.minsi %1, %c31_i32 : i32
    %c0_i32 = arith.constant 0 : i32
    %c0_i32_1 = arith.constant 0 : i32
    %c0_i32_2 = arith.constant 0 : i32
    return %arg0, %2, %c0_i32, %c0_i32_1 : i32, i32, i32, i32
  }
  func.func @transform_3(%arg0: i32, %arg1: i32) -> (i32, i32, i32) {
    %c0_i32 = arith.constant 0 : i32
    %c0_i32_0 = arith.constant 0 : i32
    return %arg0, %arg1, %c0_i32 : i32, i32, i32
  }
  func.func @transform_4(%arg0: i32, %arg1: i32) -> (i32, i32, i32) {
    %c0_i32 = arith.constant 0 : i32
    %c0_i32_0 = arith.constant 0 : i32
    %c0_i32_1 = arith.constant 0 : i32
    %c0_i32_2 = arith.constant 0 : i32
    return %c0_i32, %c0_i32_0, %c0_i32_1 : i32, i32, i32
  }
  func.func @transform_5(%arg0: i32, %arg1: i32) -> (i32, i32) {
    %c0_i32 = arith.constant 0 : i32
    %c0_i32_0 = arith.constant 0 : i32
    %c0_i32_1 = arith.constant 0 : i32
    return %c0_i32, %c0_i32_0 : i32, i32
  }
  func.func @transform_6(%arg0: i32, %arg1: i32) -> (i32, i32) {
    %c0_i32 = arith.constant 0 : i32
    %c0_i32_0 = arith.constant 0 : i32
    %c0_i32_1 = arith.constant 0 : i32
    return %c0_i32, %c0_i32_0 : i32, i32
  }
  func.func @transform_7(%arg0: i32, %arg1: i32) -> (i32, i32, i32) {
    %c0_i32 = arith.constant 0 : i32
    %c0_i32_0 = arith.constant 0 : i32
    %c0_i32_1 = arith.constant 0 : i32
    return %arg0, %c0_i32, %c0_i32_0 : i32, i32, i32
  }
  func.func @transform_8(%arg0: i32, %arg1: i32) -> (i32, i32, i32, i32) {
    %c0_i32 = arith.constant 0 : i32
    %c0_i32_0 = arith.constant 0 : i32
    %c0_i32_1 = arith.constant 0 : i32
    return %arg0, %arg1, %c0_i32, %c0_i32_0 : i32, i32, i32, i32
  }
  func.func @transform_9(%arg0: i32, %arg1: i32) -> (i32, i32, i32, i32) {
    %c0_i32 = arith.constant 0 : i32
    %c0_i32_0 = arith.constant 0 : i32
    %c0_i32_1 = arith.constant 0 : i32
    return %arg0, %arg1, %c0_i32, %c0_i32_0 : i32, i32, i32, i32
  }
}

module attributes {stable_mosaic.version = 11 : i64} {
  func.func @_conv_stage_kernel(%arg0: i32, %arg1: i32, %arg2: memref<1x8x32x4xbf16, #tpu.memory_space<vmem>>, %arg3: memref<1x1x32x4xbf16, #tpu.memory_space<vmem>>, %arg4: memref<1x1x32x4xbf16, #tpu.memory_space<vmem>>, %arg5: memref<1x256x1xbf16, #tpu.memory_space<vmem>>, %arg6: memref<9x4x8xbf16, #tpu.memory_space<vmem>>, %arg7: memref<1x8xf32, #tpu.memory_space<vmem>>, %arg8: memref<1x8xf32, #tpu.memory_space<vmem>>, %arg9: memref<1x2x4xf32, #tpu.memory_space<vmem>>, %arg10: memref<1x8x32x8xbf16, #tpu.memory_space<vmem>>, %arg11: memref<1x1x2x8xf32, #tpu.memory_space<vmem>>) attributes {dimension_semantics = [#tpu.dimension_semantics<parallel>, #tpu.dimension_semantics<parallel>], iteration_bounds = array<i64: 2, 4>, scalar_prefetch = 0 : i64, scratch_operands = 0 : i64, tpu.core_type = #tpu.core_type<tc>, window_params = [{transform_indices = @transform_0, window_bounds = array<i64: 1, 8, 32, 4>}, {transform_indices = @transform_1, window_bounds = array<i64: 1, 1, 32, 4>}, {transform_indices = @transform_2, window_bounds = array<i64: 1, 1, 32, 4>}, {transform_indices = @transform_3, window_bounds = array<i64: 1, 256, 1>}, {pipeline_mode = #tpu.pipeline_mode<synchronous>, transform_indices = @transform_4, window_bounds = array<i64: 9, 4, 8>}, {pipeline_mode = #tpu.pipeline_mode<synchronous>, transform_indices = @transform_5, window_bounds = array<i64: 1, 8>}, {pipeline_mode = #tpu.pipeline_mode<synchronous>, transform_indices = @transform_6, window_bounds = array<i64: 1, 8>}, {transform_indices = @transform_7, window_bounds = array<i64: 1, 2, 4>}, {transform_indices = @transform_8, window_bounds = array<i64: 1, 8, 32, 8>}, {transform_indices = @transform_9, window_bounds = array<i64: 1, 1, 2, 8>}]} {
    %c0 = arith.constant 0 : index
    %c0_0 = arith.constant 0 : index
    %c0_1 = arith.constant 0 : index
    %0 = vector.load %arg9[%c0, %c0_0, %c0_1] : memref<1x2x4xf32, #tpu.memory_space<vmem>>, vector<1x2x4xf32>
    %1 = vector.shape_cast %0 : vector<1x2x4xf32> to vector<2x4xf32>
    %2 = vector.extract_strided_slice %1 {offsets = [0, 0], sizes = [1, 4], strides = [1, 1]} : vector<2x4xf32> to vector<1x4xf32>
    %3 = arith.truncf %2 : vector<1x4xf32> to vector<1x4xbf16>
    %4 = vector.extract_strided_slice %1 {offsets = [1, 0], sizes = [1, 4], strides = [1, 1]} : vector<2x4xf32> to vector<1x4xf32>
    %5 = arith.truncf %4 : vector<1x4xf32> to vector<1x4xbf16>
    %c0_i32 = arith.constant 0 : i32
    %6 = arith.cmpi sgt, %arg1, %c0_i32 : i32
    %cst = arith.constant 1.000000e+00 : f32
    %cst_2 = arith.constant 0.000000e+00 : f32
    %7 = arith.select %6, %cst, %cst_2 : f32
    %8 = arith.truncf %7 : f32 to bf16
    %c3_i32 = arith.constant 3 : i32
    %9 = arith.cmpi slt, %arg1, %c3_i32 : i32
    %cst_3 = arith.constant 1.000000e+00 : f32
    %cst_4 = arith.constant 0.000000e+00 : f32
    %10 = arith.select %9, %cst_3, %cst_4 : f32
    %11 = arith.truncf %10 : f32 to bf16
    %c0_5 = arith.constant 0 : index
    %c0_6 = arith.constant 0 : index
    %c0_7 = arith.constant 0 : index
    %c0_8 = arith.constant 0 : index
    %12 = vector.load %arg2[%c0_5, %c0_6, %c0_7, %c0_8] : memref<1x8x32x4xbf16, #tpu.memory_space<vmem>>, vector<1x8x32x4xbf16>
    %13 = vector.shape_cast %12 : vector<1x8x32x4xbf16> to vector<8x32x4xbf16>
    %14 = vector.shape_cast %3 : vector<1x4xbf16> to vector<1x1x4xbf16>
    %15 = vector.broadcast %14 : vector<1x1x4xbf16> to vector<8x32x4xbf16>
    %16 = arith.mulf %13, %15 : vector<8x32x4xbf16>
    %17 = vector.shape_cast %5 : vector<1x4xbf16> to vector<1x1x4xbf16>
    %18 = vector.broadcast %17 : vector<1x1x4xbf16> to vector<8x32x4xbf16>
    %19 = arith.addf %16, %18 : vector<8x32x4xbf16>
    %c0_9 = arith.constant 0 : index
    %c0_10 = arith.constant 0 : index
    %c0_11 = arith.constant 0 : index
    %c0_12 = arith.constant 0 : index
    %20 = vector.load %arg3[%c0_9, %c0_10, %c0_11, %c0_12] : memref<1x1x32x4xbf16, #tpu.memory_space<vmem>>, vector<1x1x32x4xbf16>
    %21 = vector.shape_cast %20 : vector<1x1x32x4xbf16> to vector<32x4xbf16>
    %22 = vector.broadcast %3 : vector<1x4xbf16> to vector<32x4xbf16>
    %23 = arith.mulf %21, %22 : vector<32x4xbf16>
    %24 = vector.broadcast %5 : vector<1x4xbf16> to vector<32x4xbf16>
    %25 = arith.addf %23, %24 : vector<32x4xbf16>
    %26 = vector.broadcast %8 : bf16 to vector<32x4xbf16>
    %27 = arith.mulf %25, %26 : vector<32x4xbf16>
    %c0_13 = arith.constant 0 : index
    %c0_14 = arith.constant 0 : index
    %c0_15 = arith.constant 0 : index
    %c0_16 = arith.constant 0 : index
    %28 = vector.load %arg4[%c0_13, %c0_14, %c0_15, %c0_16] : memref<1x1x32x4xbf16, #tpu.memory_space<vmem>>, vector<1x1x32x4xbf16>
    %29 = vector.shape_cast %28 : vector<1x1x32x4xbf16> to vector<32x4xbf16>
    %30 = vector.broadcast %3 : vector<1x4xbf16> to vector<32x4xbf16>
    %31 = arith.mulf %29, %30 : vector<32x4xbf16>
    %32 = vector.broadcast %5 : vector<1x4xbf16> to vector<32x4xbf16>
    %33 = arith.addf %31, %32 : vector<32x4xbf16>
    %34 = vector.broadcast %11 : bf16 to vector<32x4xbf16>
    %35 = arith.mulf %33, %34 : vector<32x4xbf16>
    %36 = vector.shape_cast %27 : vector<32x4xbf16> to vector<1x32x4xbf16>
    %37 = vector.shape_cast %35 : vector<32x4xbf16> to vector<1x32x4xbf16>
    %38 = tpu.concatenate %36, %19, %37 in 0 : vector<1x32x4xbf16>, vector<8x32x4xbf16>, vector<1x32x4xbf16> -> vector<10x32x4xbf16>
    %cst_17 = arith.constant 0.000000e+00 : bf16
    %39 = vector.broadcast %cst_17 : bf16 to vector<10x1x4xbf16>
    %40 = vector.extract_strided_slice %38 {offsets = [0, 0, 0], sizes = [10, 31, 4], strides = [1, 1, 1]} : vector<10x32x4xbf16> to vector<10x31x4xbf16>
    %41 = tpu.concatenate %39, %40 in 1 : vector<10x1x4xbf16>, vector<10x31x4xbf16> -> vector<10x32x4xbf16>
    %42 = vector.extract_strided_slice %38 {offsets = [0, 1, 0], sizes = [10, 31, 4], strides = [1, 1, 1]} : vector<10x32x4xbf16> to vector<10x31x4xbf16>
    %43 = tpu.concatenate %42, %39 in 1 : vector<10x31x4xbf16>, vector<10x1x4xbf16> -> vector<10x32x4xbf16>
    %cst_18 = arith.constant 0.000000e+00 : f32
    %44 = vector.broadcast %cst_18 : f32 to vector<256x8xf32>
    %45 = vector.extract_strided_slice %41 {offsets = [0, 0, 0], sizes = [8, 32, 4], strides = [1, 1, 1]} : vector<10x32x4xbf16> to vector<8x32x4xbf16>
    %46 = vector.shape_cast %45 : vector<8x32x4xbf16> to vector<256x4xbf16>
    %c0_19 = arith.constant 0 : index
    %c0_20 = arith.constant 0 : index
    %c0_21 = arith.constant 0 : index
    %47 = vector.load %arg6[%c0_19, %c0_20, %c0_21] : memref<9x4x8xbf16, #tpu.memory_space<vmem>>, vector<1x4x8xbf16>
    %48 = vector.shape_cast %47 : vector<1x4x8xbf16> to vector<4x8xbf16>
    %cst_22 = arith.constant dense<0.000000e+00> : vector<256x8xf32>
    %49 = tpu.matmul %46, %48, %cst_22 {dimension_numbers = #tpu.dot_dimension_numbers<[1], [0], [0], [1], [0, 0, 1, 1], [], []>} : vector<256x4xbf16>, vector<4x8xbf16>, vector<256x8xf32> -> vector<256x8xf32>
    %50 = arith.addf %44, %49 : vector<256x8xf32>
    %51 = vector.extract_strided_slice %38 {offsets = [0, 0, 0], sizes = [8, 32, 4], strides = [1, 1, 1]} : vector<10x32x4xbf16> to vector<8x32x4xbf16>
    %52 = vector.shape_cast %51 : vector<8x32x4xbf16> to vector<256x4xbf16>
    %c1 = arith.constant 1 : index
    %c0_23 = arith.constant 0 : index
    %c0_24 = arith.constant 0 : index
    %53 = vector.load %arg6[%c1, %c0_23, %c0_24] : memref<9x4x8xbf16, #tpu.memory_space<vmem>>, vector<1x4x8xbf16>
    %54 = vector.shape_cast %53 : vector<1x4x8xbf16> to vector<4x8xbf16>
    %cst_25 = arith.constant dense<0.000000e+00> : vector<256x8xf32>
    %55 = tpu.matmul %52, %54, %cst_25 {dimension_numbers = #tpu.dot_dimension_numbers<[1], [0], [0], [1], [0, 0, 1, 1], [], []>} : vector<256x4xbf16>, vector<4x8xbf16>, vector<256x8xf32> -> vector<256x8xf32>
    %56 = arith.addf %50, %55 : vector<256x8xf32>
    %57 = vector.extract_strided_slice %43 {offsets = [0, 0, 0], sizes = [8, 32, 4], strides = [1, 1, 1]} : vector<10x32x4xbf16> to vector<8x32x4xbf16>
    %58 = vector.shape_cast %57 : vector<8x32x4xbf16> to vector<256x4xbf16>
    %c2 = arith.constant 2 : index
    %c0_26 = arith.constant 0 : index
    %c0_27 = arith.constant 0 : index
    %59 = vector.load %arg6[%c2, %c0_26, %c0_27] : memref<9x4x8xbf16, #tpu.memory_space<vmem>>, vector<1x4x8xbf16>
    %60 = vector.shape_cast %59 : vector<1x4x8xbf16> to vector<4x8xbf16>
    %cst_28 = arith.constant dense<0.000000e+00> : vector<256x8xf32>
    %61 = tpu.matmul %58, %60, %cst_28 {dimension_numbers = #tpu.dot_dimension_numbers<[1], [0], [0], [1], [0, 0, 1, 1], [], []>} : vector<256x4xbf16>, vector<4x8xbf16>, vector<256x8xf32> -> vector<256x8xf32>
    %62 = arith.addf %56, %61 : vector<256x8xf32>
    %63 = vector.extract_strided_slice %41 {offsets = [1, 0, 0], sizes = [8, 32, 4], strides = [1, 1, 1]} : vector<10x32x4xbf16> to vector<8x32x4xbf16>
    %64 = vector.shape_cast %63 : vector<8x32x4xbf16> to vector<256x4xbf16>
    %c3 = arith.constant 3 : index
    %c0_29 = arith.constant 0 : index
    %c0_30 = arith.constant 0 : index
    %65 = vector.load %arg6[%c3, %c0_29, %c0_30] : memref<9x4x8xbf16, #tpu.memory_space<vmem>>, vector<1x4x8xbf16>
    %66 = vector.shape_cast %65 : vector<1x4x8xbf16> to vector<4x8xbf16>
    %cst_31 = arith.constant dense<0.000000e+00> : vector<256x8xf32>
    %67 = tpu.matmul %64, %66, %cst_31 {dimension_numbers = #tpu.dot_dimension_numbers<[1], [0], [0], [1], [0, 0, 1, 1], [], []>} : vector<256x4xbf16>, vector<4x8xbf16>, vector<256x8xf32> -> vector<256x8xf32>
    %68 = arith.addf %62, %67 : vector<256x8xf32>
    %69 = vector.extract_strided_slice %38 {offsets = [1, 0, 0], sizes = [8, 32, 4], strides = [1, 1, 1]} : vector<10x32x4xbf16> to vector<8x32x4xbf16>
    %70 = vector.shape_cast %69 : vector<8x32x4xbf16> to vector<256x4xbf16>
    %c4 = arith.constant 4 : index
    %c0_32 = arith.constant 0 : index
    %c0_33 = arith.constant 0 : index
    %71 = vector.load %arg6[%c4, %c0_32, %c0_33] : memref<9x4x8xbf16, #tpu.memory_space<vmem>>, vector<1x4x8xbf16>
    %72 = vector.shape_cast %71 : vector<1x4x8xbf16> to vector<4x8xbf16>
    %cst_34 = arith.constant dense<0.000000e+00> : vector<256x8xf32>
    %73 = tpu.matmul %70, %72, %cst_34 {dimension_numbers = #tpu.dot_dimension_numbers<[1], [0], [0], [1], [0, 0, 1, 1], [], []>} : vector<256x4xbf16>, vector<4x8xbf16>, vector<256x8xf32> -> vector<256x8xf32>
    %74 = arith.addf %68, %73 : vector<256x8xf32>
    %75 = vector.extract_strided_slice %43 {offsets = [1, 0, 0], sizes = [8, 32, 4], strides = [1, 1, 1]} : vector<10x32x4xbf16> to vector<8x32x4xbf16>
    %76 = vector.shape_cast %75 : vector<8x32x4xbf16> to vector<256x4xbf16>
    %c5 = arith.constant 5 : index
    %c0_35 = arith.constant 0 : index
    %c0_36 = arith.constant 0 : index
    %77 = vector.load %arg6[%c5, %c0_35, %c0_36] : memref<9x4x8xbf16, #tpu.memory_space<vmem>>, vector<1x4x8xbf16>
    %78 = vector.shape_cast %77 : vector<1x4x8xbf16> to vector<4x8xbf16>
    %cst_37 = arith.constant dense<0.000000e+00> : vector<256x8xf32>
    %79 = tpu.matmul %76, %78, %cst_37 {dimension_numbers = #tpu.dot_dimension_numbers<[1], [0], [0], [1], [0, 0, 1, 1], [], []>} : vector<256x4xbf16>, vector<4x8xbf16>, vector<256x8xf32> -> vector<256x8xf32>
    %80 = arith.addf %74, %79 : vector<256x8xf32>
    %81 = vector.extract_strided_slice %41 {offsets = [2, 0, 0], sizes = [8, 32, 4], strides = [1, 1, 1]} : vector<10x32x4xbf16> to vector<8x32x4xbf16>
    %82 = vector.shape_cast %81 : vector<8x32x4xbf16> to vector<256x4xbf16>
    %c6 = arith.constant 6 : index
    %c0_38 = arith.constant 0 : index
    %c0_39 = arith.constant 0 : index
    %83 = vector.load %arg6[%c6, %c0_38, %c0_39] : memref<9x4x8xbf16, #tpu.memory_space<vmem>>, vector<1x4x8xbf16>
    %84 = vector.shape_cast %83 : vector<1x4x8xbf16> to vector<4x8xbf16>
    %cst_40 = arith.constant dense<0.000000e+00> : vector<256x8xf32>
    %85 = tpu.matmul %82, %84, %cst_40 {dimension_numbers = #tpu.dot_dimension_numbers<[1], [0], [0], [1], [0, 0, 1, 1], [], []>} : vector<256x4xbf16>, vector<4x8xbf16>, vector<256x8xf32> -> vector<256x8xf32>
    %86 = arith.addf %80, %85 : vector<256x8xf32>
    %87 = vector.extract_strided_slice %38 {offsets = [2, 0, 0], sizes = [8, 32, 4], strides = [1, 1, 1]} : vector<10x32x4xbf16> to vector<8x32x4xbf16>
    %88 = vector.shape_cast %87 : vector<8x32x4xbf16> to vector<256x4xbf16>
    %c7 = arith.constant 7 : index
    %c0_41 = arith.constant 0 : index
    %c0_42 = arith.constant 0 : index
    %89 = vector.load %arg6[%c7, %c0_41, %c0_42] : memref<9x4x8xbf16, #tpu.memory_space<vmem>>, vector<1x4x8xbf16>
    %90 = vector.shape_cast %89 : vector<1x4x8xbf16> to vector<4x8xbf16>
    %cst_43 = arith.constant dense<0.000000e+00> : vector<256x8xf32>
    %91 = tpu.matmul %88, %90, %cst_43 {dimension_numbers = #tpu.dot_dimension_numbers<[1], [0], [0], [1], [0, 0, 1, 1], [], []>} : vector<256x4xbf16>, vector<4x8xbf16>, vector<256x8xf32> -> vector<256x8xf32>
    %92 = arith.addf %86, %91 : vector<256x8xf32>
    %93 = vector.extract_strided_slice %43 {offsets = [2, 0, 0], sizes = [8, 32, 4], strides = [1, 1, 1]} : vector<10x32x4xbf16> to vector<8x32x4xbf16>
    %94 = vector.shape_cast %93 : vector<8x32x4xbf16> to vector<256x4xbf16>
    %c8 = arith.constant 8 : index
    %c0_44 = arith.constant 0 : index
    %c0_45 = arith.constant 0 : index
    %95 = vector.load %arg6[%c8, %c0_44, %c0_45] : memref<9x4x8xbf16, #tpu.memory_space<vmem>>, vector<1x4x8xbf16>
    %96 = vector.shape_cast %95 : vector<1x4x8xbf16> to vector<4x8xbf16>
    %cst_46 = arith.constant dense<0.000000e+00> : vector<256x8xf32>
    %97 = tpu.matmul %94, %96, %cst_46 {dimension_numbers = #tpu.dot_dimension_numbers<[1], [0], [0], [1], [0, 0, 1, 1], [], []>} : vector<256x4xbf16>, vector<4x8xbf16>, vector<256x8xf32> -> vector<256x8xf32>
    %98 = arith.addf %92, %97 : vector<256x8xf32>
    %99 = arith.truncf %98 : vector<256x8xf32> to vector<256x8xbf16>
    %c0_47 = arith.constant 0 : index
    %c0_48 = arith.constant 0 : index
    %100 = vector.load %arg7[%c0_47, %c0_48] : memref<1x8xf32, #tpu.memory_space<vmem>>, vector<1x8xf32>
    %101 = arith.truncf %100 : vector<1x8xf32> to vector<1x8xbf16>
    %102 = vector.broadcast %101 : vector<1x8xbf16> to vector<256x8xbf16>
    %103 = arith.addf %99, %102 : vector<256x8xbf16>
    %c0_49 = arith.constant 0 : index
    %c0_50 = arith.constant 0 : index
    %c0_51 = arith.constant 0 : index
    %104 = vector.load %arg5[%c0_49, %c0_50, %c0_51] : memref<1x256x1xbf16, #tpu.memory_space<vmem>>, vector<1x256x1xbf16>
    %105 = vector.shape_cast %104 : vector<1x256x1xbf16> to vector<256x1xbf16>
    %c0_52 = arith.constant 0 : index
    %c0_53 = arith.constant 0 : index
    %106 = vector.load %arg8[%c0_52, %c0_53] : memref<1x8xf32, #tpu.memory_space<vmem>>, vector<1x8xf32>
    %107 = arith.truncf %106 : vector<1x8xf32> to vector<1x8xbf16>
    %108 = vector.broadcast %105 : vector<256x1xbf16> to vector<256x8xbf16>
    %109 = vector.broadcast %107 : vector<1x8xbf16> to vector<256x8xbf16>
    %110 = arith.mulf %108, %109 : vector<256x8xbf16>
    %111 = arith.addf %103, %110 : vector<256x8xbf16>
    %cst_54 = arith.constant 0.000000e+00 : bf16
    %112 = vector.broadcast %cst_54 : bf16 to vector<256x8xbf16>
    %113 = arith.cmpf oge, %111, %112 : vector<256x8xbf16>
    %cst_55 = arith.constant 2.001950e-01 : bf16
    %114 = vector.broadcast %cst_55 : bf16 to vector<256x8xbf16>
    %115 = arith.mulf %111, %114 : vector<256x8xbf16>
    %116 = arith.select %113, %111, %115 : vector<256x8xi1>, vector<256x8xbf16>
    %117 = arith.extf %116 : vector<256x8xbf16> to vector<256x8xf32>
    %cst_56 = arith.constant dense<0.000000e+00> : vector<8xf32>
    %118 = vector.multi_reduction <add>, %117, %cst_56 [0] : vector<256x8xf32> to vector<8xf32>
    %119 = vector.shape_cast %118 : vector<8xf32> to vector<1x8xf32>
    %120 = arith.mulf %117, %117 : vector<256x8xf32>
    %cst_57 = arith.constant dense<0.000000e+00> : vector<8xf32>
    %121 = vector.multi_reduction <add>, %120, %cst_57 [0] : vector<256x8xf32> to vector<8xf32>
    %122 = vector.shape_cast %121 : vector<8xf32> to vector<1x8xf32>
    %123 = tpu.concatenate %119, %122 in 0 : vector<1x8xf32>, vector<1x8xf32> -> vector<2x8xf32>
    %c0_58 = arith.constant 0 : index
    %c0_59 = arith.constant 0 : index
    %c0_60 = arith.constant 0 : index
    %c0_61 = arith.constant 0 : index
    %124 = vector.load %arg11[%c0_58, %c0_59, %c0_60, %c0_61] : memref<1x1x2x8xf32, #tpu.memory_space<vmem>>, vector<1x1x2x8xf32>
    %125 = vector.shape_cast %124 : vector<1x1x2x8xf32> to vector<2x8xf32>
    %126 = vector.shape_cast %123 : vector<2x8xf32> to vector<1x1x2x8xf32>
    tpu.vector_store %arg11[%c0_58, %c0_59, %c0_60, %c0_61], %126 {strides = array<i32>} : memref<1x1x2x8xf32, #tpu.memory_space<vmem>>, vector<1x1x2x8xf32>,
    %127 = vector.shape_cast %116 : vector<256x8xbf16> to vector<8x32x8xbf16>
    %c0_62 = arith.constant 0 : index
    %c0_63 = arith.constant 0 : index
    %c0_64 = arith.constant 0 : index
    %c0_65 = arith.constant 0 : index
    %128 = vector.load %arg10[%c0_62, %c0_63, %c0_64, %c0_65] : memref<1x8x32x8xbf16, #tpu.memory_space<vmem>>, vector<1x8x32x8xbf16>
    %129 = vector.shape_cast %128 : vector<1x8x32x8xbf16> to vector<8x32x8xbf16>
    %130 = vector.shape_cast %127 : vector<8x32x8xbf16> to vector<1x8x32x8xbf16>
    tpu.vector_store %arg10[%c0_62, %c0_63, %c0_64, %c0_65], %130 {strides = array<i32>} : memref<1x8x32x8xbf16, #tpu.memory_space<vmem>>, vector<1x8x32x8xbf16>,
    return
  }
  func.func @transform_0(%arg0: i32, %arg1: i32) -> (i32, i32, i32, i32) {
    %c0_i32 = arith.constant 0 : i32
    %c0_i32_0 = arith.constant 0 : i32
    %c0_i32_1 = arith.constant 0 : i32
    return %arg0, %arg1, %c0_i32, %c0_i32_0 : i32, i32, i32, i32
  }
  func.func @transform_1(%arg0: i32, %arg1: i32) -> (i32, i32, i32, i32) {
    %c8_i32 = arith.constant 8 : i32
    %0 = arith.muli %arg1, %c8_i32 : i32
    %c1_i32 = arith.constant 1 : i32
    %1 = arith.subi %0, %c1_i32 : i32
    %c0_i32 = arith.constant 0 : i32
    %2 = arith.maxsi %1, %c0_i32 : i32
    %c0_i32_0 = arith.constant 0 : i32
    %c0_i32_1 = arith.constant 0 : i32
    %c0_i32_2 = arith.constant 0 : i32
    return %arg0, %2, %c0_i32_0, %c0_i32_1 : i32, i32, i32, i32
  }
  func.func @transform_2(%arg0: i32, %arg1: i32) -> (i32, i32, i32, i32) {
    %c8_i32 = arith.constant 8 : i32
    %0 = arith.muli %arg1, %c8_i32 : i32
    %c8_i32_0 = arith.constant 8 : i32
    %1 = arith.addi %0, %c8_i32_0 : i32
    %c31_i32 = arith.constant 31 : i32
    %2 = arith.minsi %1, %c31_i32 : i32
    %c0_i32 = arith.constant 0 : i32
    %c0_i32_1 = arith.constant 0 : i32
    %c0_i32_2 = arith.constant 0 : i32
    return %arg0, %2, %c0_i32, %c0_i32_1 : i32, i32, i32, i32
  }
  func.func @transform_3(%arg0: i32, %arg1: i32) -> (i32, i32, i32) {
    %c0_i32 = arith.constant 0 : i32
    %c0_i32_0 = arith.constant 0 : i32
    return %arg0, %arg1, %c0_i32 : i32, i32, i32
  }
  func.func @transform_4(%arg0: i32, %arg1: i32) -> (i32, i32, i32) {
    %c0_i32 = arith.constant 0 : i32
    %c0_i32_0 = arith.constant 0 : i32
    %c0_i32_1 = arith.constant 0 : i32
    %c0_i32_2 = arith.constant 0 : i32
    return %c0_i32, %c0_i32_0, %c0_i32_1 : i32, i32, i32
  }
  func.func @transform_5(%arg0: i32, %arg1: i32) -> (i32, i32) {
    %c0_i32 = arith.constant 0 : i32
    %c0_i32_0 = arith.constant 0 : i32
    %c0_i32_1 = arith.constant 0 : i32
    return %c0_i32, %c0_i32_0 : i32, i32
  }
  func.func @transform_6(%arg0: i32, %arg1: i32) -> (i32, i32) {
    %c0_i32 = arith.constant 0 : i32
    %c0_i32_0 = arith.constant 0 : i32
    %c0_i32_1 = arith.constant 0 : i32
    return %c0_i32, %c0_i32_0 : i32, i32
  }
  func.func @transform_7(%arg0: i32, %arg1: i32) -> (i32, i32, i32) {
    %c0_i32 = arith.constant 0 : i32
    %c0_i32_0 = arith.constant 0 : i32
    %c0_i32_1 = arith.constant 0 : i32
    return %arg0, %c0_i32, %c0_i32_0 : i32, i32, i32
  }
  func.func @transform_8(%arg0: i32, %arg1: i32) -> (i32, i32, i32, i32) {
    %c0_i32 = arith.constant 0 : i32
    %c0_i32_0 = arith.constant 0 : i32
    %c0_i32_1 = arith.constant 0 : i32
    return %arg0, %arg1, %c0_i32, %c0_i32_0 : i32, i32, i32, i32
  }
  func.func @transform_9(%arg0: i32, %arg1: i32) -> (i32, i32, i32, i32) {
    %c0_i32 = arith.constant 0 : i32
    %c0_i32_0 = arith.constant 0 : i32
    %c0_i32_1 = arith.constant 0 : i32
    return %arg0, %arg1, %c0_i32, %c0_i32_0 : i32, i32, i32, i32
  }
}

</mosaic_0001>

<bundles_post_ra>
// kernel: tpu_custom_call.1
= control target key start
LH: loop header
LB: loop body
LE: loop exit
PB: predicated region body
PF: predicated region fallthrough
CT: control target
= control target key end

     0   :  { %15 = vsyncpa [#allocation3], 0  ;;  %s7055_s0 = inlined_call_operand.vmem [shape: bf16[2,32,32,4], index: 0, kind: input, shape index: {}]   ;;  %s7056_s1 = inlined_call_operand.vmem [shape: bf16[2,32,32,4], index: 1, kind: input, shape index: {}]   ;;  %s7057_s2 = inlined_call_operand.vmem [shape: bf16[2,32,32,4], index: 2, kind: input, shape index: {}]   ;;  %s7058_s3 = inlined_call_operand.vmem [shape: bf16[2,1024,1], index: 3, kind: input, shape index: {}]   ;;  %s7059_s4 = inlined_call_operand.vmem [shape: bf16[9,4,8], index: 4, kind: input, shape index: {}]   ;;  %s7060_s5 = inlined_call_operand.vmem [shape: f32[1,8], index: 5, kind: input, shape index: {}]   ;;  %s7061_s6 = inlined_call_operand.vmem [shape: f32[1,8], index: 6, kind: input, shape index: {}]   ;;  %s7062_s7 = inlined_call_operand.vmem [shape: f32[2,2,4], index: 7, kind: input, shape index: {}]   ;;  %s7063_s8 = inlined_call_operand.vmem [shape: bf16[2,32,32,8], index: 8, kind: output, shape index: {0}]   ;;  %s7064_s9 = inlined_call_operand.hbm [shape: f32[2,4,2,8], index: 9, kind: output, shape index: {1}]  }
   0x1   :  { %17 = vsyncpa [#allocation3 + $0x1], 0  ;;  %s5439_s30 = smov 0   ;;  %s5441_s10 = smov 0  }
   0x2   :  { %s5443_s11 = smov 0   ;;  %s5445_s12 = smov 0  }
   0x3   :  { %s5447_s13 = smov 0   ;;  %s5449_s14 = smov 0  }
   0x4   :  { %s5451_s15 = smov 0   ;;  %s5453_s16 = smov 0  }
   0x5 LB: > { %7100 = sst [smem:[#allocation5_spill]] %s5376_s14  ;;  %s4217_s17 = sadd.s32 4294967295, %s5384_s16   ;;  %s5384_s16 = sphi %s5453_s16, %s23_s16   ;;  %s5380_s15 = sphi %s5451_s15, %s7163_s15   ;;  %s5376_s14 = sphi %s5449_s14, %s7162_s14   ;;  %s5372_s13 = sphi %s5447_s13, %s7161_s13   ;;  %s5368_s12 = sphi %s5445_s12, %s7160_s12   ;;  %s5364_s11 = sphi %s5443_s11, %s7166_s11   ;;  %s5360_s10 = sphi %s5441_s10, %s7165_s10   ;;  %s5356_s30 = sphi %s5439_s30, %s7164_s30  }
   0x6   : > { %7101 = sst [smem:[#allocation6_spill]] %s5380_s15  ;;  %s4218_s18 = sadd.s32 4294967294, %s5384_s16  }
   0x7   : > { %s32_s19 = sadd.s32 1, %s5376_s14  ;;  %s35_s20 = sadd.s32 1, %s5380_s15 }
   0x8   : > { %p33_p0 = scmp.ge.s32.totalorder %s32_s19, 4  ;;  %p299_p1 = scmp.ne.s32.totalorder %s5364_s11, %s5360_s10 }
   0x9   : > { %p300_p2 = scmp.eq.s32.totalorder %s4217_s17, 7  ;;  %p305_p5 = scmp.ne.s32.totalorder %s5360_s10, %s5356_s30 }
   0xa   : > { %s7168_s19 = smov (%p33_p0, %s32_s19), 0  ;;  %s7170_s20 = smov (!%p33_p0, %s35_s20), %s5380_s15 }
   0xb   : > { %7102 = sst [smem:[#allocation7_spill]] %s7168_s19  ;;  %s285_s21 = ssub.s32 %s5376_s14, %s7168_s19 }
   0xc   : > { %p5490_p3 = por %p300_p2, %p299_p1  ;;  %p37_p4 = scmp.ge.s32.totalorder %s7170_s20, 2 }
   0xd   : > { %p306_p6 = scmp.eq.s32.totalorder %s4218_s18, 7  ;;  %p4227_p7 = scmp.ge.s32.totalorder %s5384_s16, 1 }
   0xe   : > { %s7172_s20 = smov (%p37_p4, %s7170_s20), 0  ;;  %p407_p9 = scmp.lt.s32.totalorder %s5384_s16, 9 }
   0xf   : > { %7104 = sst [smem:[#allocation8_spill]] %s7172_s20  ;;  %p5499_p8 = por %p306_p6, %p305_p5 }
  0x10   : > { %s284_s24 = ssub.s32 %s5380_s15, %s7172_s20  ;;  %s289_s25 = sadd.s32 1, %s5364_s11 }
  0x11   : > { %s286_s26 = sor.u32 %s285_s21, %s284_s24  ;;  %p408_p10 = pnand %p4227_p7, %p407_p9 }
  0x12   : > { %p287_p11 = scmp.eq.s32.totalorder %s286_s26, 0 }
  0x13   : > { %411 = sbr.rel (%p408_p10) target bundleno = 624 (0x270), region = 52 }
  0x14   : > { %s5508_s27 = scalar_select %p287_p11, %s5364_s11, %s289_s25  }
  0x16   : > { %7106 = sst [smem:[#allocation9_spill]] %s5508_s27 }
  0x1a   : > { %vm1135_vm0 = vcmask 1041408   ;;  %v5513_v0 = vld [vmem:[%s7059_s4 + $0x8] sm:$0x3]  ;;  %v4280_v1 = vld [vmem:[%s7059_s4 + $0x2] sm:$0x3]  ;;  %s5519_s20 = sshll.u32 %s5368_s12, 3  ;;  %v630_v2 = vlaneseq }
  0x1b   : > { %5209 = vmatprep.subr.msk.bf16.mxu0 %vm1135_vm0, %v5513_v0  ;;  %5205 = vmatprep.subr.msk.bf16.mxu1 %vm1135_vm0, %v4280_v1  ;;  %v5526_v3 = vsel %vm1135_vm0, %v5513_v0, 0  ;;  %v1137_v4 = vsel %vm1135_vm0, %v4280_v1, 0  ;;  %p498_p12 = scmp.lt.s32.totalorder %s5372_s13, 1  ;;  %p500_p13 = scmp.lt.s32.totalorder %s5519_s20, 31  ;;  %v5539_v5 = vld [vmem:[%s7059_s4] sm:$0x3] }
  0x1c   : > { %4778 = vmatpush3.bf16.msra.mxu0 %v5526_v3  ;;  %4642 = vmatpush3.bf16.msra.mxu1 %v1137_v4  ;;  %s5533_s21 = sadd.s32 4294967295, %s5519_s20  ;;  %v5544_v6 = vld [vmem:[%s7059_s4 + $0xa] sm:$0x3]  ;;  %v5547_v7 = vshrl.u32 %v630_v2, 7  ;;  %p571_p2 = scmp.gt.s32.totalorder %s5368_s12, 0  ;;  %vm1102_vm1 = vcmask 31744  }
  0x1d   : > { %s499_s24 = scalar_select %p498_p12, %s5372_s13, 1  ;;  %5206 = vmatprep.subr.msk.bf16.mxu1 %vm1135_vm0, %v5539_v5  ;;  %5211 = vmatprep.subr.msk.bf16.mxu0 %vm1135_vm0, %v5544_v6  ;;  %v2173_v53 = vsel %vm1135_vm0, %v5544_v6, 0  ;;  %v5640_v58 = vld [vmem:[%s7059_s4 + $0xc] sm:$0x3]  ;;  %vm1026_vm2 = vsmask.f32 7424 }
  0x1e   : > { %s501_s17 = scalar_select %p500_p13, %s5519_s20, 31  ;;  %7107 = vst [vmem:[#allocation10_spill] sm:$0xff] %v5547_v7  ;;  %v5564_v10 = vsub.s32 0, %v5547_v7  ;;  %vm1087_vm3 = vcmask 1047552   ;;  %vm853_vm5 = vsmask.f32 256 }
  0x1f   : > { %s5553_s18 = sshll.u32 %s499_s24, 7  ;;  %s4253_s25 = sshll.u32 %s499_s24, 1  ;;  %vm5761_vm4 = vmand %vm1087_vm3, %vm1026_vm2  ;;  %vm1014_vm6 = vcmask 1040384   ;;  %vm3672_vm10 = vcmask 64512   ;;  %vm3959_vm11 = vcmask 60416  }
  0x20   : > { %s4230_s26 = sshll.u32 %s501_s17, 2  ;;  %s555_s19 = scalar_lea.vmem %s7062_s7, %s4253_s25  ;;  %7108 = vst [vmem:[#allocation11_spill] sm:$0xff] %v5564_v10  ;;  %vm5989_vm7 = vmand %vm1014_vm6, %vm853_vm5 }
  0x21   : > { %s5559_s15 = sadd.s32 %s5553_s18, %s4230_s26  ;;  %v569_v8 = vld [vmem:[%s555_s19] sm:$0x3]  ;;  %p510_p0 = scmp.gt.s32.totalorder %s5533_s21, 0 }
  0x22   : > { %s4232_s14 = sshll.u32 %s5559_s15, 2  ;;  %v570_v9 = vpack.c.bf16 %v569_v8, %v569_v8  ;;  %p4235_p1 = scmp.lt.s32.totalorder %s5533_s21, 31 }
  0x23   : > { %s5572_s17 = scalar_lea.vmem %s7055_s0, %s4232_s14  ;;  %s7174_s21 = smov (!%p510_p0, %s5533_s21), 0 }
  0x24   : > { %v628_v11 = vpack.i.b16 %v570_v9, %v570_v9  ;;  %v670_v12 = vshrl.u32 %v570_v9, 16  ;;  %v595_v13 = vld [vmem:[%s5572_s17] sm:$0xf]  ;;  %v596_v14 = vld [vmem:[%s5572_s17 + $0x4] sm:$0xf]  ;;  %s7176_s21 = smov (!%p4235_p1, %s7174_s21), 31 }
  0x25   : > { %v597_v17 = vld [vmem:[%s5572_s17 + $0x8] sm:$0xf]  ;;  %v598_v18 = vld [vmem:[%s5572_s17 + $0xc] sm:$0xf]  ;;  %s5581_s19 = scalar_select %p571_p2, 1.0, 0.0 }
  0x26   : > { %v633_v15 = vrot.slane %v628_v11, %v5564_v10  ;;  %v671_v16 = vpack.i.b16 %v670_v12, %v670_v12  ;;  %v599_v19 = vld [vmem:[%s5572_s17 + $0x10] sm:$0xf]  ;;  %s4240_s27 = sshll.u32 %s7176_s21, 2  ;;  %v600_v22 = vld [vmem:[%s5572_s17 + $0x14] sm:$0xf]  ;;  %p583_p5 = scmp.lt.s32.totalorder %s5368_s12, 3 }
  0x27   : > { %v601_v23 = vld [vmem:[%s5572_s17 + $0x18] sm:$0xf]  ;;  %s518_s25 = sadd.s32 %s4240_s27, %s5553_s18  ;;  %p574_p4 = scmp.ne.f32.partialorder %s5581_s19, %s5581_s19  ;;  %v602_v24 = vld [vmem:[%s5572_s17 + $0x1c] sm:$0xf]  ;;  %v603_v49 = vld [vmem:[%s5572_s17 + $0x20] sm:$0xf] }
  0x28   : > { %v5584_v20 = vcombine.low %v633_v15, %v633_v15  ;;  %v676_v21 = vrot.slane %v671_v16, %v5564_v10  ;;  %s4242_s26 = sshll.u32 %s518_s25, 2  ;;  %s575_s28 = sshrl.u32 %s5581_s19, 16  ;;  %v604_v50 = vld [vmem:[%s5572_s17 + $0x24] sm:$0xf]  ;;  %v605_v63 = vld [vmem:[%s5572_s17 + $0x28] sm:$0xf] }
  0x29   : > { %s520_s24 = scalar_lea.vmem %s7056_s1, %s4242_s26  ;;  %s576_s27 = sand.u32 1, %s575_s28  ;;  %v606_v1 = vld [vmem:[%s5572_s17 + $0x2c] sm:$0xf]  ;;  %v607_v6 = vld [vmem:[%s5572_s17 + $0x30] sm:$0xf] }
  0x2a   : > { %v638_v25 = vmul.bf16 %v5584_v20, %v595_v13  ;;  %v639_v26 = vmul.bf16 %v5584_v20, %v596_v14  ;;  %v5595_v27 = vcombine.low %v676_v21, %v676_v21  ;;  %v640_v28 = vmul.bf16 %v5584_v20, %v597_v17  ;;  %s577_s25 = sadd.s32 32767, %s576_s27  ;;  %v713_v36 = vld [vmem:[%s520_s24] sm:$0xf]  ;;  %v714_v37 = vld [vmem:[%s520_s24 + $0x4] sm:$0xf] }
  0x2b   : > { %v641_v29 = vmul.bf16 %v5584_v20, %v598_v18  ;;  %v642_v30 = vmul.bf16 %v5584_v20, %v599_v19  ;;  %v643_v31 = vmul.bf16 %v5584_v20, %v600_v22  ;;  %v644_v32 = vmul.bf16 %v5584_v20, %v601_v23  ;;  %s578_s26 = sadd.s32 %s577_s25, %s5581_s19  ;;  %v715_v42 = vld [vmem:[%s520_s24 + $0x8] sm:$0xf]  ;;  %v716_v43 = vld [vmem:[%s520_s24 + $0xc] sm:$0xf]  ;;  %v608_v8 = vld [vmem:[%s5572_s17 + $0x34] sm:$0xf] }
  0x2c   : > { %v681_v33 = vadd.bf16 %v5595_v27, %v638_v25  ;;  %v682_v34 = vadd.bf16 %v5595_v27, %v639_v26  ;;  %v683_v35 = vadd.bf16 %v5595_v27, %v640_v28  ;;  %v645_v38 = vmul.bf16 %v5584_v20, %v602_v24  ;;  %s579_s28 = sand.u32 4294901760, %s578_s26  ;;  %v5681_v28 = vld [vmem:[%s7059_s4 + $0x4] sm:$0x3] }
  0x2d   : > { %v684_v39 = vadd.bf16 %v5595_v27, %v641_v29  ;;  %v717_v40 = vmul.bf16 %v5584_v20, %v713_v36  ;;  %v718_v41 = vmul.bf16 %v5584_v20, %v714_v37  ;;  %v685_v44 = vadd.bf16 %v5595_v27, %v642_v30  ;;  %s7178_s28 = smov (%p574_p4, %s579_s28), 2143289344  ;;  %v609_v30 = vld [vmem:[%s5572_s17 + $0x38] sm:$0xf] }
  0x2e   : > { %v5615_v45 = vcombine.low %v681_v33, %v682_v34  ;;  %v719_v46 = vmul.bf16 %v5584_v20, %v715_v42  ;;  %v720_v47 = vmul.bf16 %v5584_v20, %v716_v43  ;;  %v686_v48 = vadd.bf16 %v5595_v27, %v643_v31  ;;  %s582_s29 = sshrl.u32 %s7178_s28, 16  ;;  %v610_v31 = vld [vmem:[%s5572_s17 + $0x3c] sm:$0xf]  ;;  %s526_s28 = sadd.s32 8, %s5519_s20 }
  0x2f   : > { %v5622_v51 = vcombine.low %v683_v35, %v684_v39  ;;  %v721_v52 = vadd.bf16 %v5595_v27, %v717_v40  ;;  %v722_v54 = vadd.bf16 %v5595_v27, %v718_v41  ;;  %v687_v56 = vadd.bf16 %v5595_v27, %v644_v32  ;;  %s725_s24 = sshll.u32 %s582_s29, 16  ;;  %p5739_p6 = scmp.lt.s32.totalorder %s526_s28, 31 }
  0x30   : > { %4779 = vmatprep.mubr.msk.bf16.mxu0 %vm1102_vm1, %v5615_v45  ;;  %v5633_v55 = vcombine.low %v685_v44, %v686_v48  ;;  %v688_v57 = vadd.bf16 %v5595_v27, %v645_v38  ;;  %v723_v59 = vadd.bf16 %v5595_v27, %v719_v46  ;;  %v724_v60 = vadd.bf16 %v5595_v27, %v720_v47  ;;  %s726_s27 = sor.u32 %s725_s24, %s582_s29  ;;  %v621_v47 = vld [vmem:[%s5572_s17 + $0x68] sm:$0xf]  ;;  %v622_v48 = vld [vmem:[%s5572_s17 + $0x6c] sm:$0xf] }
  0x31   : > { %4780 = vmatmul.mubr.msk.bf16.vlgmr.msra.gmra.mrb[0].mxu0 %vm1102_vm1, %v5622_v51  ;;  %v646_v61 = vmul.bf16 %v5584_v20, %v603_v49  ;;  %v647_v62 = vmul.bf16 %v5584_v20, %v604_v50  ;;  %v727_v9 = vstv %s726_s27  ;;  %v648_v12 = vmul.bf16 %v5584_v20, %v605_v63  ;;  %s5728_s19 = scalar_select %p583_p5, 1.0, 0.0 }
  0x32   : > { %4812 = vmatpush3.bf16.msra.mxu0 %v2173_v53  ;;  %4783 = vmatprep.mubr.msk.bf16.mxu0 %vm1102_vm1, %v5633_v55  ;;  %v5658_v11 = vcombine.low %v687_v56, %v688_v57  ;;  %v649_v13 = vmul.bf16 %v5584_v20, %v606_v1  ;;  %v729_v14 = vmul.bf16 %v727_v9, %v721_v52  ;;  %v1349_v24 = vsel %vm1135_vm0, %v5539_v5, 0  ;;  %s7180_s28 = smov (!%p5739_p6, %s526_s28), 31 }
  0x33   : > { %v689_v2 = vadd.bf16 %v5595_v27, %v646_v61  ;;  %v690_v4 = vadd.bf16 %v5595_v27, %v647_v62  ;;  %5212 = vmatprep.subr.msk.bf16.mxu0 %vm1135_vm0, %v5640_v58  ;;  %v730_v15 = vmul.bf16 %v727_v9, %v722_v54  ;;  %v731_v16 = vmul.bf16 %v727_v9, %v723_v59  ;;  %v612_v61 = vld [vmem:[%s5572_s17 + $0x44] sm:$0xf]  ;;  %s587_s21 = sshrl.u32 %s5728_s19, 16  ;;  %s7182_s28 = smov (!%p5739_p6, %s7180_s28), 31 }
  0x34   : > { %v732_v17 = vmul.bf16 %v727_v9, %v724_v60  ;;  %v650_v19 = vmul.bf16 %v5584_v20, %v607_v6  ;;  %v651_v21 = vmul.bf16 %v5584_v20, %v608_v8  ;;  %v691_v25 = vadd.bf16 %v5595_v27, %v648_v12  ;;  %v611_v60 = vld [vmem:[%s5572_s17 + $0x40] sm:$0xf]  ;;  %s588_s29 = sand.u32 1, %s587_s21  ;;  %s5840_s20 = sshll.u32 %s7182_s28, 2 }
  0x35   : > { %v5662_v18 = vcombine.low %v689_v2, %v690_v4  ;;  %v5666_v22 = vcombine.low %v729_v14, %v730_v15  ;;  %v692_v26 = vadd.bf16 %v5595_v27, %v649_v13  ;;  %v873_v32 = vshll.u32 %v5615_v45, 16  ;;  %s589_s25 = sadd.s32 32767, %s588_s29  ;;  %p586_p7 = scmp.ne.f32.partialorder %s5728_s19, %s5728_s19 }
  0x36   : > { %v5668_v23 = vcombine.low %v731_v16, %v732_v17  ;;  %v693_v5 = vadd.bf16 %v5595_v27, %v650_v19  ;;  %v694_v29 = vadd.bf16 %v5595_v27, %v651_v21  ;;  %v652_v34 = vmul.bf16 %v5584_v20, %v609_v30  ;;  %s5823_s26 = sadd.s32 %s589_s25, %s5728_s19  ;;  %s535_s28 = sadd.s32 %s5840_s20, %s5553_s18 }
  0x37   : > { %4643 = vmatprep.mubr.msk.bf16.mxu1 %vm1102_vm1, %v5666_v22  ;;  %v5696_v33 = vcombine.low %v691_v25, %v692_v26  ;;  %v653_v35 = vmul.bf16 %v5584_v20, %v610_v31  ;;  %v870_v37 = vshrl.u32 %v5615_v45, 16  ;;  %v880_v38 = vshll.u32 %v5622_v51, 16  ;;  %v5796_v25 = vld [vmem:[%s7059_s4 + $0xe] sm:$0x3]  ;;  %s591_s21 = sand.u32 4294901760, %s5823_s26 }
  0x38   : > { %4644 = vmatmul.mubr.msk.bf16.vlgmr.msra.gmra.mrb[0].mxu1 %vm1102_vm1, %v5668_v23  ;;  %v5700_v36 = vcombine.low %v693_v5, %v694_v29  ;;  %v1032_v39 = vrot.slane %v873_v32, 1  ;;  %v695_v40 = vadd.bf16 %v5595_v27, %v652_v34  ;;  %v888_v44 = vshll.u32 %v5633_v55, 16  ;;  %v613_v5 = vld [vmem:[%s5572_s17 + $0x48] sm:$0xf]  ;;  %v614_v29 = vld [vmem:[%s5572_s17 + $0x4c] sm:$0xf] }
  0x39   : > { %4784 = vmatmul.mubr.msk.bf16.gmra.mrb[4].mxu0 %vm1102_vm1, %v5658_v11  ;;  %4676 = vmatpush3.bf16.msra.mxu1 %v1349_v24  ;;  %v696_v41 = vadd.bf16 %v5595_v27, %v653_v35  ;;  %v1034_v43 = vrot.slane %v880_v38, 1  ;;  %v877_v49 = vshrl.u32 %v5622_v51, 16  ;;  %v885_v52 = vshrl.u32 %v5633_v55, 16  ;;  %v615_v34 = vld [vmem:[%s5572_s17 + $0x50] sm:$0xf]  ;;  %s7184_s21 = smov (%p586_p7, %s591_s21), 2143289344 }
  0x3a   : > { %4787 = vmatprep.mubr.msk.bf16.mxu0 %vm1102_vm1, %v5662_v18  ;;  %4647 = vmatprep.mubr.msk.bf16.mxu1 %vm1102_vm1, %v5615_v45  ;;  %v1033_v42 = vor.u32 %v1032_v39, %v870_v37  ;;  %v7079_v53 = vshll.u32 %v5658_v11, 16  ;;  %v1037_v54 = vrot.slane %v888_v44, 1  ;;  %v664_v56 = vmul.bf16 %v5584_v20, %v621_v47  ;;  %v616_v35 = vld [vmem:[%s5572_s17 + $0x54] sm:$0xf]  ;;  %s594_s19 = sshrl.u32 %s7184_s21, 16 }
  0x3b   : > { %5207 = vmatprep.subr.msk.bf16.mxu1 %vm1135_vm0, %v5681_v28  ;;  %v5722_v46 = vcombine.low %v695_v40, %v696_v41  ;;  %v665_v57 = vmul.bf16 %v5584_v20, %v622_v48  ;;  %v1036_v59 = vor.u32 %v1034_v43, %v877_v49  ;;  %v7078_v62 = vshll.u32 %v5662_v18, 16  ;;  %v623_v40 = vld [vmem:[%s5572_s17 + $0x70] sm:$0xf]  ;;  %v624_v41 = vld [vmem:[%s5572_s17 + $0x74] sm:$0xf]  ;;  %s745_s25 = sshll.u32 %s594_s19, 16 }
  0x3c   : > { %v5731_v50 = vsel %vm1026_vm2, %v1033_v42, %v1034_v43  ;;  %v707_v63 = vadd.bf16 %v5595_v27, %v664_v56  ;;  %v1038_v4 = vor.u32 %v1037_v54, %v885_v52  ;;  %v1039_v6 = vrot.slane %v7079_v53, 1  ;;  %v625_v48 = vld [vmem:[%s5572_s17 + $0x78] sm:$0xf]  ;;  %v626_v54 = vld [vmem:[%s5572_s17 + $0x7c] sm:$0xf]  ;;  %s746_s26 = sor.u32 %s745_s25, %s594_s19  ;;  %s4250_s19 = sshll.u32 %s5368_s12, 5 }
  0x3d   : > { %v708_v1 = vadd.bf16 %v5595_v27, %v665_v57  ;;  %v892_v8 = vshrl.u32 %v5658_v11, 16  ;;  %v654_v12 = vmul.bf16 %v5584_v20, %v611_v60  ;;  %v655_v13 = vmul.bf16 %v5584_v20, %v612_v61  ;;  %p545_p9 = scmp.lt.s32.totalorder %s4250_s19, 127 }
  0x3e   : > { %v5780_v14 = vsel %vm5761_vm4, %v1036_v59, 0  ;;  %v900_v15 = vshrl.u32 %v5662_v18, 16  ;;  %v7075_v16 = vshll.u32 %v5696_v33, 16  ;;  %v1042_v17 = vrot.slane %v7078_v62, 1 }
  0x3f   : > { %v5770_v9 = vcombine.low %v707_v63, %v708_v1  ;;  %v2377_v19 = vsel %vm1135_vm0, %v5640_v58, 0  ;;  %v5789_v21 = vsel %vm1026_vm2, %v1038_v4, %v1039_v6  ;;  %v1041_v24 = vor.u32 %v1039_v6, %v892_v8  ;;  %v617_v63 = vld [vmem:[%s5572_s17 + $0x58] sm:$0xf]  ;;  %s7186_s19 = smov (!%p545_p9, %s4250_s19), 127 }
  0x40   : > { %4648 = vmatmul.mubr.msk.bf16.gmra.mrb[4].mxu1 %vm1102_vm1, %v5622_v51  ;;  %v697_v58 = vadd.bf16 %v5595_v27, %v654_v12  ;;  %v698_v26 = vadd.bf16 %v5595_v27, %v655_v13  ;;  %v1043_v30 = vor.u32 %v1042_v17, %v900_v15  ;;  %v1044_v31 = vrot.slane %v7075_v16, 1  ;;  %s548_s29 = sadd.s32 %s5553_s18, %s7186_s19 }
  0x41   : > { %4788 = vmatmul.mubr.msk.bf16.gmra.mrb[8].mxu0 %vm1102_vm1, %v5696_v33  ;;  %4651 = vmatprep.mubr.msk.bf16.mxu1 %vm1102_vm1, %v5633_v55  ;;  %v7072_v39 = vshll.u32 %v5700_v36, 16  ;;  %v5827_v42 = vsel %vm5761_vm4, %v1041_v24, 0  ;;  %v656_v43 = vmul.bf16 %v5584_v20, %v613_v5  ;;  %v657_v47 = vmul.bf16 %v5584_v20, %v614_v29  ;;  %s4252_s24 = sshll.u32 %s548_s29, 2  ;;  %s6745_s29 = scalar_lea.vmem %s7063_s8, %s4232_s14 }
  0x42   : > { %4791 = vmatprep.mubr.msk.bf16.mxu0 %vm1102_vm1, %v5700_v36  ;;  %v5835_v56 = vcombine.low %v697_v58, %v698_v26  ;;  %v7077_v57 = vshrl.u32 %v5696_v33, 16  ;;  %v658_v59 = vmul.bf16 %v5584_v20, %v615_v34  ;;  %v659_v60 = vmul.bf16 %v5584_v20, %v616_v35  ;;  %v618_v26 = vld [vmem:[%s5572_s17 + $0x5c] sm:$0xf]  ;;  %v620_v34 = vld [vmem:[%s5572_s17 + $0x64] sm:$0xf]  ;;  %s494_s14 = sand.u32 1, %s5360_s10  }
  0x43   : > { %v5845_v61 = vsel %vm1026_vm2, %v1043_v30, %v1044_v31  ;;  %v7076_v1 = vshrl.u32 %v5700_v36, 16  ;;  %v7069_v4 = vshll.u32 %v5722_v46, 16  ;;  %v666_v6 = vmul.bf16 %v5584_v20, %v623_v40  ;;  %v619_v30 = vld [vmem:[%s5572_s17 + $0x60] sm:$0xf]  ;;  %s4249_s17 = sshll.u32 %s535_s28, 2  ;;  %s4228_s15 = sshll.u32 %s494_s14, 1 }
  0x44   : > { %v1047_v12 = vrot.slane %v7072_v39, 1  ;;  %v667_v13 = vmul.bf16 %v5584_v20, %v624_v41  ;;  %v668_v17 = vmul.bf16 %v5584_v20, %v625_v48  ;;  %v699_v24 = vadd.bf16 %v5595_v27, %v656_v43  ;;  %s537_s27 = scalar_lea.vmem %s7057_s2, %s4249_s17  ;;  %s5388_s17 = smov [#allocation2]  }
  0x45   : > { %v700_v58 = vadd.bf16 %v5595_v27, %v657_v47  ;;  %v709_v5 = vadd.bf16 %v5595_v27, %v666_v6  ;;  %v660_v29 = vmul.bf16 %v5584_v20, %v617_v63  ;;  %v1046_v43 = vor.u32 %v1044_v31, %v7077_v57  ;;  %s5294_s19 = sshll.u32 %s5388_s17, 4  ;;  %s5295_s19 = int_to_ptr.vmem [resolvable:$false] %s5294_s19 }
  0x46   : > { %v710_v35 = vadd.bf16 %v5595_v27, %v667_v13  ;;  %v711_v40 = vadd.bf16 %v5595_v27, %v668_v17  ;;  %v701_v47 = vadd.bf16 %v5595_v27, %v658_v59  ;;  %v702_v48 = vadd.bf16 %v5595_v27, %v659_v60 }
  0x47   : > { %v1048_v63 = vor.u32 %v1047_v12, %v7076_v1  ;;  %v7070_v6 = vshll.u32 %v5835_v56, 16  ;;  %v661_v31 = vmul.bf16 %v5584_v20, %v618_v26  ;;  %v7071_v59 = vshrl.u32 %v5722_v46, 16 }
  0x48   : > { %4652 = vmatmul.mubr.msk.bf16.gmra.mrb[8].mxu1 %vm1102_vm1, %v5658_v11  ;;  %v5891_v13 = vcombine.low %v709_v5, %v710_v35  ;;  %v662_v60 = vmul.bf16 %v5584_v20, %v619_v30  ;;  %v5904_v12 = vsel %vm5761_vm4, %v1046_v43, 0  ;;  %v5906_v5 = vcombine.low %v701_v47, %v702_v48  ;;  %v733_v43 = vld [vmem:[%s537_s27] sm:$0xf]  ;;  %v734_v47 = vld [vmem:[%s537_s27 + $0x4] sm:$0xf] }
  0x49   : > { %4792 = vmatmul.mubr.msk.bf16.gmra.mrb[12].mxu0 %vm1102_vm1, %v5722_v46  ;;  %4655 = vmatprep.mubr.msk.bf16.mxu1 %vm1102_vm1, %v5662_v18  ;;  %v703_v35 = vadd.bf16 %v5595_v27, %v660_v29  ;;  %v738_v16 = vmul.bf16 %v5584_v20, %v734_v47  ;;  %v747_v57 = vstv %s746_s26  ;;  %v7083_v47 = vshll.u32 %v5666_v22, 16  ;;  %s6253_s26 = scalar_lea.vmem %s7058_s3, %s4252_s24  ;;  %s4482_s24 = sshll.u32 %s5372_s13, 2 }
  0x4a   : > { %4813 = vmatprep.mubr.msk.bf16.mxu0 %vm1102_vm1, %v5731_v50  ;;  %v705_v29 = vadd.bf16 %v5595_v27, %v662_v60  ;;  %v736_v60 = vld [vmem:[%s537_s27 + $0xc] sm:$0xf]  ;;  %v894_v51 = vrot.slane %v892_v8, 7 }
  0x4b   : > { %v742_v62 = vadd.bf16 %v5595_v27, %v738_v16 }
  0x50   : > { %4656 = vmatmul.mubr.msk.bf16.gmra.mrb[12].mxu1 %vm1102_vm1, %v5696_v33 }
  0x51   : > { %4814 = vmatmul.mubr.msk.bf16.vlgmr.msra.gmra.mrb[0].mxu0 %vm1102_vm1, %v5780_v14  ;;  %4659 = vmatprep.mubr.msk.bf16.mxu1 %vm1102_vm1, %v5700_v36 }
  0x52   : > { %4846 = vmatpush3.bf16.msra.mxu0 %v2377_v19  ;;  %4817 = vmatprep.mubr.msk.bf16.mxu0 %vm1102_vm1, %v5789_v21  ;;  %v669_v19 = vmul.bf16 %v5584_v20, %v626_v54  ;;  %v1049_v54 = vrot.slane %v7069_v4, 1  ;;  %v5899_v4 = vcombine.low %v699_v24, %v700_v58  ;;  %v1052_v24 = vrot.slane %v7070_v6, 1 }
  0x53   : > { %5213 = vmatprep.subr.msk.bf16.mxu0 %vm1135_vm0, %v5796_v25  ;;  %v704_v58 = vadd.bf16 %v5595_v27, %v661_v31  ;;  %v735_v31 = vld [vmem:[%s537_s27 + $0x8] sm:$0xf]  ;;  %s4018_s27 = sadd.s32 %s5368_s12, %s4482_s24  ;;  %s4003_s12 = scalar_lea.sflag [#allocation3], %s494_s14 }
  0x54   : > { %v712_v41 = vadd.bf16 %v5595_v27, %v669_v19  ;;  %v663_v19 = vmul.bf16 %v5584_v20, %v620_v34  ;;  %v5910_v26 = vsel %vm1026_vm2, %v1048_v63, %v1049_v54  ;;  %v7074_v30 = vshll.u32 %v5899_v4, 16  ;;  %s4483_s25 = sshll.u32 %s4018_s27, 5 }
  0x55   : > { %v1051_v34 = vor.u32 %v1049_v54, %v7071_v59  ;;  %v7081_v63 = vshll.u32 %v5906_v5, 16  ;;  %v5938_v6 = vcombine.low %v703_v35, %v704_v58  ;;  %v739_v35 = vmul.bf16 %v5584_v20, %v735_v31  ;;  %s7001_s28 = scalar_lea.hbm %s7064_s9, %s4483_s25 }
  0x56   : > { %v5893_v17 = vcombine.low %v711_v40, %v712_v41  ;;  %v7073_v40 = vshrl.u32 %v5835_v56, 16  ;;  %v706_v41 = vadd.bf16 %v5595_v27, %v663_v19  ;;  %v1054_v54 = vrot.slane %v7074_v30, 1 }
  0x57   : > { %v7080_v19 = vshrl.u32 %v5666_v22, 16  ;;  %v5942_v59 = vsel %vm5761_vm4, %v1051_v34, 0  ;;  %v737_v30 = vmul.bf16 %v5584_v20, %v733_v43  ;;  %v7085_v1 = vshll.u32 %v5938_v6, 16 }
  0x58   : > { %4660 = vmatmul.mubr.msk.bf16.gmra.mrb[16].mxu1 %vm1102_vm1, %v5722_v46  ;;  %v1053_v48 = vor.u32 %v1052_v24, %v7073_v40  ;;  %v5944_v39 = vcombine.low %v705_v29, %v706_v41  ;;  %v937_v24 = vshrl.u32 %v5899_v4, 16  ;;  %v945_v40 = vshrl.u32 %v5906_v5, 16 }
  0x59   : > { %4818 = vmatmul.mubr.msk.bf16.gmra.mrb[4].mxu0 %vm1102_vm1, %v5827_v42  ;;  %4663 = vmatprep.mubr.msk.bf16.mxu1 %vm1102_vm1, %v5835_v56  ;;  %v740_v58 = vmul.bf16 %v5584_v20, %v736_v60  ;;  %v1057_v29 = vrot.slane %v7081_v63, 1  ;;  %v741_v41 = vadd.bf16 %v5595_v27, %v737_v30  ;;  %v857_v43 = vrot.slane %v7080_v19, 7 }
  0x5a   : > { %4821 = vmatprep.mubr.msk.bf16.mxu0 %vm1102_vm1, %v5845_v61  ;;  %v5954_v34 = vsel %vm1026_vm2, %v1053_v48, %v1054_v54  ;;  %v743_v53 = vadd.bf16 %v5595_v27, %v739_v35  ;;  %v750_v48 = vmul.bf16 %v747_v57, %v742_v62  ;;  %v7082_v30 = vshrl.u32 %v5668_v23, 16 }
  0x5b   : > { %v744_v31 = vadd.bf16 %v5595_v27, %v740_v58  ;;  %v749_v20 = vmul.bf16 %v747_v57, %v741_v41  ;;  %v1056_v16 = vor.u32 %v1054_v54, %v937_v24  ;;  %v1058_v35 = vor.u32 %v1057_v29, %v945_v40 }
  0x5c   : > { %v751_v60 = vmul.bf16 %v747_v57, %v743_v53  ;;  %v1059_v62 = vrot.slane %v7085_v1, 1  ;;  %v7084_v58 = vshll.u32 %v5944_v39, 16  ;;  %v860_v19 = vor.u32 %v7083_v47, %v857_v43  ;;  %v3030_v53 = vld [vmem:[%s6253_s26 + $0x2c] sm:$0xf] }
  0x5d   : > { %v752_v27 = vmul.bf16 %v747_v57, %v744_v31  ;;  %v5981_v41 = vcombine.low %v749_v20, %v750_v48  ;;  %v864_v57 = vrot.slane %v7082_v30, 7  ;;  %v7086_v54 = vshll.u32 %v5668_v23, 16 }
  0x5e   : > { %v5998_v29 = vsel %vm5761_vm4, %v1056_v16, 0  ;;  %v952_v31 = vshrl.u32 %v5938_v6, 16  ;;  %v6002_v20 = vsel %vm1026_vm2, %v1058_v35, %v1059_v62  ;;  %v7088_v48 = vshrl.u32 %v5944_v39, 16 }
  0x5f   : > { %v5985_v63 = vcombine.low %v751_v60, %v752_v27  ;;  %v7087_v60 = vshll.u32 %v5770_v9, 16  ;;  %v1062_v27 = vrot.slane %v7084_v58, 1  ;;  %v1016_v30 = vsel %vm5989_vm7, 0, %v860_v19 }
  0x60   : > { %4664 = vmatmul.mubr.msk.bf16.gmra.mrb[20].mxu1 %vm1102_vm1, %v5899_v4  ;;  %v872_v47 = vrot.slane %v870_v37, 7  ;;  %v867_v16 = vor.u32 %v7086_v54, %v864_v57  ;;  %v1061_v35 = vor.u32 %v1059_v62, %v952_v31  ;;  %v7091_v58 = vshll.u32 %v5891_v13, 16 }
  0x61   : > { %4822 = vmatmul.mubr.msk.bf16.gmra.mrb[8].mxu0 %vm1102_vm1, %v5904_v12  ;;  %4667 = vmatprep.mubr.msk.bf16.mxu1 %vm1102_vm1, %v5906_v5  ;;  %v1063_v37 = vor.u32 %v1062_v27, %v7088_v48  ;;  %v1064_v19 = vrot.slane %v7087_v60, 1  ;;  %v7093_v62 = vshrl.u32 %v5770_v9, 16  ;;  %v7092_v60 = vshrl.u32 %v5891_v13, 16 }
  0x62   : > { %4825 = vmatprep.mubr.msk.bf16.mxu0 %vm1102_vm1, %v5910_v26  ;;  %v875_v1 = vor.u32 %v873_v32, %v872_v47  ;;  %v868_v57 = vsel %vm853_vm5, %v857_v43, %v867_v16  ;;  %v6033_v54 = vsel %vm5761_vm4, %v1061_v35, 0  ;;  %v7089_v48 = vshll.u32 %v5893_v17, 16  ;;  %v6058_v16 = vld [vmem:[%s7059_s4 + $0x6] sm:$0x3] }
  0x63   : > { %v6039_v27 = vsel %vm1026_vm2, %v1063_v37, %v1064_v19  ;;  %v1067_v45 = vrot.slane %v7091_v58, 1  ;;  %v1563_v32 = vsel %vm1135_vm0, %v5681_v28, 0  ;;  %v1066_v28 = vor.u32 %v1064_v19, %v7093_v62 }
  0x64   : > { %v6049_v43 = vsel %vm5989_vm7, 0, %v875_v1  ;;  %v1069_v35 = vrot.slane %v7089_v48, 1 }
  0x65   : > { %v1068_v1 = vor.u32 %v1067_v45, %v7092_v60  ;;  %v6079_v19 = vsel %vm5761_vm4, %v1066_v28, 0  ;;  %v902_v45 = vrot.slane %v900_v15, 7  ;;  %v7116_v15 = vshll.u32 %v5662_v18, 16 }
  0x66   : > { %v7123_v60 = vshrl.u32 %v5835_v56, 16 }
  0x67   : > { %v905_v28 = vor.u32 %v7116_v15, %v902_v45 }
  0x68   : > { %4668 = vmatmul.mubr.msk.bf16.gmra.mrb[24].mxu1 %vm1102_vm1, %v5938_v6  ;;  %v932_v62 = vrot.slane %v7123_v60, 7  ;;  %v7125_v60 = vshll.u32 %v5835_v56, 16 }
  0x69   : > { %4826 = vmatmul.mubr.msk.bf16.gmra.mrb[12].mxu0 %vm1102_vm1, %v5942_v59  ;;  %4671 = vmatprep.mubr.msk.bf16.mxu1 %vm1102_vm1, %v5944_v39 }
  0x6a   : > { %4829 = vmatprep.mubr.msk.bf16.mxu0 %vm1102_vm1, %v5954_v34 }
  0x70   : > { %4672 = vmatmul.mubr.msk.bf16.gmra.mrb[28].mxu1 %vm1102_vm1, %v5770_v9 }
  0x71   : > { %4830 = vmatmul.mubr.msk.bf16.gmra.mrb[16].mxu0 %vm1102_vm1, %v5998_v29  ;;  %4677 = vmatprep.mubr.msk.bf16.mxu1 %vm1102_vm1, %v1016_v30  ;;  %v879_v30 = vrot.slane %v877_v49, 7  ;;  %v887_v49 = vrot.slane %v885_v52, 7 }
  0x72   : > { %4833 = vmatprep.mubr.msk.bf16.mxu0 %vm1102_vm1, %v6002_v20 }
  0x73   : > { %v882_v52 = vor.u32 %v880_v38, %v879_v30  ;;  %v890_v37 = vor.u32 %v888_v44, %v887_v49  ;;  %v6088_v30 = vsel %vm1026_vm2, %v1068_v1, %v1069_v35  ;;  %v7118_v1 = vshrl.u32 %v5696_v33, 16 }
  0x74   : > { %7114 = vst [vmem:[#allocation12_spill] sm:$0xff] %v6088_v30 }
  0x75   : > { %v6085_v38 = vsel %vm853_vm5, %v872_v47, %v882_v52  ;;  %v6092_v44 = vsel %vm5989_vm7, 0, %v890_v37  ;;  %v7115_v47 = vshll.u32 %v5658_v11, 16  ;;  %v909_v37 = vrot.slane %v7118_v1, 7 }
  0x76   : > { %v2579_v1 = vsel %vm1135_vm0, %v5796_v25, 0  ;;  %v7124_v25 = vshll.u32 %v5722_v46, 16 }
  0x78   : > { %4678 = vmatmul.mubr.msk.bf16.vlgmr.msra.gmra.mrb[0].mxu1 %vm1102_vm1, %v868_v57  ;;  %v7090_v57 = vshrl.u32 %v5893_v17, 16 }
  0x79   : > { %4834 = vmatmul.mubr.msk.bf16.gmra.mrb[20].mxu0 %vm1102_vm1, %v6033_v54  ;;  %4710 = vmatpush3.bf16.msra.mxu1 %v1563_v32  ;;  %v897_v32 = vor.u32 %v7115_v47, %v894_v51  ;;  %v7121_v47 = vshll.u32 %v5700_v36, 16 }
  0x7a   : > { %4837 = vmatprep.mubr.msk.bf16.mxu0 %vm1102_vm1, %v6039_v27  ;;  %4681 = vmatprep.mubr.msk.bf16.mxu1 %vm1102_vm1, %v6049_v43  ;;  %v1071_v8 = vor.u32 %v1069_v35, %v7090_v57  ;;  %v6121_v35 = vsel %vm5989_vm7, 0, %v905_v28  ;;  %v7119_v57 = vshrl.u32 %v5700_v36, 16 }
  0x7b   : > { %5208 = vmatprep.subr.msk.bf16.mxu1 %vm1135_vm0, %v6058_v16  ;;  %v6117_v48 = vsel %vm853_vm5, %v887_v49, %v897_v32  ;;  %v7120_v49 = vshll.u32 %v5696_v33, 16 }
  0x7c   : > { %v6112_v52 = vsel %vm5761_vm4, %v1071_v8, 0  ;;  %v917_v51 = vrot.slane %v7119_v57, 7  ;;  %v7122_v57 = vshrl.u32 %v5722_v46, 16 }
  0x7d   : > { %7117 = vst [vmem:[#allocation13_spill] sm:$0xff] %v6112_v52  ;;  %v912_v8 = vor.u32 %v7120_v49, %v909_v37  ;;  %v6155_v37 = vld [vmem:[%s7059_s4 + $0x10] sm:$0x3]  ;;  %v935_v49 = vor.u32 %v7125_v60, %v932_v62  ;;  %v7128_v60 = vshrl.u32 %v5944_v39, 16 }
  0x7e   : > { %v920_v32 = vor.u32 %v7121_v47, %v917_v51  ;;  %v924_v15 = vrot.slane %v7122_v57, 7  ;;  %v947_v57 = vrot.slane %v945_v40, 7  ;;  %v954_v40 = vrot.slane %v952_v31, 7 }
  0x7f   : > { %v6140_v28 = vsel %vm853_vm5, %v902_v45, %v912_v8  ;;  %v939_v8 = vrot.slane %v937_v24, 7  ;;  %v7126_v24 = vshll.u32 %v5899_v4, 16  ;;  %v7129_v31 = vshll.u32 %v5938_v6, 16 }
  0x80   : > { %4682 = vmatmul.mubr.msk.bf16.gmra.mrb[4].mxu1 %vm1102_vm1, %v6085_v38  ;;  %v6146_v58 = vsel %vm5989_vm7, 0, %v920_v32  ;;  %v927_v45 = vor.u32 %v7124_v25, %v924_v15  ;;  %v6176_v32 = vsel %vm5989_vm7, 0, %v935_v49  ;;  %v7127_v15 = vshll.u32 %v5906_v5, 16 }
  0x81   : > { %4838 = vmatmul.mubr.msk.bf16.gmra.mrb[24].mxu0 %vm1102_vm1, %v6079_v19  ;;  %4685 = vmatprep.mubr.msk.bf16.mxu1 %vm1102_vm1, %v6092_v44  ;;  %v962_v49 = vrot.slane %v7128_v60, 7  ;;  %v7132_v60 = vshll.u32 %v5666_v22, 16 }
  0x82   : > { %4841 = vmatprep.mubr.msk.bf16.mxu0 %vm1102_vm1, %v6088_v30  ;;  %v6172_v47 = vsel %vm853_vm5, %v917_v51, %v927_v45  ;;  %v942_v51 = vor.u32 %v7126_v24, %v939_v8  ;;  %v7130_v8 = vshll.u32 %v5944_v39, 16 }
  0x83   : > { %v1027_v7 = vrot.slane %v7132_v60, 1 }
  0x84   : > { %v6195_v25 = vsel %vm853_vm5, %v932_v62, %v942_v51  ;;  %v957_v62 = vor.u32 %v7129_v31, %v954_v40  ;;  %v965_v24 = vor.u32 %v7130_v8, %v962_v49  ;;  %v7131_v51 = vshrl.u32 %v5770_v9, 16 }
  0x85   : > { %v7135_v31 = vshrl.u32 %v5666_v22, 16  ;;  %v7136_v8 = vshll.u32 %v5668_v23, 16  ;;  %v3019_v22 = vld [vmem:[%s6253_s26] sm:$0xf] }
  0x86   : > { %v6224_v10 = vsel %vm5989_vm7, 0, %v965_v24 }
  0x87   : > { %7133 = vst [vmem:[#allocation14_spill] sm:$0xff] %v6224_v10  ;;  %v1029_v24 = vrot.slane %v7136_v8, 1  ;;  %v3020_v8 = vld [vmem:[%s6253_s26 + $0x4] sm:$0xf] }
  0x88   : > { %4686 = vmatmul.mubr.msk.bf16.gmra.mrb[8].mxu1 %vm1102_vm1, %v6117_v48 }
  0x89   : > { %4842 = vmatmul.mubr.msk.bf16.gmra.mrb[28].mxu0 %vm1102_vm1, %v6112_v52  ;;  %4689 = vmatprep.mubr.msk.bf16.mxu1 %vm1102_vm1, %v6121_v35  ;;  %v7137_v52 = vshrl.u32 %v5891_v13, 16 }
  0x8a   : > { %4847 = vmatprep.mubr.msk.bf16.mxu0 %vm1102_vm1, %v6092_v44 }
  0x8b   : > { %v977_v30 = vrot.slane %v7137_v52, 7  ;;  %v7138_v52 = vshrl.u32 %v5668_v23, 16 }
  0x90   : > { %4690 = vmatmul.mubr.msk.bf16.gmra.mrb[12].mxu1 %vm1102_vm1, %v6140_v28 }
  0x91   : > { %4848 = vmatmul.mubr.msk.bf16.vlgmr.msra.gmra.mrb[0].mxu0 %vm1102_vm1, %v6117_v48  ;;  %4693 = vmatprep.mubr.msk.bf16.mxu1 %vm1102_vm1, %v6146_v58 }
  0x92   : > { %4880 = vmatpush3.bf16.msra.mxu0 %v2579_v1  ;;  %4851 = vmatprep.mubr.msk.bf16.mxu0 %vm1102_vm1, %v6121_v35  ;;  %v950_v1 = vor.u32 %v7127_v15, %v947_v57  ;;  %v969_v15 = vrot.slane %v7131_v51, 7  ;;  %v5386_v51 = vmov 0  }
  0x93   : > { %5214 = vmatprep.subr.msk.bf16.mxu0 %vm1135_vm0, %v6155_v37  ;;  %5289 = vset.pattern.permute.xlu1 %v5386_v51 }
  0x94   : > { %v6199_v45 = vsel %vm5989_vm7, 0, %v950_v1  ;;  %v6218_v1 = vsel %vm853_vm5, %v947_v57, %v957_v62  ;;  %v7134_v57 = vshll.u32 %v5770_v9, 16  ;;  %v1028_v62 = vor.u32 %v1027_v7, %v7135_v31  ;;  %5288 = vset.pattern.permute.xlu0 %v5386_v51  ;;  %v3021_v7 = vld [vmem:[%s6253_s26 + $0x8] sm:$0xf] }
  0x95   : > { %v990_v31 = vshrl.u32 %v5981_v41, 16  ;;  %3079 = vperm.xlu1 %5289, %v3021_v7   ;;  %3055 = vperm.xlu0 %5288, %v3019_v22   ;;  %v7140_v51 = vshrl.u32 %v5893_v17, 16  ;;  %v993_v7 = vshll.u32 %v5981_v41, 16  ;;  %v1767_v22 = vsel %vm1135_vm0, %v6058_v16, 0 }
  0x96   : > { %v972_v40 = vor.u32 %v7134_v57, %v969_v15  ;;  %v1030_v15 = vsel %vm1026_vm2, %v1028_v62, %v1029_v24  ;;  %v7139_v57 = vshll.u32 %v5891_v13, 16  ;;  %v3022_v62 = vld [vmem:[%s6253_s26 + $0xc] sm:$0xf] }
  0x98   : > { %4694 = vmatmul.mubr.msk.bf16.gmra.mrb[16].mxu1 %vm1102_vm1, %v6172_v47  ;;  %v6242_v60 = vsel %vm853_vm5, %v962_v49, %v972_v40  ;;  %v1031_v49 = vor.u32 %v1029_v24, %v7138_v52  ;;  %v980_v40 = vor.u32 %v7139_v57, %v977_v30  ;;  %v7141_v52 = vshll.u32 %v5893_v17, 16 }
  0x99   : > { %4852 = vmatmul.mubr.msk.bf16.gmra.mrb[4].mxu0 %vm1102_vm1, %v6140_v28  ;;  %4697 = vmatprep.mubr.msk.bf16.mxu1 %vm1102_vm1, %v6176_v32  ;;  %v997_v57 = vshrl.u32 %v5985_v63, 16 }
  0x9a   : > { %4855 = vmatprep.mubr.msk.bf16.mxu0 %vm1102_vm1, %v6146_v58  ;;  %v1089_v23 = vsel %vm5761_vm4, %v1031_v49, 0  ;;  %v6275_v24 = vsel %vm5989_vm7, 0, %v980_v40  ;;  %3091 = vperm.xlu1 %5289, %v3022_v62   ;;  %v3024_v40 = vld [vmem:[%s6253_s26 + $0x14] sm:$0xf]  ;;  %v3023_v62 = vld [vmem:[%s6253_s26 + $0x10] sm:$0xf] }
  0x9b   : > { %3067 = vperm.xlu0 %5288, %v3020_v8   ;;  %v3026_v8 = vld [vmem:[%s6253_s26 + $0x1c] sm:$0xf] }
  0x9e   : > { %3115 = vperm.xlu1 %5289, %v3024_v40   ;;  %v3032_v40 = vld [vmem:[%s6253_s26 + $0x34] sm:$0xf] }
  0x9f   : > { %3103 = vperm.xlu0 %5288, %v3023_v62   ;;  %v3031_v62 = vld [vmem:[%s6253_s26 + $0x30] sm:$0xf] }
  0xa0   : > { %4698 = vmatmul.mubr.msk.bf16.gmra.mrb[20].mxu1 %vm1102_vm1, %v6195_v25 }
  0xa1   : > { %4856 = vmatmul.mubr.msk.bf16.gmra.mrb[8].mxu0 %vm1102_vm1, %v6172_v47  ;;  %4701 = vmatprep.mubr.msk.bf16.mxu1 %vm1102_vm1, %v6199_v45 }
  0xa2   : > { %4859 = vmatprep.mubr.msk.bf16.mxu0 %vm1102_vm1, %v6176_v32  ;;  %3139 = vperm.xlu1 %5289, %v3026_v8   ;;  %v2783_v8 = vsel %vm1135_vm0, %v6155_v37, 0  ;;  %v3038_v37 = vld [vmem:[%s6253_s26 + $0x4c] sm:$0xf] }
  0xa8   : > { %4702 = vmatmul.mubr.msk.bf16.gmra.mrb[24].mxu1 %vm1102_vm1, %v6218_v1 }
  0xa9   : > { %4860 = vmatmul.mubr.msk.bf16.gmra.mrb[12].mxu0 %vm1102_vm1, %v6195_v25  ;;  %4705 = vmatprep.mubr.msk.bf16.mxu1 %vm1102_vm1, %v6224_v10 }
  0xaa   : > { %4863 = vmatprep.mubr.msk.bf16.mxu0 %vm1102_vm1, %v6199_v45 }
  0xb0   : > { %4706 = vmatmul.mubr.msk.bf16.gmra.mrb[28].mxu1 %vm1102_vm1, %v6242_v60 }
  0xb1   : > { %4864 = vmatmul.mubr.msk.bf16.gmra.mrb[16].mxu0 %vm1102_vm1, %v6218_v1  ;;  %4711 = vmatprep.mubr.msk.bf16.mxu1 %vm1102_vm1, %v1030_v15  ;;  %v992_v15 = vrot.slane %v990_v31, 7 }
  0xb2   : > { %4867 = vmatprep.mubr.msk.bf16.mxu0 %vm1102_vm1, %v6224_v10  ;;  %v984_v10 = vrot.slane %v7140_v51, 7  ;;  %v999_v51 = vrot.slane %v997_v57, 7 }
  0xb3   : > { %v995_v16 = vor.u32 %v993_v7, %v992_v15 }
  0xb4   : > { %v987_v49 = vor.u32 %v7141_v52, %v984_v10  ;;  %v3027_v52 = vld [vmem:[%s6253_s26 + $0x20] sm:$0xf] }
  0xb6   : > { %v6300_v10 = vsel %vm853_vm5, %v977_v30, %v987_v49  ;;  %v3028_v30 = vld [vmem:[%s6253_s26 + $0x24] sm:$0xf] }
  0xb7   : > { %3163 = vperm.xlu1 %5289, %v3028_v30   ;;  %v3046_v30 = vld [vmem:[%s6253_s26 + $0x6c] sm:$0xf] }
  0xb8   : > { %4712 = vmatmul.mubr.msk.bf16.vlgmr.msra.gmra.mrb[0].mxu1 %vm1102_vm1, %v1089_v23  ;;  %v3025_v23 = vld [vmem:[%s6253_s26 + $0x18] sm:$0xf] }
  0xb9   : > { %4868 = vmatmul.mubr.msk.bf16.gmra.mrb[20].mxu0 %vm1102_vm1, %v6242_v60  ;;  %4744 = vmatpush3.bf16.msra.mxu1 %v1767_v22  ;;  %v1025_v22 = vsel %vm5989_vm7, 0, %v995_v16  ;;  %v3033_v16 = vld [vmem:[%s6253_s26 + $0x38] sm:$0xf] }
  0xba   : > { %4871 = vmatprep.mubr.msk.bf16.mxu0 %vm1102_vm1, %v6275_v24  ;;  %4715 = vmatprep.mubr.msk.bf16.mxu1 %vm1102_vm1, %v5731_v50  ;;  %v1000_v50 = vshll.u32 %v5985_v63, 16 }
  0xbb   : > { %5210 = vmatprep.subr.msk.bf16.mxu1 %vm1135_vm0, %v5513_v0  ;;  %3127 = vperm.xlu0 %5288, %v3025_v23   ;;  %v3040_v23 = vld [vmem:[%s6253_s26 + $0x54] sm:$0xf] }
  0xbc   : > { %v1002_v0 = vor.u32 %v1000_v50, %v999_v51  ;;  %3187 = vperm.xlu1 %5289, %v3030_v53   ;;  %v3035_v51 = vld [vmem:[%s6253_s26 + $0x40] sm:$0xf]  ;;  %v3047_v53 = vld [vmem:[%s6253_s26 + $0x70] sm:$0xf] }
  0xbe   : > { %v1003_v49 = vsel %vm853_vm5, %v992_v15, %v1002_v0  ;;  %v3034_v15 = vld [vmem:[%s6253_s26 + $0x3c] sm:$0xf]  ;;  %v3041_v0 = vld [vmem:[%s6253_s26 + $0x58] sm:$0xf] }
  0xbf   : > { %3151 = vperm.xlu0 %5288, %v3027_v52   ;;  %v3045_v52 = vld [vmem:[%s6253_s26 + $0x68] sm:$0xf] }
  0xc0   : > { %4716 = vmatmul.mubr.msk.bf16.gmra.mrb[4].mxu1 %vm1102_vm1, %v5780_v14  ;;  %v3029_v14 = vld [vmem:[%s6253_s26 + $0x28] sm:$0xf]  ;;  %3211 = vperm.xlu1 %5289, %v3032_v40  }
  0xc1   : > { %4872 = vmatmul.mubr.msk.bf16.gmra.mrb[24].mxu0 %vm1102_vm1, %v6300_v10  ;;  %4719 = vmatprep.mubr.msk.bf16.mxu1 %vm1102_vm1, %v5789_v21 }
  0xc2   : > { %4875 = vmatprep.mubr.msk.bf16.mxu0 %vm1102_vm1, %v1025_v22  ;;  %v3042_v22 = vld [vmem:[%s6253_s26 + $0x5c] sm:$0xf] }
  0xc3   : > { %3175 = vperm.xlu0 %5288, %v3029_v14   ;;  %v3049_v14 = vld [vmem:[%s6253_s26 + $0x78] sm:$0xf] }
  0xc4   : > { %3235 = vperm.xlu1 %5289, %v3034_v15  }
  0xc7   : > { %3199 = vperm.xlu0 %5288, %v3031_v62  }
  0xc8   : > { %4720 = vmatmul.mubr.msk.bf16.gmra.mrb[8].mxu1 %vm1102_vm1, %v5827_v42 }
  0xc9   : > { %4876 = vmatmul.mubr.msk.bf16.gmra.mrb[28].mxu0 %vm1102_vm1, %v1003_v49  ;;  %4723 = vmatprep.mubr.msk.bf16.mxu1 %vm1102_vm1, %v5845_v61  ;;  %v3050_v49 = vld [vmem:[%s6253_s26 + $0x7c] sm:$0xf] }
  0xca   : > { %4881 = vmatprep.mubr.msk.bf16.mxu0 %vm1102_vm1, %v5633_v55  ;;  %v3036_v55 = vld [vmem:[%s6253_s26 + $0x44] sm:$0xf] }
  0xcb   : > { %3223 = vperm.xlu0 %5288, %v3033_v16   ;;  %3259 = vperm.xlu1 %5289, %v3036_v55  }
  0xcf   : > { %3247 = vperm.xlu0 %5288, %v3035_v51   ;;  %3283 = vperm.xlu1 %5289, %v3038_v37  }
  0xd0   : > { %4724 = vmatmul.mubr.msk.bf16.gmra.mrb[12].mxu1 %vm1102_vm1, %v5904_v12 }
  0xd1   : > { %4882 = vmatmul.mubr.msk.bf16.vlgmr.msra.gmra.mrb[0].mxu0 %vm1102_vm1, %v5658_v11  ;;  %4727 = vmatprep.mubr.msk.bf16.mxu1 %vm1102_vm1, %v5910_v26  ;;  %v3037_v11 = vld [vmem:[%s6253_s26 + $0x48] sm:$0xf] }
  0xd2   : > { %4914 = vmatpush3.bf16.msra.mxu0 %v2783_v8  ;;  %4885 = vmatprep.mubr.msk.bf16.mxu0 %vm1102_vm1, %v5662_v18  ;;  %v3039_v18 = vld [vmem:[%s6253_s26 + $0x50] sm:$0xf] }
  0xd3   : > { %3271 = vperm.xlu0 %5288, %v3037_v11   ;;  %3307 = vperm.xlu1 %5289, %v3040_v23  }
  0xd7   : > { %3295 = vperm.xlu0 %5288, %v3039_v18   ;;  %3331 = vperm.xlu1 %5289, %v3042_v22  }
  0xd8   : > { %4728 = vmatmul.mubr.msk.bf16.gmra.mrb[16].mxu1 %vm1102_vm1, %v5942_v59 }
  0xd9   : > { %4886 = vmatmul.mubr.msk.bf16.gmra.mrb[4].mxu0 %vm1102_vm1, %v5696_v33  ;;  %4731 = vmatprep.mubr.msk.bf16.mxu1 %vm1102_vm1, %v5954_v34  ;;  %v3044_v33 = vld [vmem:[%s6253_s26 + $0x64] sm:$0xf] }
  0xda   : > { %4889 = vmatprep.mubr.msk.bf16.mxu0 %vm1102_vm1, %v5700_v36  ;;  %v3043_v36 = vld [vmem:[%s6253_s26 + $0x60] sm:$0xf] }
  0xdb   : > { %3319 = vperm.xlu0 %5288, %v3041_v0   ;;  %3355 = vperm.xlu1 %5289, %v3044_v33  }
  0xdf   : > { %3343 = vperm.xlu0 %5288, %v3043_v36   ;;  %3379 = vperm.xlu1 %5289, %v3046_v30  }
  0xe0   : > { %4732 = vmatmul.mubr.msk.bf16.gmra.mrb[20].mxu1 %vm1102_vm1, %v5998_v29 }
  0xe1   : > { %4890 = vmatmul.mubr.msk.bf16.gmra.mrb[8].mxu0 %vm1102_vm1, %v5722_v46  ;;  %4735 = vmatprep.mubr.msk.bf16.mxu1 %vm1102_vm1, %v6002_v20  ;;  %v3048_v46 = vld [vmem:[%s6253_s26 + $0x74] sm:$0xf]  ;;  %s496_s26 = scalar_lea.vmem [#allocation2], %s4228_s15 }
  0xe2   : > { %4893 = vmatprep.mubr.msk.bf16.mxu0 %vm1102_vm1, %v5835_v56  ;;  %s4022_s18 = sshll.u32 %s496_s26, 4  ;;  %s7003_s18 = int_to_ptr.vmem [resolvable:$true] %s4022_s18 }
  0xe3   : > { %3367 = vperm.xlu0 %5288, %v3045_v52   ;;  %3403 = vperm.xlu1 %5289, %v3048_v46   ;;  %s5290_s13 = scalar_lea.vmem %s7003_s18, 32  ;;  %p5297_p13 = scmp.lt.s32.totalorder %s7003_s18, %s5295_s19 }
  0xe4   : > { %p5291_p10 = scmp.ne.s32.totalorder %s7003_s18, %s5290_s13 }
  0xe6   : > { %p5292_p11 = pnand %p5291_p10, %p5490_p3 }
  0xe7   : > { %3391 = vperm.xlu0 %5288, %v3047_v53   ;;  %3427 = vperm.xlu1 %5289, %v3050_v49  }
  0xe8   : > { %4736 = vmatmul.mubr.msk.bf16.gmra.mrb[24].mxu1 %vm1102_vm1, %v6033_v54  ;;  %p5293_p12 = pneg %p5292_p11 }
  0xe9   : > { %4894 = vmatmul.mubr.msk.bf16.gmra.mrb[12].mxu0 %vm1102_vm1, %v5899_v4  ;;  %4739 = vmatprep.mubr.msk.bf16.mxu1 %vm1102_vm1, %v6039_v27 }
  0xea   : > { %4897 = vmatprep.mubr.msk.bf16.mxu0 %vm1102_vm1, %v5906_v5 }
  0xeb   : > { %3415 = vperm.xlu0 %5288, %v3049_v14  }
  0xf0   : > { %4740 = vmatmul.mubr.msk.bf16.gmra.mrb[28].mxu1 %vm1102_vm1, %v6079_v19 }
  0xf1   : > { %4898 = vmatmul.mubr.msk.bf16.gmra.mrb[16].mxu0 %vm1102_vm1, %v5938_v6  ;;  %4745 = vmatprep.mubr.msk.bf16.mxu1 %vm1102_vm1, %v6049_v43 }
  0xf2   : > { %4901 = vmatprep.mubr.msk.bf16.mxu0 %vm1102_vm1, %v5944_v39 }
  0xf8   : > { %4746 = vmatmul.mubr.msk.bf16.vlgmr.msra.gmra.mrb[0].mxu1 %vm1102_vm1, %v6085_v38 }
  0xf9   : > { %4902 = vmatmul.mubr.msk.bf16.gmra.mrb[20].mxu0 %vm1102_vm1, %v5770_v9  ;;  %4948 = vmatpush3.bf16.msra.mxu1 %v5526_v3  ;;  %v7142_v3 = vld [vmem:[#allocation14_spill] sm:$0xff] }
  0xfa   : > { %4905 = vmatprep.mubr.msk.bf16.mxu0 %vm1102_vm1, %v5891_v13  ;;  %4749 = vmatprep.mubr.msk.bf16.mxu1 %vm1102_vm1, %v6092_v44  ;;  %v3051_v44 = vld [vmem:[%s7061_s6] sm:$0x1] }
 0x100   : > { %4750 = vmatmul.mubr.msk.bf16.gmra.mrb[4].mxu1 %vm1102_vm1, %v6117_v48  ;;  %v7144_v48 = vld [vmem:[#allocation13_spill] sm:$0xff] }
 0x101   : > { %4906 = vmatmul.mubr.msk.bf16.gmra.mrb[24].mxu0 %vm1102_vm1, %v5893_v17  ;;  %4753 = vmatprep.mubr.msk.bf16.mxu1 %vm1102_vm1, %v6121_v35 }
 0x102   : > { %4909 = vmatprep.mubr.msk.bf16.mxu0 %vm1102_vm1, %v5981_v41 }
 0x108   : > { %4754 = vmatmul.mubr.msk.bf16.gmra.mrb[8].mxu1 %vm1102_vm1, %v6140_v28 }
 0x109   : > { %4910 = vmatmul.mubr.msk.bf16.gmra.mrb[28].mxu0 %vm1102_vm1, %v5985_v63  ;;  %4757 = vmatprep.mubr.msk.bf16.mxu1 %vm1102_vm1, %v6146_v58 }
 0x10a   : > { %4915 = vmatprep.mubr.msk.bf16.mxu0 %vm1102_vm1, %v5789_v21 }
 0x110   : > { %4758 = vmatmul.mubr.msk.bf16.gmra.mrb[12].mxu1 %vm1102_vm1, %v6172_v47  ;;  %v5387_v47 = vmov 839922192  }
 0x111   : > { %4916 = vmatmul.mubr.msk.bf16.vlgmr.msra.gmra.mrb[0].mxu0 %vm1102_vm1, %v5827_v42  ;;  %4761 = vmatprep.mubr.msk.bf16.mxu1 %vm1102_vm1, %v6176_v32  ;;  %v3059_v32 = vunpack.c.l.s4 %v5387_v47 }
 0x112   : > { %4919 = vmatprep.mubr.msk.bf16.mxu0 %vm1102_vm1, %v5845_v61 }
 0x114   : > { %v6454_v21 = vpop.permute.xlu1 %3079  ;;  %v6458_v42 = vpop.permute.xlu0 %3055 }
 0x118   : > { %4762 = vmatmul.mubr.msk.bf16.gmra.mrb[16].mxu1 %vm1102_vm1, %v6195_v25 }
 0x119   : > { %4920 = vmatmul.mubr.msk.bf16.gmra.mrb[4].mxu0 %vm1102_vm1, %v5904_v12  ;;  %4765 = vmatprep.mubr.msk.bf16.mxu1 %vm1102_vm1, %v6199_v45  ;;  %v6460_v61 = vpop.permute.xlu1 %3091 }
 0x11a   : > { %4923 = vmatprep.mubr.msk.bf16.mxu0 %vm1102_vm1, %v5910_v26  ;;  %v6464_v12 = vpop.permute.xlu0 %3067  ;;  %v7143_v26 = vld [vmem:[#allocation12_spill] sm:$0xff] }
 0x11d   : > { %v6478_v58 = vpop.permute.xlu1 %3115 }
 0x120   : > { %4766 = vmatmul.mubr.msk.bf16.gmra.mrb[20].mxu1 %vm1102_vm1, %v6218_v1 }
 0x121   : > { %4924 = vmatmul.mubr.msk.bf16.gmra.mrb[8].mxu0 %vm1102_vm1, %v5942_v59  ;;  %4769 = vmatprep.mubr.msk.bf16.mxu1 %vm1102_vm1, %v7142_v3  ;;  %v1072_v59 = vrot.slane %v993_v7, 1 }
 0x122   : > { %4927 = vmatprep.mubr.msk.bf16.mxu0 %vm1102_vm1, %v5954_v34  ;;  %v1074_v34 = vrot.slane %v1000_v50, 1 }
 0x128   : > { %4770 = vmatmul.mubr.msk.bf16.gmra.mrb[24].mxu1 %vm1102_vm1, %v6242_v60  ;;  %v3060_v60 = vunpack.c.0.s8 %v3059_v32 }
 0x129   : > { %4928 = vmatmul.mubr.msk.bf16.gmra.mrb[12].mxu0 %vm1102_vm1, %v5998_v29  ;;  %4773 = vmatprep.mubr.msk.bf16.mxu1 %vm1102_vm1, %v6275_v24 }
 0x12a   : > { %4931 = vmatprep.mubr.msk.bf16.mxu0 %vm1102_vm1, %v6002_v20  ;;  %v6483_v20 = vpop.permute.xlu1 %3139 }
 0x130   : > { %4774 = vmatmul.mubr.msk.bf16.gmra.mrb[28].mxu1 %vm1102_vm1, %v6300_v10 }
 0x131   : > { %4932 = vmatmul.mubr.msk.bf16.gmra.mrb[16].mxu0 %vm1102_vm1, %v6033_v54  ;;  %4795 = vmatprep.mubr.msk.bf16.mxu1 %vm1102_vm1, %v5835_v56  ;;  %v1073_v56 = vor.u32 %v1072_v59, %v990_v31  ;;  %v6480_v54 = vpop.permute.xlu0 %3103  ;;  %v7145_v31 = vld [vmem:[#allocation11_spill] sm:$0xff] }
 0x132   : > { %4935 = vmatprep.mubr.msk.bf16.mxu0 %vm1102_vm1, %v6039_v27 }
 0x133   : > { %v1075_v29 = vsel %vm1026_vm2, %v1073_v56, %v1074_v34 }
 0x136   : > { %v6496_v41 = vpop.permute.xlu1 %3163 }
 0x138   : > { %4796 = vmatmul.mubr.msk.bf16.vlgmr.msra.gmra.mrb[16].mxu1 %vm1102_vm1, %v5899_v4 }
 0x139   : > { %4936 = vmatmul.mubr.msk.bf16.gmra.mrb[20].mxu0 %vm1102_vm1, %v6079_v19  ;;  %4799 = vmatprep.mubr.msk.bf16.mxu1 %vm1102_vm1, %v5906_v5  ;;  %v1076_v5 = vor.u32 %v1074_v34, %v997_v57  ;;  %v7146_v57 = vld [vmem:[#allocation10_spill] sm:$0xff] }
 0x13a   : > { %4939 = vmatprep.mubr.msk.bf16.mxu0 %vm1102_vm1, %v7143_v26  ;;  %v6485_v4 = vpop.permute.xlu0 %3127  ;;  %v6540_v10 = vsub.s32 %v3060_v60, %v7146_v57 }
 0x13b   : > { %v1098_v43 = vsel %vm5761_vm4, %v1076_v5, 0  ;;  %v6502_v19 = vpop.permute.xlu1 %3187 }
 0x13c   : > { %v3088_v57 = vrot.slane %v6454_v21, %v6540_v10 }
 0x13e   : > { %v6498_v27 = vpop.permute.xlu0 %3151 }
 0x140   : > { %4800 = vmatmul.mubr.msk.bf16.gmra.mrb[20].mxu1 %vm1102_vm1, %v5938_v6 }
 0x141   : > { %4940 = vmatmul.mubr.msk.bf16.gmra.mrb[24].mxu0 %vm1102_vm1, %v7144_v48  ;;  %4803 = vmatprep.mubr.msk.bf16.mxu1 %vm1102_vm1, %v5944_v39  ;;  %v6511_v39 = vpop.permute.xlu1 %3211 }
 0x142   : > { %4943 = vmatprep.mubr.msk.bf16.mxu0 %vm1102_vm1, %v1075_v29  ;;  %v6504_v38 = vpop.permute.xlu0 %3175 }
 0x145   : > { %v6515_v63 = vpop.permute.xlu1 %3235 }
 0x146   : > { %v6513_v6 = vpop.permute.xlu0 %3199 }
 0x148   : > { %4804 = vmatmul.mubr.msk.bf16.gmra.mrb[24].mxu1 %vm1102_vm1, %v5770_v9 }
 0x149   : > { %4944 = vmatmul.mubr.msk.bf16.gmra.mrb[28].mxu0 %vm1102_vm1, %v1098_v43  ;;  %4807 = vmatprep.mubr.msk.bf16.mxu1 %vm1102_vm1, %v5891_v13  ;;  %v3052_v13 = vpack.c.bf16 %v3051_v44, %v3051_v44 }
 0x14a   : > { %v6517_v2 = vpop.permute.xlu0 %3223  ;;  %v6524_v35 = vpop.permute.xlu1 %3259 }
 0x14b   : > { %v3438_v45 = vpack.i.b16 %v3052_v13, %v3052_v13 }
 0x14d   : > { %v3443_v24 = vrot.slane %v3438_v45, %v7145_v31 }
 0x14e   : > { %v6526_v9 = vpop.permute.xlu0 %3247  ;;  %v6528_v28 = vpop.permute.xlu1 %3283 }
 0x14f   : > { %v6544_v40 = vcombine.low %v3443_v24, %v3443_v24 }
 0x150   : > { %4808 = vmatmul.mubr.msk.bf16.gmra.mrb[28].mxu1 %vm1102_vm1, %v5893_v17 }
 0x152   : > { %v6530_v25 = vpop.permute.xlu0 %3271  ;;  %v6532_v1 = vpop.permute.xlu1 %3307 }
 0x156   : > { %v6534_v17 = vpop.permute.xlu0 %3295  ;;  %v6537_v7 = vpop.permute.xlu1 %3331 }
 0x15a   : > { %v6542_v50 = vpop.permute.xlu0 %3319  ;;  %v3356_v62 = vpop.permute.xlu1 %3355 }
 0x15b   : > { %v3364_v15 = vrot.slane %v3356_v62, %v6540_v10  ;;  %v3064_v62 = vrot.slane %v6458_v42, %v6540_v10 }
 0x15d   : > { %v6549_v55 = vmul.bf16 %v6544_v40, %v3364_v15  ;;  %v3100_v15 = vrot.slane %v6460_v61, %v6540_v10  ;;  %v6611_v21 = vmul.bf16 %v6544_v40, %v3064_v62  ;;  %v3160_v62 = vrot.slane %v6498_v27, %v6540_v10 }
 0x15e   : > { %v3344_v16 = vpop.permute.xlu0 %3343  ;;  %v3380_v37 = vpop.permute.xlu1 %3379 }
 0x15f   : > { %v3352_v8 = vrot.slane %v3344_v16, %v6540_v10  ;;  %v3388_v11 = vrot.slane %v3380_v37, %v6540_v10  ;;  %v3076_v16 = vrot.slane %v6464_v12, %v6540_v10  ;;  %v6606_v37 = vmul.bf16 %v6544_v40, %v3088_v57 }
 0x160   : > { %v6614_v42 = vmul.bf16 %v6544_v40, %v3100_v15  ;;  %v3124_v12 = vrot.slane %v6478_v58, %v6540_v10  ;;  %v3196_v15 = vrot.slane %v6502_v19, %v6540_v10  ;;  %v3232_v19 = vrot.slane %v6517_v2, %v6540_v10 }
 0x161   : > { %v6552_v51 = vmul.bf16 %v6544_v40, %v3352_v8  ;;  %v6559_v0 = vmul.bf16 %v6544_v40, %v3388_v11  ;;  %v2994_v8 = vld [vmem:[%s7060_s5] sm:$0x1]  ;;  %v6617_v61 = vmul.bf16 %v6544_v40, %v3076_v16  ;;  %v3184_v16 = vrot.slane %v6504_v38, %v6540_v10 }
 0x162   : > { %v3368_v23 = vpop.permute.xlu0 %3367  ;;  %v3404_v36 = vpop.permute.xlu1 %3403  ;;  %v6636_v58 = vmul.bf16 %v6544_v40, %v3124_v12  ;;  %v3268_v38 = vrot.slane %v6524_v35, %v6540_v10 }
 0x163   : > { %v3376_v22 = vrot.slane %v3368_v23, %v6540_v10  ;;  %v3412_v30 = vrot.slane %v3404_v36, %v6540_v10 }
 0x165   : > { %v6562_v33 = vmul.bf16 %v6544_v40, %v3376_v22  ;;  %v6569_v49 = vmul.bf16 %v6544_v40, %v3412_v30  ;;  %v3112_v22 = vrot.slane %v6480_v54, %v6540_v10  ;;  %v2995_v30 = vpack.c.bf16 %v2994_v8, %v2994_v8 }
 0x166   : > { %v3392_v52 = vpop.permute.xlu0 %3391  ;;  %v3428_v3 = vpop.permute.xlu1 %3427  ;;  %v3136_v54 = vrot.slane %v6485_v4, %v6540_v10  ;;  %v3220_v4 = vrot.slane %v6511_v39, %v6540_v10 }
 0x167   : > { %v3400_v53 = vrot.slane %v3392_v52, %v6540_v10  ;;  %v3436_v59 = vrot.slane %v3428_v3, %v6540_v10  ;;  %v3148_v52 = vrot.slane %v6483_v20, %v6540_v10  ;;  %v4434_v3 = vcombine.low %v6606_v37, %v6614_v42 }
 0x168   : > { %v3172_v20 = vrot.slane %v6496_v41, %v6540_v10  ;;  %v3208_v41 = vrot.slane %v6513_v6, %v6540_v10  ;;  %v3244_v37 = vrot.slane %v6515_v63, %v6540_v10 }
 0x169   : > { %v6572_v14 = vmul.bf16 %v6544_v40, %v3400_v53  ;;  %v6579_v29 = vmul.bf16 %v6544_v40, %v3436_v59  ;;  %v4433_v59 = vcombine.low %v6611_v21, %v6617_v61  ;;  %v6646_v57 = vmul.bf16 %v6544_v40, %v3148_v52 }
 0x16a   : > { %v3416_v26 = vpop.permute.xlu0 %3415  ;;  %v3256_v61 = vrot.slane %v6526_v9, %v6540_v10  ;;  %v6674_v63 = vmul.bf16 %v6544_v40, %v3172_v20  ;;  %v6682_v52 = vmul.bf16 %v6544_v40, %v3160_v62  ;;  %v6685_v9 = vmul.bf16 %v6544_v40, %v3196_v15 }
 0x16b   : > { %v3424_v34 = vrot.slane %v3416_v26, %v6540_v10  ;;  %v6639_v26 = vmul.bf16 %v6544_v40, %v3112_v22  ;;  %v6671_v22 = vmul.bf16 %v6544_v40, %v3136_v54  ;;  %v6702_v62 = vmul.bf16 %v6544_v40, %v3232_v19 }
 0x16c   : > { %v6705_v15 = vmul.bf16 %v6544_v40, %v3268_v38  ;;  %v3280_v19 = vrot.slane %v6530_v25, %v6540_v10 }
 0x16d   : > { %v6582_v48 = vmul.bf16 %v6544_v40, %v3424_v34  ;;  %v2997_v34 = vpack.i.b16 %v2995_v30, %v2995_v30 }
 0x16f   : > { %v6679_v2 = vrot.slane %v2997_v34, %v7145_v31  ;;  %v6699_v31 = vmul.bf16 %v6544_v40, %v3244_v37 }
 0x1cb   : > { %v4747_v43 = vpop.f32.mrb[0].mxu1 }
 0x1cc   : > { %v1803_v44 = vpop.f32.mrb[1].mxu1 }
 0x1cd   : > { %v4748_v13 = vpop.f32.mrb[2].mxu1 }
 0x1ce   : > { %v1806_v47 = vpop.f32.mrb[3].mxu1 }
 0x1d3   : > { %v6586_v32 = vpop.f32.mrb[4].mxu1 }
 0x1d4   : > { %v6588_v45 = vpop.f32.mrb[5].mxu1 }
 0x1d5   : > { %v6590_v60 = vpop.f32.mrb[6].mxu1 }
 0x1d6   : > { %v6592_v24 = vpop.f32.mrb[7].mxu1 }
 0x1db   : > { %v6608_v11 = vpop.f32.mrb[8].mxu1 }
 0x1dc   : > { %v6621_v23 = vpop.f32.mrb[9].mxu1 }
 0x1dd   : > { %v6625_v36 = vpop.f32.mrb[10].mxu1 }
 0x1de   : > { %v6629_v53 = vpop.f32.mrb[11].mxu1 }
 0x1e3   : > { %v6660_v21 = vpop.f32.mrb[12].mxu1 }
 0x1e4   : > { %v4917_v8 = vpop.f32.mrb[0].mxu0  ;;  %v6668_v39 = vpop.f32.mrb[13].mxu1 }
 0x1e5   : > { %v4949_v42 = vadd.f32 %v4917_v8, %v4747_v43  ;;  %v2819_v27 = vpop.f32.mrb[1].mxu0  ;;  %v6676_v43 = vpop.f32.mrb[14].mxu1  ;;  %v6693_v8 = vmul.bf16 %v6544_v40, %v3220_v4  ;;  %v4435_v4 = vcombine.low %v6639_v26, %v6636_v58 }
 0x1e6   : > { %v4950_v12 = vadd.f32 %v2819_v27, %v1803_v44  ;;  %v4918_v6 = vpop.f32.mrb[2].mxu0  ;;  %v6688_v44 = vmul.bf16 %v6544_v40, %v3184_v16  ;;  %v6690_v54 = vpop.f32.mrb[15].mxu1  ;;  %v6708_v16 = vmul.bf16 %v6544_v40, %v3256_v61 }
 0x1e7   : > { %v4951_v30 = vadd.f32 %v4918_v6, %v4748_v13  ;;  %v2822_v35 = vpop.f32.mrb[3].mxu0  ;;  %v6696_v13 = vmul.bf16 %v6544_v40, %v3208_v41  ;;  %v3292_v41 = vrot.slane %v6528_v28, %v6540_v10 }
 0x1e8   : > { %v4952_v20 = vadd.f32 %v2822_v35, %v1806_v47 }
 0x1e9   : > { %v2979_v34 = vpack.c.bf16 %v4951_v30, %v4949_v42  ;;  %v4436_v42 = vcombine.low %v6671_v22, %v6646_v57 }
 0x1ea   : > { %v2978_v47 = vpack.c.bf16 %v4952_v20, %v4950_v12 }
 0x1eb   : > { %v3004_v37 = vadd.bf16 %v6679_v2, %v2979_v34 }
 0x1ec   : > { %v3003_v38 = vadd.bf16 %v6679_v2, %v2978_v47  ;;  %v4921_v61 = vpop.f32.mrb[4].mxu0  ;;  %v6733_v47 = vmul.bf16 %v6544_v40, %v3292_v41 }
 0x1ed   : > { %v3577_v6 = vadd.bf16 %v4434_v3, %v3004_v37  ;;  %v4953_v30 = vadd.f32 %v4921_v61, %v6586_v32  ;;  %v2835_v57 = vpop.f32.mrb[5].mxu0  ;;  %v6737_v37 = vmul.bf16 %v6544_v40, %v3280_v19 }
 0x1ee   : > { %v3576_v35 = vadd.bf16 %v4433_v59, %v3003_v38  ;;  %v4954_v20 = vadd.f32 %v2835_v57, %v6588_v45  ;;  %v4922_v34 = vpop.f32.mrb[6].mxu0 }
 0x1ef   : > { %vm3593_vm8 = vcmp.ge.bf16.partialorder %v3577_v6, 0  ;;  %v3609_v56 = vmul.bf16 1045249613, %v3577_v6  ;;  %v4955_v3 = vadd.f32 %v4922_v34, %v6590_v60  ;;  %v2838_v32 = vpop.f32.mrb[7].mxu0 }
 0x1f0   : > { %vm3592_vm9 = vcmp.ge.bf16.partialorder %v3576_v35, 0  ;;  %v3608_v61 = vmul.bf16 1045249613, %v3576_v35  ;;  %v4956_v5 = vadd.f32 %v2838_v32, %v6592_v24 }
 0x1f1   : > { %v3625_v45 = vsel %vm3593_vm8, %v3577_v6, %v3609_v56  ;;  %v2981_v60 = vpack.c.bf16 %v4955_v3, %v4953_v30 }
 0x1f2   : > { %v3642_v59 = vunpack.c.l.bf16 %v3625_v45  ;;  %v3643_v41 = vunpack.c.h.bf16 %v3625_v45  ;;  %v4451_v19 = vcombine.low %v3625_v45, %v3625_v45  ;;  %v4452_v38 = vcombine.high %v3625_v45, %v3625_v45 }
 0x1f3   : > { %v3624_v24 = vsel %vm3592_vm9, %v3576_v35, %v3608_v61  ;;  %v3006_v34 = vadd.bf16 %v6679_v2, %v2981_v60  ;;  %v2980_v32 = vpack.c.bf16 %v4956_v5, %v4954_v20 }
 0x1f4   : > { %v3676_v6 = vsel %vm3672_vm10, %v3642_v59, 0.0  ;;  %v3678_v30 = vsel %vm3672_vm10, %v3643_v41, 0.0  ;;  %3962 = vst.msk [vmem:[%s6745_s29 + $0x8] sm:$0xf] %vm3959_vm11, %v4451_v19  ;;  %3963 = vst.msk [vmem:[%s6745_s29 + $0xc] sm:$0xf] %vm3959_vm11, %v4452_v38  ;;  %v3640_v35 = vunpack.c.l.bf16 %v3624_v24  ;;  %v3641_v61 = vunpack.c.h.bf16 %v3624_v24 }
 0x1f5   : > { %v4925_v3 = vpop.f32.mrb[8].mxu0  ;;  %v4449_v5 = vcombine.low %v3624_v24, %v3624_v24  ;;  %v4450_v20 = vcombine.high %v3624_v24, %v3624_v24  ;;  %v3744_v60 = vmul.f32 %v3642_v59, %v3642_v59  ;;  %v3745_v46 = vmul.f32 %v3643_v41, %v3643_v41 }
 0x1f6   : > { %v2851_v45 = vpop.f32.mrb[9].mxu0  ;;  %v3579_v57 = vadd.bf16 %v4436_v42, %v3006_v34  ;;  %v3005_v56 = vadd.bf16 %v6679_v2, %v2980_v32  ;;  %v3673_v18 = vsel %vm3672_vm10, %v3640_v35, 0.0  ;;  %v3674_v19 = vsel %vm3672_vm10, %v3641_v61, 0.0 }
 0x1f7   : > { %v4926_v25 = vpop.f32.mrb[10].mxu0  ;;  %v3742_v28 = vmul.f32 %v3640_v35, %v3640_v35  ;;  %v3743_v38 = vmul.f32 %v3641_v61, %v3641_v61  ;;  %3960 = vst.msk [vmem:[%s6745_s29] sm:$0xf] %vm3959_vm11, %v4449_v5  ;;  %3961 = vst.msk [vmem:[%s6745_s29 + $0x4] sm:$0xf] %vm3959_vm11, %v4450_v20  ;;  %v3675_v27 = vadd.f32 %v3674_v19, %v3673_v18  ;;  %v3777_v35 = vsel %vm3672_vm10, %v3744_v60, 0.0 }
 0x1f8   : > { %v2854_v22 = vpop.f32.mrb[11].mxu0  ;;  %vm3595_vm12 = vcmp.ge.bf16.partialorder %v3579_v57, 0  ;;  %v3611_v24 = vmul.bf16 1045249613, %v3579_v57  ;;  %v3578_v42 = vadd.bf16 %v4435_v4, %v3005_v56  ;;  %v4957_v34 = vadd.f32 %v4925_v3, %v6608_v11 }
 0x1f9   : > { %v3774_v59 = vsel %vm3672_vm10, %v3742_v28, 0.0  ;;  %v3775_v41 = vsel %vm3672_vm10, %v3743_v38, 0.0  ;;  %v4958_v32 = vadd.f32 %v2851_v45, %v6621_v23  ;;  %v3677_v61 = vadd.f32 %v3676_v6, %v3675_v27 }
 0x1fa   : > { %v3776_v5 = vadd.f32 %v3775_v41, %v3774_v59  ;;  %v3627_v18 = vsel %vm3595_vm12, %v3579_v57, %v3611_v24  ;;  %vm3594_vm13 = vcmp.ge.bf16.partialorder %v3578_v42, 0  ;;  %v3610_v26 = vmul.bf16 1045249613, %v3578_v42 }
 0x1fb   : > { %v3646_v20 = vunpack.c.l.bf16 %v3627_v18  ;;  %v4455_v19 = vcombine.low %v3627_v18, %v3627_v18  ;;  %v4456_v12 = vcombine.high %v3627_v18, %v3627_v18  ;;  %v3679_v4 = vadd.f32 %v3678_v30, %v3677_v61 }
 0x1fc   : > { %v3778_v58 = vadd.f32 %v3777_v35, %v3776_v5  ;;  %v4959_v28 = vadd.f32 %v4926_v25, %v6625_v36  ;;  %v4929_v56 = vpop.f32.mrb[12].mxu0  ;;  %v3340_v11 = vrot.slane %v6537_v7, %v6540_v10  ;;  %v3328_v23 = vrot.slane %v6542_v50, %v6540_v10 }
 0x1fd   : > { %v3779_v27 = vsel %vm3672_vm10, %v3745_v46, 0.0  ;;  %v3647_v6 = vunpack.c.h.bf16 %v3627_v18  ;;  %3966 = vst.msk [vmem:[%s6745_s29 + $0x18] sm:$0xf] %vm3959_vm11, %v4455_v19  ;;  %3967 = vst.msk [vmem:[%s6745_s29 + $0x1c] sm:$0xf] %vm3959_vm11, %v4456_v12  ;;  %v2867_v57 = vpop.f32.mrb[13].mxu0  ;;  %v3626_v3 = vsel %vm3594_vm13, %v3578_v42, %v3610_v26  ;;  %v4960_v36 = vadd.f32 %v2854_v22, %v6629_v53 }
 0x1fe   : > { %v3780_v45 = vadd.f32 %v3779_v27, %v3778_v58  ;;  %v2983_v30 = vpack.c.bf16 %v4959_v28, %v4957_v34  ;;  %v4930_v25 = vpop.f32.mrb[14].mxu0  ;;  %v3684_v7 = vsel %vm3672_vm10, %v3646_v20, 0.0  ;;  %v3748_v60 = vmul.f32 %v3646_v20, %v3646_v20 }
 0x1ff   : > { %v3644_v50 = vunpack.c.l.bf16 %v3626_v3  ;;  %v3645_v38 = vunpack.c.h.bf16 %v3626_v3  ;;  %v2870_v46 = vpop.f32.mrb[15].mxu0  ;;  %v4453_v24 = vcombine.low %v3626_v3, %v3626_v3  ;;  %v4454_v59 = vcombine.high %v3626_v3, %v3626_v3 }
 0x200   : > { %v3008_v41 = vadd.bf16 %v6679_v2, %v2983_v30  ;;  %v2982_v12 = vpack.c.bf16 %v4960_v36, %v4958_v32  ;;  %v3749_v35 = vmul.f32 %v3647_v6, %v3647_v6  ;;  %v7147_v22 = vcombine.low %v6688_v44, %v6685_v9 }
 0x201   : > { %v3680_v42 = vsel %vm3672_vm10, %v3644_v50, 0.0  ;;  %v3746_v34 = vmul.f32 %v3644_v50, %v3644_v50  ;;  %v3747_v61 = vmul.f32 %v3645_v38, %v3645_v38  ;;  %3964 = vst.msk [vmem:[%s6745_s29 + $0x10] sm:$0xf] %vm3959_vm11, %v4453_v24  ;;  %3965 = vst.msk [vmem:[%s6745_s29 + $0x14] sm:$0xf] %vm3959_vm11, %v4454_v59  ;;  %v4961_v20 = vadd.f32 %v4929_v56, %v6660_v21 }
 0x202   : > { %v3681_v53 = vadd.f32 %v3680_v42, %v3679_v4  ;;  %v3581_v5 = vadd.bf16 %v7147_v22, %v3008_v41  ;;  %v3007_v18 = vadd.bf16 %v6679_v2, %v2982_v12  ;;  %v3682_v32 = vsel %vm3672_vm10, %v3645_v38, 0.0 }
 0x203   : > { %v3781_v19 = vsel %vm3672_vm10, %v3746_v34, 0.0  ;;  %v4962_v58 = vadd.f32 %v2867_v57, %v6668_v39  ;;  %v4963_v26 = vadd.f32 %v4930_v25, %v6676_v43  ;;  %v3783_v9 = vsel %vm3672_vm10, %v3747_v61, 0.0 }
 0x204   : > { %v3683_v4 = vadd.f32 %v3682_v32, %v3681_v53  ;;  %v3782_v28 = vadd.f32 %v3781_v19, %v3780_v45  ;;  %vm3597_vm14 = vcmp.ge.bf16.partialorder %v3581_v5, 0  ;;  %v3613_v27 = vmul.bf16 1045249613, %v3581_v5  ;;  %v4933_v3 = vpop.f32.mrb[16].mxu0 }
 0x205   : > { %v7148_v44 = vcombine.low %v6682_v52, %v6674_v63  ;;  %v2985_v21 = vpack.c.bf16 %v4963_v26, %v4961_v20  ;;  %v4964_v56 = vadd.f32 %v2870_v46, %v6690_v54  ;;  %v2883_v36 = vpop.f32.mrb[17].mxu0  ;;  %v3686_v50 = vsel %vm3672_vm10, %v3647_v6, 0.0 }
 0x206   : > { %v3685_v39 = vadd.f32 %v3684_v7, %v3683_v4  ;;  %v3784_v57 = vadd.f32 %v3783_v9, %v3782_v28  ;;  %v3629_v43 = vsel %vm3597_vm14, %v3581_v5, %v3613_v27  ;;  %v4934_v45 = vpop.f32.mrb[18].mxu0  ;;  %v3785_v25 = vsel %vm3672_vm10, %v3748_v60, 0.0 }
 0x207   : > { %v3580_v30 = vadd.bf16 %v7148_v44, %v3007_v18  ;;  %v3650_v38 = vunpack.c.l.bf16 %v3629_v43  ;;  %v4459_v24 = vcombine.low %v3629_v43, %v3629_v43  ;;  %v4460_v59 = vcombine.high %v3629_v43, %v3629_v43  ;;  %v6809_v41 = vpop.f32.mrb[19].mxu0 }
 0x208   : > { %v3786_v63 = vadd.f32 %v3785_v25, %v3784_v57  ;;  %v3687_v54 = vadd.f32 %v3686_v50, %v3685_v39  ;;  %v6812_v46 = vmul.bf16 %v6544_v40, %v3340_v11  ;;  %v6815_v6 = vmul.bf16 %v6544_v40, %v3328_v23 }
 0x209   : > { %vm3596_vm15 = vcmp.ge.bf16.partialorder %v3580_v30, 0  ;;  %v3612_v52 = vmul.bf16 1045249613, %v3580_v30  ;;  %v3787_v7 = vsel %vm3672_vm10, %v3749_v35, 0.0  ;;  %v3651_v12 = vunpack.c.h.bf16 %v3629_v43  ;;  %3970 = vst.msk [vmem:[%s6745_s29 + $0x28] sm:$0xf] %vm3959_vm11, %v4459_v24 }
 0x20a   : > { %3971 = vst.msk [vmem:[%s6745_s29 + $0x2c] sm:$0xf] %vm3959_vm11, %v4460_v59  ;;  %v3788_v42 = vadd.f32 %v3787_v7, %v3786_v63  ;;  %v3010_v34 = vadd.bf16 %v6679_v2, %v2985_v21  ;;  %v2984_v61 = vpack.c.bf16 %v4964_v56, %v4962_v58  ;;  %v3692_v53 = vsel %vm3672_vm10, %v3650_v38, 0.0 }
 0x20b   : > { %v3628_v60 = vsel %vm3596_vm15, %v3580_v30, %v3612_v52  ;;  %v3752_v11 = vmul.f32 %v3650_v38, %v3650_v38  ;;  %v7149_v35 = vcombine.low %v6702_v62, %v6699_v31  ;;  %v3753_v26 = vmul.f32 %v3651_v12, %v3651_v12  ;;  %v4797_v27 = vpop.f32.mrb[16].mxu1 }
 0x20c   : > { %v3648_v22 = vunpack.c.l.bf16 %v3628_v60  ;;  %v3649_v23 = vunpack.c.h.bf16 %v3628_v60  ;;  %v4457_v5 = vcombine.low %v3628_v60, %v3628_v60  ;;  %v4458_v18 = vcombine.high %v3628_v60, %v3628_v60  ;;  %v6828_v19 = vpop.f32.mrb[20].mxu0  ;;  %v2069_v21 = vpop.f32.mrb[17].mxu1 }
 0x20d   : > { %v3583_v20 = vadd.bf16 %v7149_v35, %v3010_v34  ;;  %v3009_v32 = vadd.bf16 %v6679_v2, %v2984_v61  ;;  %v6831_v9 = vpop.f32.mrb[21].mxu0  ;;  %v7150_v62 = vcombine.low %v6696_v13, %v6693_v8  ;;  %v4965_v57 = vadd.f32 %v4933_v3, %v4797_v27  ;;  %v4798_v25 = vpop.f32.mrb[18].mxu1 }
 0x20e   : > { %v3688_v58 = vsel %vm3672_vm10, %v3648_v22, 0.0  ;;  %v3750_v4 = vmul.f32 %v3648_v22, %v3648_v22  ;;  %v3751_v28 = vmul.f32 %v3649_v23, %v3649_v23  ;;  %3968 = vst.msk [vmem:[%s6745_s29 + $0x20] sm:$0xf] %vm3959_vm11, %v4457_v5  ;;  %3969 = vst.msk [vmem:[%s6745_s29 + $0x24] sm:$0xf] %vm3959_vm11, %v4458_v18  ;;  %v4938_v56 = vpop.f32.mrb[22].mxu0  ;;  %v6842_v43 = vadd.f32 %v2883_v36, %v2069_v21 }
 0x20f   : > { %v3689_v44 = vadd.f32 %v3688_v58, %v3687_v54  ;;  %vm3599_vm0 = vcmp.ge.bf16.partialorder %v3583_v20, 0  ;;  %v3615_v31 = vmul.bf16 1045249613, %v3583_v20  ;;  %v3582_v30 = vadd.bf16 %v7150_v62, %v3009_v32  ;;  %v2902_v38 = vpop.f32.mrb[23].mxu0  ;;  %v2072_v8 = vpop.f32.mrb[19].mxu1 }
 0x210   : > { %v3690_v50 = vsel %vm3672_vm10, %v3649_v23, 0.0  ;;  %v3789_v39 = vsel %vm3672_vm10, %v3750_v4, 0.0  ;;  %v3791_v63 = vsel %vm3672_vm10, %v3751_v28, 0.0  ;;  %v4967_v3 = vadd.f32 %v4934_v45, %v4798_v25 }
 0x211   : > { %v3691_v24 = vadd.f32 %v3690_v50, %v3689_v44  ;;  %v3790_v59 = vadd.f32 %v3789_v39, %v3788_v42  ;;  %v3631_v52 = vsel %vm3599_vm0, %v3583_v20, %v3615_v31  ;;  %vm3598_vm1 = vcmp.ge.bf16.partialorder %v3582_v30, 0 }
 0x212   : > { %v3654_v13 = vunpack.c.l.bf16 %v3631_v52  ;;  %v4463_v54 = vcombine.low %v3631_v52, %v3631_v52  ;;  %v4464_v7 = vcombine.high %v3631_v52, %v3631_v52  ;;  %v3614_v61 = vmul.bf16 1045249613, %v3582_v30 }
 0x213   : > { %v3693_v60 = vadd.f32 %v3692_v53, %v3691_v24  ;;  %v3792_v34 = vadd.f32 %v3791_v63, %v3790_v59  ;;  %v3694_v36 = vsel %vm3672_vm10, %v3651_v12, 0.0  ;;  %v3793_v22 = vsel %vm3672_vm10, %v3752_v11, 0.0  ;;  %v4801_v11 = vpop.f32.mrb[20].mxu1 }
 0x214   : > { %v3795_v42 = vsel %vm3672_vm10, %v3753_v26, 0.0  ;;  %v3655_v23 = vunpack.c.h.bf16 %v3631_v52  ;;  %3974 = vst.msk [vmem:[%s6745_s29 + $0x38] sm:$0xf] %vm3959_vm11, %v4463_v54  ;;  %3975 = vst.msk [vmem:[%s6745_s29 + $0x3c] sm:$0xf] %vm3959_vm11, %v4464_v7  ;;  %v3630_v18 = vsel %vm3598_vm1, %v3582_v30, %v3614_v61  ;;  %v2987_v20 = vpack.c.bf16 %v4967_v3, %v4965_v57  ;;  %v6852_v32 = vpop.f32.mrb[24].mxu0 }
 0x215   : > { %v3794_v5 = vadd.f32 %v3793_v22, %v3792_v34  ;;  %v3695_v35 = vadd.f32 %v3694_v36, %v3693_v60  ;;  %v3700_v53 = vsel %vm3672_vm10, %v3654_v13, 0.0  ;;  %v3756_v45 = vmul.f32 %v3654_v13, %v3654_v13  ;;  %v6855_v26 = vpop.f32.mrb[25].mxu0  ;;  %v2085_v31 = vpop.f32.mrb[21].mxu1 }
 0x216   : > { %v3652_v58 = vunpack.c.l.bf16 %v3630_v18  ;;  %v3653_v12 = vunpack.c.h.bf16 %v3630_v18  ;;  %v4461_v28 = vcombine.low %v3630_v18, %v3630_v18  ;;  %v4462_v27 = vcombine.high %v3630_v18, %v3630_v18  ;;  %v6858_v62 = vpop.f32.mrb[26].mxu0  ;;  %v4802_v57 = vpop.f32.mrb[22].mxu1 }
 0x217   : > { %v3796_v4 = vadd.f32 %v3795_v42, %v3794_v5  ;;  %v3012_v44 = vadd.bf16 %v6679_v2, %v2987_v20  ;;  %v3757_v30 = vmul.f32 %v3655_v23, %v3655_v23  ;;  %v2918_v25 = vpop.f32.mrb[27].mxu0  ;;  %v7151_v59 = vcombine.low %v6737_v37, %v6733_v47  ;;  %v2088_v54 = vpop.f32.mrb[23].mxu1 }
 0x218   : > { %v3696_v21 = vsel %vm3672_vm10, %v3652_v58, 0.0  ;;  %v3754_v50 = vmul.f32 %v3652_v58, %v3652_v58  ;;  %v3755_v39 = vmul.f32 %v3653_v12, %v3653_v12  ;;  %3972 = vst.msk [vmem:[%s6745_s29 + $0x30] sm:$0xf] %vm3959_vm11, %v4461_v28  ;;  %3973 = vst.msk [vmem:[%s6745_s29 + $0x34] sm:$0xf] %vm3959_vm11, %v4462_v27  ;;  %v4968_v52 = vadd.f32 %v6809_v41, %v2072_v8 }
 0x219   : > { %v3697_v24 = vadd.f32 %v3696_v21, %v3695_v35  ;;  %v3585_v63 = vadd.bf16 %v7151_v59, %v3012_v44  ;;  %v4969_v13 = vadd.f32 %v6828_v19, %v4801_v11  ;;  %v3698_v7 = vsel %vm3672_vm10, %v3653_v12, 0.0 }
 0x21a   : > { %v3797_v60 = vsel %vm3672_vm10, %v3754_v50, 0.0  ;;  %v4970_v34 = vadd.f32 %v6831_v9, %v2085_v31  ;;  %v4971_v61 = vadd.f32 %v4938_v56, %v4802_v57  ;;  %v3799_v42 = vsel %vm3672_vm10, %v3755_v39, 0.0 }
 0x21b   : > { %v3699_v3 = vadd.f32 %v3698_v7, %v3697_v24  ;;  %v3798_v36 = vadd.f32 %v3797_v60, %v3796_v4  ;;  %vm3601_vm2 = vcmp.ge.bf16.partialorder %v3585_v63, 0  ;;  %v3617_v22 = vmul.bf16 1045249613, %v3585_v63  ;;  %v4805_v12 = vpop.f32.mrb[24].mxu1 }
 0x21c   : > { %v2986_v47 = vpack.c.bf16 %v4968_v52, %v6842_v43  ;;  %v2989_v37 = vpack.c.bf16 %v4971_v61, %v4969_v13  ;;  %v4972_v41 = vadd.f32 %v2902_v38, %v2088_v54  ;;  %v4444_v19 = vcombine.low %v6815_v6, %v6812_v46  ;;  %v6877_v35 = vpop.f32.mrb[28].mxu0 }
 0x21d   : > { %v3701_v8 = vadd.f32 %v3700_v53, %v3699_v3  ;;  %v3800_v5 = vadd.f32 %v3799_v42, %v3798_v36  ;;  %v3633_v18 = vsel %vm3601_vm2, %v3585_v63, %v3617_v22  ;;  %v3702_v9 = vsel %vm3672_vm10, %v3655_v23, 0.0  ;;  %v6881_v43 = vpop.f32.mrb[29].mxu0  ;;  %v2101_v53 = vpop.f32.mrb[25].mxu1 }
 0x21e   : > { %v3801_v56 = vsel %vm3672_vm10, %v3756_v45, 0.0  ;;  %v4467_v20 = vcombine.low %v3633_v18, %v3633_v18  ;;  %v4468_v58 = vcombine.high %v3633_v18, %v3633_v18  ;;  %v3011_v11 = vadd.bf16 %v6679_v2, %v2986_v47  ;;  %v6885_v4 = vpop.f32.mrb[30].mxu0  ;;  %v4806_v45 = vpop.f32.mrb[26].mxu1 }
 0x21f   : > { %v3802_v38 = vadd.f32 %v3801_v56, %v3800_v5  ;;  %v3703_v46 = vadd.f32 %v3702_v9, %v3701_v8  ;;  %v3014_v6 = vadd.bf16 %v6679_v2, %v2989_v37  ;;  %v3803_v28 = vsel %vm3672_vm10, %v3757_v30, 0.0  ;;  %v6892_v44 = vpop.f32.mrb[31].mxu0  ;;  %v2104_v24 = vpop.f32.mrb[27].mxu1 }
 0x220   : > { %v3658_v23 = vunpack.c.l.bf16 %v3633_v18  ;;  %v3659_v27 = vunpack.c.h.bf16 %v3633_v18  ;;  %3978 = vst.msk [vmem:[%s6745_s29 + $0x48] sm:$0xf] %vm3959_vm11, %v4467_v20  ;;  %3979 = vst.msk [vmem:[%s6745_s29 + $0x4c] sm:$0xf] %vm3959_vm11, %v4468_v58  ;;  %v7152_v31 = vcombine.low %v6708_v16, %v6705_v15  ;;  %v2988_v57 = vpack.c.bf16 %v4972_v41, %v4970_v34 }
 0x221   : > { %v3804_v50 = vadd.f32 %v3803_v28, %v3802_v38  ;;  %v3587_v39 = vadd.bf16 %v4444_v19, %v3014_v6  ;;  %v7153_v30 = vrot.slane %v6532_v1, %v6540_v10  ;;  %v7154_v63 = vrot.slane %v6534_v17, %v6540_v10 }
 0x222   : > { %v3584_v21 = vadd.bf16 %v7152_v31, %v3011_v11  ;;  %v4973_v13 = vadd.f32 %v6852_v32, %v4805_v12  ;;  %v4974_v54 = vadd.f32 %v6855_v26, %v2101_v53  ;;  %v3760_v7 = vmul.f32 %v3658_v23, %v3658_v23 }
 0x223   : > { %v3469_v59 = vmul.bf16 %v6544_v40, %v7153_v30  ;;  %v3468_v52 = vmul.bf16 %v6544_v40, %v7154_v63  ;;  %vm3603_vm4 = vcmp.ge.bf16.partialorder %v3587_v39, 0  ;;  %v3619_v16 = vmul.bf16 1045249613, %v3587_v39  ;;  %v4809_v26 = vpop.f32.mrb[28].mxu1 }
 0x224   : > { %vm3600_vm3 = vcmp.ge.bf16.partialorder %v3584_v21, 0  ;;  %v3616_v15 = vmul.bf16 1045249613, %v3584_v21  ;;  %v4975_v60 = vadd.f32 %v6858_v62, %v4806_v45  ;;  %v4976_v34 = vadd.f32 %v2918_v25, %v2104_v24  ;;  %v2117_v62 = vpop.f32.mrb[29].mxu1 }
 0x225   : > { %v3761_v1 = vmul.f32 %v3659_v27, %v3659_v27  ;;  %v3635_v3 = vsel %vm3603_vm4, %v3587_v39, %v3619_v16  ;;  %v3013_v17 = vadd.bf16 %v6679_v2, %v2988_v57  ;;  %v4443_v22 = vcombine.low %v3468_v52, %v3469_v59  ;;  %v4810_v5 = vpop.f32.mrb[30].mxu1 }
 0x226   : > { %v3632_v61 = vsel %vm3600_vm3, %v3584_v21, %v3616_v15  ;;  %v3662_v42 = vunpack.c.l.bf16 %v3635_v3  ;;  %v4471_v47 = vcombine.low %v3635_v3, %v3635_v3  ;;  %v4472_v37 = vcombine.high %v3635_v3, %v3635_v3  ;;  %v6922_v58 = vpop.f32.mrb[31].mxu1 }
 0x227   : > { %v3656_v10 = vunpack.c.l.bf16 %v3632_v61  ;;  %v3657_v40 = vunpack.c.h.bf16 %v3632_v61  ;;  %v4465_v32 = vcombine.low %v3632_v61, %v3632_v61  ;;  %v4466_v36 = vcombine.high %v3632_v61, %v3632_v61 }
 0x228   : > { %v3708_v25 = vsel %vm3672_vm10, %v3658_v23, 0.0  ;;  %v3710_v18 = vsel %vm3672_vm10, %v3659_v27, 0.0  ;;  %v3809_v9 = vsel %vm3672_vm10, %v3760_v7, 0.0  ;;  %v3811_v56 = vsel %vm3672_vm10, %v3761_v1, 0.0  ;;  %3982 = vst.msk [vmem:[%s6745_s29 + $0x58] sm:$0xf] %vm3959_vm11, %v4471_v47 }
 0x229   : > { %v3704_v41 = vsel %vm3672_vm10, %v3656_v10, 0.0  ;;  %v3758_v19 = vmul.f32 %v3656_v10, %v3656_v10  ;;  %v3759_v8 = vmul.f32 %v3657_v40, %v3657_v40  ;;  %3976 = vst.msk [vmem:[%s6745_s29 + $0x40] sm:$0xf] %vm3959_vm11, %v4465_v32  ;;  %3977 = vst.msk [vmem:[%s6745_s29 + $0x44] sm:$0xf] %vm3959_vm11, %v4466_v36  ;;  %v3706_v12 = vsel %vm3672_vm10, %v3657_v40, 0.0 }
 0x22a   : > { %v3705_v20 = vadd.f32 %v3704_v41, %v3703_v46  ;;  %3983 = vst.msk [vmem:[%s6745_s29 + $0x5c] sm:$0xf] %vm3959_vm11, %v4472_v37  ;;  %v3663_v11 = vunpack.c.h.bf16 %v3635_v3  ;;  %v3586_v6 = vadd.bf16 %v4443_v22, %v3013_v17  ;;  %v3716_v23 = vsel %vm3672_vm10, %v3662_v42, 0.0 }
 0x22b   : > { %v3805_v38 = vsel %vm3672_vm10, %v3758_v19, 0.0  ;;  %v2991_v27 = vpack.c.bf16 %v4975_v60, %v4973_v13  ;;  %v3807_v45 = vsel %vm3672_vm10, %v3759_v8, 0.0  ;;  %v2990_v31 = vpack.c.bf16 %v4976_v34, %v4974_v54 }
 0x22c   : > { %v3707_v53 = vadd.f32 %v3706_v12, %v3705_v20  ;;  %v3806_v28 = vadd.f32 %v3805_v38, %v3804_v50  ;;  %vm3602_vm5 = vcmp.ge.bf16.partialorder %v3586_v6, 0  ;;  %v3618_v46 = vmul.bf16 1045249613, %v3586_v6 }
 0x22d   : > { %v3016_v57 = vadd.bf16 %v6679_v2, %v2991_v27  ;;  %v4977_v24 = vadd.f32 %v6877_v35, %v4809_v26  ;;  %v3015_v59 = vadd.bf16 %v6679_v2, %v2990_v31  ;;  %v6932_v63 = vadd.f32 %v6881_v43, %v2117_v62 }
 0x22e   : > { %v3709_v21 = vadd.f32 %v3708_v25, %v3707_v53  ;;  %v3808_v39 = vadd.f32 %v3807_v45, %v3806_v28  ;;  %v3634_v30 = vsel %vm3602_vm5, %v3586_v6, %v3618_v46  ;;  %v4979_v50 = vadd.f32 %v6885_v4, %v4810_v5 }
 0x22f   : > { %v3660_v13 = vunpack.c.l.bf16 %v3634_v30  ;;  %v3661_v15 = vunpack.c.h.bf16 %v3634_v30  ;;  %v4469_v16 = vcombine.low %v3634_v30, %v3634_v30  ;;  %v4470_v7 = vcombine.high %v3634_v30, %v3634_v30 }
 0x230   : > { %v3810_v52 = vadd.f32 %v3809_v9, %v3808_v39  ;;  %v3711_v54 = vadd.f32 %v3710_v18, %v3709_v21  ;;  %v7155_v60 = vcombine.low %v6562_v33, %v6559_v0  ;;  %v7156_v34 = vcombine.low %v6552_v51, %v6549_v55 }
 0x231   : > { %v3764_v43 = vmul.f32 %v3662_v42, %v3662_v42  ;;  %v3712_v61 = vsel %vm3672_vm10, %v3660_v13, 0.0  ;;  %v3762_v3 = vmul.f32 %v3660_v13, %v3660_v13  ;;  %v3763_v4 = vmul.f32 %v3661_v15, %v3661_v15  ;;  %3980 = vst.msk [vmem:[%s6745_s29 + $0x50] sm:$0xf] %vm3959_vm11, %v4469_v16  ;;  %3981 = vst.msk [vmem:[%s6745_s29 + $0x54] sm:$0xf] %vm3959_vm11, %v4470_v7 }
 0x232   : > { %v3589_v35 = vadd.bf16 %v7155_v60, %v3016_v57  ;;  %v3588_v1 = vadd.bf16 %v7156_v34, %v3015_v59  ;;  %v3713_v17 = vadd.f32 %v3712_v61, %v3711_v54  ;;  %v3812_v10 = vadd.f32 %v3811_v56, %v3810_v52 }
 0x233   : > { %v3714_v0 = vsel %vm3672_vm10, %v3661_v15, 0.0  ;;  %v3813_v33 = vsel %vm3672_vm10, %v3762_v3, 0.0  ;;  %v2993_v26 = vpack.c.bf16 %v4979_v50, %v4977_v24  ;;  %v3765_v22 = vmul.f32 %v3663_v11, %v3663_v11 }
 0x234   : > { %vm3605_vm7 = vcmp.ge.bf16.partialorder %v3589_v35, 0  ;;  %v3621_v40 = vmul.bf16 1045249613, %v3589_v35  ;;  %vm3604_vm8 = vcmp.ge.bf16.partialorder %v3588_v1, 0  ;;  %v3620_v55 = vmul.bf16 1045249613, %v3588_v1 }
 0x235   : > { %v3715_v51 = vadd.f32 %v3714_v0, %v3713_v17  ;;  %v3814_v32 = vadd.f32 %v3813_v33, %v3812_v10  ;;  %v3815_v42 = vsel %vm3672_vm10, %v3763_v4, 0.0  ;;  %v3718_v19 = vsel %vm3672_vm10, %v3663_v11, 0.0 }
 0x236   : > { %v3637_v36 = vsel %vm3605_vm7, %v3589_v35, %v3621_v40  ;;  %v3636_v41 = vsel %vm3604_vm8, %v3588_v1, %v3620_v55  ;;  %v3817_v8 = vsel %vm3672_vm10, %v3764_v43, 0.0  ;;  %v3018_v18 = vadd.bf16 %v6679_v2, %v2993_v26 }
 0x237   : > { %v4475_v47 = vcombine.low %v3637_v36, %v3637_v36  ;;  %v4476_v37 = vcombine.high %v3637_v36, %v3637_v36  ;;  %v3717_v62 = vadd.f32 %v3716_v23, %v3715_v51  ;;  %v3816_v25 = vadd.f32 %v3815_v42, %v3814_v32 }
 0x238   : > { %v3666_v5 = vunpack.c.l.bf16 %v3637_v36  ;;  %v3664_v56 = vunpack.c.l.bf16 %v3636_v41  ;;  %v3665_v20 = vunpack.c.h.bf16 %v3636_v41  ;;  %v3819_v38 = vsel %vm3672_vm10, %v3765_v22, 0.0 }
 0x239   : > { %3986 = vst.msk [vmem:[%s6745_s29 + $0x68] sm:$0xf] %vm3959_vm11, %v4475_v47  ;;  %3987 = vst.msk [vmem:[%s6745_s29 + $0x6c] sm:$0xf] %vm3959_vm11, %v4476_v37  ;;  %v3818_v9 = vadd.f32 %v3817_v8, %v3816_v25  ;;  %v3719_v12 = vadd.f32 %v3718_v19, %v3717_v62  ;;  %v4473_v6 = vcombine.low %v3636_v41, %v3636_v41  ;;  %v3667_v11 = vunpack.c.h.bf16 %v3637_v36 }
 0x23a   : > { %v4474_v53 = vcombine.high %v3636_v41, %v3636_v41  ;;  %v3720_v28 = vsel %vm3672_vm10, %v3664_v56, 0.0  ;;  %v3766_v23 = vmul.f32 %v3664_v56, %v3664_v56  ;;  %v3767_v27 = vmul.f32 %v3665_v20, %v3665_v20 }
 0x23b   : > { %v3721_v45 = vadd.f32 %v3720_v28, %v3719_v12  ;;  %v3820_v46 = vadd.f32 %v3819_v38, %v3818_v9  ;;  %3984 = vst.msk [vmem:[%s6745_s29 + $0x60] sm:$0xf] %vm3959_vm11, %v4473_v6  ;;  %v7157_v31 = vcombine.low %v6582_v48, %v6579_v29  ;;  %v4980_v39 = vadd.f32 %v6892_v44, %v6922_v58 }
 0x23c   : > { %3985 = vst.msk [vmem:[%s6745_s29 + $0x64] sm:$0xf] %vm3959_vm11, %v4474_v53  ;;  %v3768_v57 = vmul.f32 %v3666_v5, %v3666_v5  ;;  %v3722_v24 = vsel %vm3672_vm10, %v3665_v20, 0.0  ;;  %v3821_v30 = vsel %vm3672_vm10, %v3766_v23, 0.0  ;;  %v3724_v13 = vsel %vm3672_vm10, %v3666_v5, 0.0 }
 0x23d   : > { %v3591_v21 = vadd.bf16 %v7157_v31, %v3018_v18  ;;  %v3723_v59 = vadd.f32 %v3722_v24, %v3721_v45  ;;  %v3822_v50 = vadd.f32 %v3821_v30, %v3820_v46  ;;  %v3769_v15 = vmul.f32 %v3667_v11, %v3667_v11 }
 0x23e   : > { %v3823_v29 = vsel %vm3672_vm10, %v3767_v27, 0.0  ;;  %v2992_v48 = vpack.c.bf16 %v4980_v39, %v6932_v63  ;;  %v3726_v16 = vsel %vm3672_vm10, %v3667_v11, 0.0  ;;  %v3825_v7 = vsel %vm3672_vm10, %v3768_v57, 0.0 }
 0x23f   : > { %vm3607_vm9 = vcmp.ge.bf16.partialorder %v3591_v21, 0  ;;  %v3623_v52 = vmul.bf16 1045249613, %v3591_v21  ;;  %v3725_v54 = vadd.f32 %v3724_v13, %v3723_v59  ;;  %v3824_v44 = vadd.f32 %v3823_v29, %v3822_v50 }
 0x240   : > { %v3017_v1 = vadd.bf16 %v6679_v2, %v2992_v48  ;;  %v3827_v61 = vsel %vm3672_vm10, %v3769_v15, 0.0  ;;  %v7158_v63 = vcombine.low %v6572_v14, %v6569_v49 }
 0x241   : > { %v3639_v58 = vsel %vm3607_vm9, %v3591_v21, %v3623_v52  ;;  %v3826_v34 = vadd.f32 %v3825_v7, %v3824_v44  ;;  %v3727_v43 = vadd.f32 %v3726_v16, %v3725_v54 }
 0x242   : > { %v4479_v60 = vcombine.low %v3639_v58, %v3639_v58  ;;  %v4480_v35 = vcombine.high %v3639_v58, %v3639_v58  ;;  %v3590_v3 = vadd.bf16 %v7158_v63, %v3017_v1  ;;  %v3670_v10 = vunpack.c.l.bf16 %v3639_v58 }
 0x243   : > { %v3828_v4 = vadd.f32 %v3827_v61, %v3826_v34  ;;  %v3671_v51 = vunpack.c.h.bf16 %v3639_v58 }
 0x244   : > { %3990 = vst.msk [vmem:[%s6745_s29 + $0x78] sm:$0xf] %vm3959_vm11, %v4479_v60  ;;  %3991 = vst.msk [vmem:[%s6745_s29 + $0x7c] sm:$0xf] %vm3959_vm11, %v4480_v35  ;;  %vm3606_vm12 = vcmp.ge.bf16.partialorder %v3590_v3, 0  ;;  %v3772_v14 = vmul.f32 %v3670_v10, %v3670_v10  ;;  %v3732_v62 = vsel %vm3672_vm10, %v3670_v10, 0.0 }
 0x245   : > { %v3622_v17 = vmul.bf16 1045249613, %v3590_v3  ;;  %v3773_v25 = vmul.f32 %v3671_v51, %v3671_v51  ;;  %v3734_v5 = vsel %vm3672_vm10, %v3671_v51, 0.0 }
 0x246   : > { %v3833_v18 = vsel %vm3672_vm10, %v3772_v14, 0.0 }
 0x247   : > { %v3638_v40 = vsel %vm3606_vm12, %v3590_v3, %v3622_v17  ;;  %v3835_v20 = vsel %vm3672_vm10, %v3773_v25, 0.0 }
 0x248   : > { %v3668_v0 = vunpack.c.l.bf16 %v3638_v40  ;;  %v3669_v2 = vunpack.c.h.bf16 %v3638_v40  ;;  %v4477_v33 = vcombine.low %v3638_v40, %v3638_v40  ;;  %v4478_v55 = vcombine.high %v3638_v40, %v3638_v40 }
 0x24a   : > { %v3728_v32 = vsel %vm3672_vm10, %v3668_v0, 0.0  ;;  %v3770_v36 = vmul.f32 %v3668_v0, %v3668_v0  ;;  %v3771_v26 = vmul.f32 %v3669_v2, %v3669_v2  ;;  %3988 = vst.msk [vmem:[%s6745_s29 + $0x70] sm:$0xf] %vm3959_vm11, %v4477_v33  ;;  %3989 = vst.msk [vmem:[%s6745_s29 + $0x74] sm:$0xf] %vm3959_vm11, %v4478_v55  ;;  %v3730_v22 = vsel %vm3672_vm10, %v3669_v2, 0.0 }
 0x24b   : > { %v3729_v49 = vadd.f32 %v3728_v32, %v3727_v43  ;;  %s5296_s29 = scalar_lea.vmem %s5295_s19, 64 }
 0x24c   : > { %v3829_v42 = vsel %vm3672_vm10, %v3770_v36, 0.0  ;;  %v3831_v41 = vsel %vm3672_vm10, %v3771_v26, 0.0  ;;  %vm3845_vm10 = vcmask 58368   ;;  %p5298_p0 = scmp.lt.s32.totalorder %s5296_s29, %s5290_s13 }
 0x24d   : > { %v3731_v47 = vadd.f32 %v3730_v22, %v3729_v49  ;;  %v3830_v37 = vadd.f32 %v3829_v42, %v3828_v4 }
 0x24e   : > { %p5299_p1 = por %p5298_p0, %p5297_p13 }
 0x24f   : > { %v3832_v19 = vadd.f32 %v3831_v41, %v3830_v37  ;;  %v3733_v8 = vadd.f32 %v3732_v62, %v3731_v47 }
 0x250   : > { %p5300_p2 = pnand %p5299_p1, %p5293_p12 }
 0x251   : > { %v3735_v9 = vadd.f32 %v3734_v5, %v3733_v8  ;;  %v3834_v56 = vadd.f32 %v3833_v18, %v3832_v19 }
 0x253   : > { %v3736_v12 = vrot.slane %v3735_v9, 4  ;;  %v3836_v38 = vadd.f32 %v3835_v20, %v3834_v56 }
 0x255   : > { %v3737_v6 = vadd.f32 %v3736_v12, %v3735_v9  ;;  %v3837_v53 = vrot.slane %v3836_v38, 4 }
 0x257   : > { %v3738_v11 = vrot.slane %v3737_v6, 2  ;;  %v3838_v28 = vadd.f32 %v3837_v53, %v3836_v38 }
 0x259   : > { %v3739_v23 = vadd.f32 %v3738_v11, %v3737_v6  ;;  %v3839_v27 = vrot.slane %v3838_v28, 2 }
 0x25b   : > { %v3740_v45 = vrot.slane %v3739_v23, 1  ;;  %v3840_v46 = vadd.f32 %v3839_v27, %v3838_v28 }
 0x25d   : > { %v3841_v31 = vrot.slane %v3840_v46, 1  ;;  %v3741_v21 = vadd.f32 %v3740_v45, %v3739_v23 }
 0x25f   : > { %v3842_v39 = vadd.f32 %v3841_v31, %v3840_v46 }
 0x261   : > { %v3844_v57 = vsel %vm1014_vm6, %v3741_v21, %v3842_v39 }
 0x262   : > { %3846 = vst.msk [vmem:[%s496_s26] sm:$0x3] %vm3845_vm10, %v3844_v57 }
 0x263   : > { %5303 = shalt.err (!%p5300_p2)
}
 0x264   : > { %s5304_s14 = scalar_lea.hbm %s7001_s28, 32  ;;  %s5308_s27 = scalar_lea.hbm %s7064_s9, 256 }
 0x265   : > { %p5305_p4 = scmp.ne.s32.totalorder %s7001_s28, %s5304_s14  ;;  %p5309_p7 = scmp.lt.u32.totalorder %s7001_s28, %s7064_s9 }
 0x266   : > { %p5310_p9 = scmp.lt.u32.totalorder %s5308_s27, %s5304_s14  ;;  %p5312_p11 = scmp.lt.u32.totalorder %s5304_s14, %s7001_s28 }
 0x267   : > { %p5306_p5 = pnand %p5305_p4, %p5490_p3 }
 0x268   : > { %p5311_p10 = por %p5310_p9, %p5309_p7 }
 0x269   : > { %p5307_p6 = pneg %p5306_p5 }
 0x26a   : > { %p5313_p12 = por %p5312_p11, %p5311_p10 }
 0x26c   : > { %p5314_p13 = pnand %p5313_p12, %p5307_p6 }
 0x26e   : > { %5317 = shalt.err (!%p5314_p13)
}
 0x26f   : > { %5215 = dma.vmem_to_hbm [thread:$0]  (%p5490_p3), %s7003_s18, 32, %s7001_s28, %s4003_s12  }
 0x270 PF: > { %p5221_p0 = scmp.ge.s32.totalorder %s5384_s16, 2  ;;  %s4047_s20 = sand.u32 1, %s5356_s30  }
 0x271   : > { %s4048_s21 = scalar_lea.sflag [#allocation3], %s4047_s20 }
 0x272   : > { %p5218_p1 = pnand %p5221_p0, %p5499_p8 }
 0x274   : > { %5351 = dma.done.wait (!%p5218_p1), %s4048_s21, 32  }
 0x275   : > { %5353 = vsyncadd (!%p5218_p1), %s4048_s21, 4294967264  ;;  %s23_s16 = sadd.s32 1, %s5384_s16   ;;  %s7159_s22 = sld [smem:[#allocation9_spill]] }
 0x276   : > { %p20_p2 = scmp.ge.s32.totalorder %s23_s16, 10   ;;  %s7160_s12 = sld [smem:[#allocation5_spill]] }
 0x277   : > { %s7161_s13 = sld [smem:[#allocation6_spill]]  ;;  %s7162_s14 = sld [smem:[#allocation7_spill]] }
 0x278   : > { %s7163_s15 = sld [smem:[#allocation8_spill]]  ;;  %s7164_s30 = smov %s5360_s10 }
 0x279   : > { %s7165_s10 = smov %s5364_s11  ;;  %22 = sbr.rel (!%p20_p2) target bundleno = 5 (0x5), region = 119 }
 0x27b   : > { %s7166_s11 = smov %s7159_s22 }
 0x280   :  { %4053 = vsyncpa [#allocation3], 1 }
 0x281   :  { %4055 = vsyncpa [#allocation3 + $0x1], 1 }

// kernel: tpu_custom_call.1
= control target key start
LH: loop header
LB: loop body
LE: loop exit
PB: predicated region body
PF: predicated region fallthrough
CT: control target
= control target key end

     0   :  { %15 = vsyncpa [#allocation3], 0  ;;  %s7055_s0 = inlined_call_operand.vmem [shape: bf16[2,32,32,4], index: 0, kind: input, shape index: {}]   ;;  %s7056_s1 = inlined_call_operand.vmem [shape: bf16[2,32,32,4], index: 1, kind: input, shape index: {}]   ;;  %s7057_s2 = inlined_call_operand.vmem [shape: bf16[2,32,32,4], index: 2, kind: input, shape index: {}]   ;;  %s7058_s3 = inlined_call_operand.vmem [shape: bf16[2,1024,1], index: 3, kind: input, shape index: {}]   ;;  %s7059_s4 = inlined_call_operand.vmem [shape: bf16[9,4,8], index: 4, kind: input, shape index: {}]   ;;  %s7060_s5 = inlined_call_operand.vmem [shape: f32[1,8], index: 5, kind: input, shape index: {}]   ;;  %s7061_s6 = inlined_call_operand.vmem [shape: f32[1,8], index: 6, kind: input, shape index: {}]   ;;  %s7062_s7 = inlined_call_operand.vmem [shape: f32[2,2,4], index: 7, kind: input, shape index: {}]   ;;  %s7063_s8 = inlined_call_operand.vmem [shape: bf16[2,32,32,8], index: 8, kind: output, shape index: {0}]   ;;  %s7064_s9 = inlined_call_operand.hbm [shape: f32[2,4,2,8], index: 9, kind: output, shape index: {1}]  }
   0x1   :  { %17 = vsyncpa [#allocation3 + $0x1], 0  ;;  %s5439_s30 = smov 0   ;;  %s5441_s10 = smov 0  }
   0x2   :  { %s5443_s11 = smov 0   ;;  %s5445_s12 = smov 0  }
   0x3   :  { %s5447_s13 = smov 0   ;;  %s5449_s14 = smov 0  }
   0x4   :  { %s5451_s15 = smov 0   ;;  %s5453_s16 = smov 0  }
   0x5 LB: > { %7100 = sst [smem:[#allocation5_spill]] %s5376_s14  ;;  %s4217_s17 = sadd.s32 4294967295, %s5384_s16   ;;  %s5384_s16 = sphi %s5453_s16, %s23_s16   ;;  %s5380_s15 = sphi %s5451_s15, %s7163_s15   ;;  %s5376_s14 = sphi %s5449_s14, %s7162_s14   ;;  %s5372_s13 = sphi %s5447_s13, %s7161_s13   ;;  %s5368_s12 = sphi %s5445_s12, %s7160_s12   ;;  %s5364_s11 = sphi %s5443_s11, %s7166_s11   ;;  %s5360_s10 = sphi %s5441_s10, %s7165_s10   ;;  %s5356_s30 = sphi %s5439_s30, %s7164_s30  }
   0x6   : > { %7101 = sst [smem:[#allocation6_spill]] %s5380_s15  ;;  %s4218_s18 = sadd.s32 4294967294, %s5384_s16  }
   0x7   : > { %s32_s19 = sadd.s32 1, %s5376_s14  ;;  %s35_s20 = sadd.s32 1, %s5380_s15 }
   0x8   : > { %p33_p0 = scmp.ge.s32.totalorder %s32_s19, 4  ;;  %p299_p1 = scmp.ne.s32.totalorder %s5364_s11, %s5360_s10 }
   0x9   : > { %p300_p2 = scmp.eq.s32.totalorder %s4217_s17, 7  ;;  %p305_p5 = scmp.ne.s32.totalorder %s5360_s10, %s5356_s30 }
   0xa   : > { %s7168_s19 = smov (%p33_p0, %s32_s19), 0  ;;  %s7170_s20 = smov (!%p33_p0, %s35_s20), %s5380_s15 }
   0xb   : > { %7102 = sst [smem:[#allocation7_spill]] %s7168_s19  ;;  %s285_s21 = ssub.s32 %s5376_s14, %s7168_s19 }
   0xc   : > { %p5490_p3 = por %p300_p2, %p299_p1  ;;  %p37_p4 = scmp.ge.s32.totalorder %s7170_s20, 2 }
   0xd   : > { %p306_p6 = scmp.eq.s32.totalorder %s4218_s18, 7  ;;  %p4227_p7 = scmp.ge.s32.totalorder %s5384_s16, 1 }
   0xe   : > { %s7172_s20 = smov (%p37_p4, %s7170_s20), 0  ;;  %p407_p9 = scmp.lt.s32.totalorder %s5384_s16, 9 }
   0xf   : > { %7104 = sst [smem:[#allocation8_spill]] %s7172_s20  ;;  %p5499_p8 = por %p306_p6, %p305_p5 }
  0x10   : > { %s284_s24 = ssub.s32 %s5380_s15, %s7172_s20  ;;  %s289_s25 = sadd.s32 1, %s5364_s11 }
  0x11   : > { %s286_s26 = sor.u32 %s285_s21, %s284_s24  ;;  %p408_p10 = pnand %p4227_p7, %p407_p9 }
  0x12   : > { %p287_p11 = scmp.eq.s32.totalorder %s286_s26, 0 }
  0x13   : > { %411 = sbr.rel (%p408_p10) target bundleno = 624 (0x270), region = 52 }
  0x14   : > { %s5508_s27 = scalar_select %p287_p11, %s5364_s11, %s289_s25  }
  0x16   : > { %7106 = sst [smem:[#allocation9_spill]] %s5508_s27 }
  0x1a   : > { %vm1135_vm0 = vcmask 1041408   ;;  %v5513_v0 = vld [vmem:[%s7059_s4 + $0x8] sm:$0x3]  ;;  %v4280_v1 = vld [vmem:[%s7059_s4 + $0x2] sm:$0x3]  ;;  %s5519_s20 = sshll.u32 %s5368_s12, 3  ;;  %v630_v2 = vlaneseq }
  0x1b   : > { %5209 = vmatprep.subr.msk.bf16.mxu0 %vm1135_vm0, %v5513_v0  ;;  %5205 = vmatprep.subr.msk.bf16.mxu1 %vm1135_vm0, %v4280_v1  ;;  %v5526_v3 = vsel %vm1135_vm0, %v5513_v0, 0  ;;  %v1137_v4 = vsel %vm1135_vm0, %v4280_v1, 0  ;;  %p498_p12 = scmp.lt.s32.totalorder %s5372_s13, 1  ;;  %p500_p13 = scmp.lt.s32.totalorder %s5519_s20, 31  ;;  %v5539_v5 = vld [vmem:[%s7059_s4] sm:$0x3] }
  0x1c   : > { %4778 = vmatpush3.bf16.msra.mxu0 %v5526_v3  ;;  %4642 = vmatpush3.bf16.msra.mxu1 %v1137_v4  ;;  %s5533_s21 = sadd.s32 4294967295, %s5519_s20  ;;  %v5544_v6 = vld [vmem:[%s7059_s4 + $0xa] sm:$0x3]  ;;  %v5547_v7 = vshrl.u32 %v630_v2, 7  ;;  %p571_p2 = scmp.gt.s32.totalorder %s5368_s12, 0  ;;  %vm1102_vm1 = vcmask 31744  }
  0x1d   : > { %s499_s24 = scalar_select %p498_p12, %s5372_s13, 1  ;;  %5206 = vmatprep.subr.msk.bf16.mxu1 %vm1135_vm0, %v5539_v5  ;;  %5211 = vmatprep.subr.msk.bf16.mxu0 %vm1135_vm0, %v5544_v6  ;;  %v2173_v53 = vsel %vm1135_vm0, %v5544_v6, 0  ;;  %v5640_v58 = vld [vmem:[%s7059_s4 + $0xc] sm:$0x3]  ;;  %vm1026_vm2 = vsmask.f32 7424 }
  0x1e   : > { %s501_s17 = scalar_select %p500_p13, %s5519_s20, 31  ;;  %7107 = vst [vmem:[#allocation10_spill] sm:$0xff] %v5547_v7  ;;  %v5564_v10 = vsub.s32 0, %v5547_v7  ;;  %vm1087_vm3 = vcmask 1047552   ;;  %vm853_vm5 = vsmask.f32 256 }
  0x1f   : > { %s5553_s18 = sshll.u32 %s499_s24, 7  ;;  %s4253_s25 = sshll.u32 %s499_s24, 1  ;;  %vm5761_vm4 = vmand %vm1087_vm3, %vm1026_vm2  ;;  %vm1014_vm6 = vcmask 1040384   ;;  %vm3672_vm10 = vcmask 64512   ;;  %vm3959_vm11 = vcmask 60416  }
  0x20   : > { %s4230_s26 = sshll.u32 %s501_s17, 2  ;;  %s555_s19 = scalar_lea.vmem %s7062_s7, %s4253_s25  ;;  %7108 = vst [vmem:[#allocation11_spill] sm:$0xff] %v5564_v10  ;;  %vm5989_vm7 = vmand %vm1014_vm6, %vm853_vm5 }
  0x21   : > { %s5559_s15 = sadd.s32 %s5553_s18, %s4230_s26  ;;  %v569_v8 = vld [vmem:[%s555_s19] sm:$0x3]  ;;  %p510_p0 = scmp.gt.s32.totalorder %s5533_s21, 0 }
  0x22   : > { %s4232_s14 = sshll.u32 %s5559_s15, 2  ;;  %v570_v9 = vpack.c.bf16 %v569_v8, %v569_v8  ;;  %p4235_p1 = scmp.lt.s32.totalorder %s5533_s21, 31 }
  0x23   : > { %s5572_s17 = scalar_lea.vmem %s7055_s0, %s4232_s14  ;;  %s7174_s21 = smov (!%p510_p0, %s5533_s21), 0 }
  0x24   : > { %v628_v11 = vpack.i.b16 %v570_v9, %v570_v9  ;;  %v670_v12 = vshrl.u32 %v570_v9, 16  ;;  %v595_v13 = vld [vmem:[%s5572_s17] sm:$0xf]  ;;  %v596_v14 = vld [vmem:[%s5572_s17 + $0x4] sm:$0xf]  ;;  %s7176_s21 = smov (!%p4235_p1, %s7174_s21), 31 }
  0x25   : > { %v597_v17 = vld [vmem:[%s5572_s17 + $0x8] sm:$0xf]  ;;  %v598_v18 = vld [vmem:[%s5572_s17 + $0xc] sm:$0xf]  ;;  %s5581_s19 = scalar_select %p571_p2, 1.0, 0.0 }
  0x26   : > { %v633_v15 = vrot.slane %v628_v11, %v5564_v10  ;;  %v671_v16 = vpack.i.b16 %v670_v12, %v670_v12  ;;  %v599_v19 = vld [vmem:[%s5572_s17 + $0x10] sm:$0xf]  ;;  %s4240_s27 = sshll.u32 %s7176_s21, 2  ;;  %v600_v22 = vld [vmem:[%s5572_s17 + $0x14] sm:$0xf]  ;;  %p583_p5 = scmp.lt.s32.totalorder %s5368_s12, 3 }
  0x27   : > { %v601_v23 = vld [vmem:[%s5572_s17 + $0x18] sm:$0xf]  ;;  %s518_s25 = sadd.s32 %s4240_s27, %s5553_s18  ;;  %p574_p4 = scmp.ne.f32.partialorder %s5581_s19, %s5581_s19  ;;  %v602_v24 = vld [vmem:[%s5572_s17 + $0x1c] sm:$0xf]  ;;  %v603_v49 = vld [vmem:[%s5572_s17 + $0x20] sm:$0xf] }
  0x28   : > { %v5584_v20 = vcombine.low %v633_v15, %v633_v15  ;;  %v676_v21 = vrot.slane %v671_v16, %v5564_v10  ;;  %s4242_s26 = sshll.u32 %s518_s25, 2  ;;  %s575_s28 = sshrl.u32 %s5581_s19, 16  ;;  %v604_v50 = vld [vmem:[%s5572_s17 + $0x24] sm:$0xf]  ;;  %v605_v63 = vld [vmem:[%s5572_s17 + $0x28] sm:$0xf] }
  0x29   : > { %s520_s24 = scalar_lea.vmem %s7056_s1, %s4242_s26  ;;  %s576_s27 = sand.u32 1, %s575_s28  ;;  %v606_v1 = vld [vmem:[%s5572_s17 + $0x2c] sm:$0xf]  ;;  %v607_v6 = vld [vmem:[%s5572_s17 + $0x30] sm:$0xf] }
  0x2a   : > { %v638_v25 = vmul.bf16 %v5584_v20, %v595_v13  ;;  %v639_v26 = vmul.bf16 %v5584_v20, %v596_v14  ;;  %v5595_v27 = vcombine.low %v676_v21, %v676_v21  ;;  %v640_v28 = vmul.bf16 %v5584_v20, %v597_v17  ;;  %s577_s25 = sadd.s32 32767, %s576_s27  ;;  %v713_v36 = vld [vmem:[%s520_s24] sm:$0xf]  ;;  %v714_v37 = vld [vmem:[%s520_s24 + $0x4] sm:$0xf] }
  0x2b   : > { %v641_v29 = vmul.bf16 %v5584_v20, %v598_v18  ;;  %v642_v30 = vmul.bf16 %v5584_v20, %v599_v19  ;;  %v643_v31 = vmul.bf16 %v5584_v20, %v600_v22  ;;  %v644_v32 = vmul.bf16 %v5584_v20, %v601_v23  ;;  %s578_s26 = sadd.s32 %s577_s25, %s5581_s19  ;;  %v715_v42 = vld [vmem:[%s520_s24 + $0x8] sm:$0xf]  ;;  %v716_v43 = vld [vmem:[%s520_s24 + $0xc] sm:$0xf]  ;;  %v608_v8 = vld [vmem:[%s5572_s17 + $0x34] sm:$0xf] }
  0x2c   : > { %v681_v33 = vadd.bf16 %v5595_v27, %v638_v25  ;;  %v682_v34 = vadd.bf16 %v5595_v27, %v639_v26  ;;  %v683_v35 = vadd.bf16 %v5595_v27, %v640_v28  ;;  %v645_v38 = vmul.bf16 %v5584_v20, %v602_v24  ;;  %s579_s28 = sand.u32 4294901760, %s578_s26  ;;  %v5681_v28 = vld [vmem:[%s7059_s4 + $0x4] sm:$0x3] }
  0x2d   : > { %v684_v39 = vadd.bf16 %v5595_v27, %v641_v29  ;;  %v717_v40 = vmul.bf16 %v5584_v20, %v713_v36  ;;  %v718_v41 = vmul.bf16 %v5584_v20, %v714_v37  ;;  %v685_v44 = vadd.bf16 %v5595_v27, %v642_v30  ;;  %s7178_s28 = smov (%p574_p4, %s579_s28), 2143289344  ;;  %v609_v30 = vld [vmem:[%s5572_s17 + $0x38] sm:$0xf] }
  0x2e   : > { %v5615_v45 = vcombine.low %v681_v33, %v682_v34  ;;  %v719_v46 = vmul.bf16 %v5584_v20, %v715_v42  ;;  %v720_v47 = vmul.bf16 %v5584_v20, %v716_v43  ;;  %v686_v48 = vadd.bf16 %v5595_v27, %v643_v31  ;;  %s582_s29 = sshrl.u32 %s7178_s28, 16  ;;  %v610_v31 = vld [vmem:[%s5572_s17 + $0x3c] sm:$0xf]  ;;  %s526_s28 = sadd.s32 8, %s5519_s20 }
  0x2f   : > { %v5622_v51 = vcombine.low %v683_v35, %v684_v39  ;;  %v721_v52 = vadd.bf16 %v5595_v27, %v717_v40  ;;  %v722_v54 = vadd.bf16 %v5595_v27, %v718_v41  ;;  %v687_v56 = vadd.bf16 %v5595_v27, %v644_v32  ;;  %s725_s24 = sshll.u32 %s582_s29, 16  ;;  %p5739_p6 = scmp.lt.s32.totalorder %s526_s28, 31 }
  0x30   : > { %4779 = vmatprep.mubr.msk.bf16.mxu0 %vm1102_vm1, %v5615_v45  ;;  %v5633_v55 = vcombine.low %v685_v44, %v686_v48  ;;  %v688_v57 = vadd.bf16 %v5595_v27, %v645_v38  ;;  %v723_v59 = vadd.bf16 %v5595_v27, %v719_v46  ;;  %v724_v60 = vadd.bf16 %v5595_v27, %v720_v47  ;;  %s726_s27 = sor.u32 %s725_s24, %s582_s29  ;;  %v621_v47 = vld [vmem:[%s5572_s17 + $0x68] sm:$0xf]  ;;  %v622_v48 = vld [vmem:[%s5572_s17 + $0x6c] sm:$0xf] }
  0x31   : > { %4780 = vmatmul.mubr.msk.bf16.vlgmr.msra.gmra.mrb[0].mxu0 %vm1102_vm1, %v5622_v51  ;;  %v646_v61 = vmul.bf16 %v5584_v20, %v603_v49  ;;  %v647_v62 = vmul.bf16 %v5584_v20, %v604_v50  ;;  %v727_v9 = vstv %s726_s27  ;;  %v648_v12 = vmul.bf16 %v5584_v20, %v605_v63  ;;  %s5728_s19 = scalar_select %p583_p5, 1.0, 0.0 }
  0x32   : > { %4812 = vmatpush3.bf16.msra.mxu0 %v2173_v53  ;;  %4783 = vmatprep.mubr.msk.bf16.mxu0 %vm1102_vm1, %v5633_v55  ;;  %v5658_v11 = vcombine.low %v687_v56, %v688_v57  ;;  %v649_v13 = vmul.bf16 %v5584_v20, %v606_v1  ;;  %v729_v14 = vmul.bf16 %v727_v9, %v721_v52  ;;  %v1349_v24 = vsel %vm1135_vm0, %v5539_v5, 0  ;;  %s7180_s28 = smov (!%p5739_p6, %s526_s28), 31 }
  0x33   : > { %v689_v2 = vadd.bf16 %v5595_v27, %v646_v61  ;;  %v690_v4 = vadd.bf16 %v5595_v27, %v647_v62  ;;  %5212 = vmatprep.subr.msk.bf16.mxu0 %vm1135_vm0, %v5640_v58  ;;  %v730_v15 = vmul.bf16 %v727_v9, %v722_v54  ;;  %v731_v16 = vmul.bf16 %v727_v9, %v723_v59  ;;  %v612_v61 = vld [vmem:[%s5572_s17 + $0x44] sm:$0xf]  ;;  %s587_s21 = sshrl.u32 %s5728_s19, 16  ;;  %s7182_s28 = smov (!%p5739_p6, %s7180_s28), 31 }
  0x34   : > { %v732_v17 = vmul.bf16 %v727_v9, %v724_v60  ;;  %v650_v19 = vmul.bf16 %v5584_v20, %v607_v6  ;;  %v651_v21 = vmul.bf16 %v5584_v20, %v608_v8  ;;  %v691_v25 = vadd.bf16 %v5595_v27, %v648_v12  ;;  %v611_v60 = vld [vmem:[%s5572_s17 + $0x40] sm:$0xf]  ;;  %s588_s29 = sand.u32 1, %s587_s21  ;;  %s5840_s20 = sshll.u32 %s7182_s28, 2 }
  0x35   : > { %v5662_v18 = vcombine.low %v689_v2, %v690_v4  ;;  %v5666_v22 = vcombine.low %v729_v14, %v730_v15  ;;  %v692_v26 = vadd.bf16 %v5595_v27, %v649_v13  ;;  %v873_v32 = vshll.u32 %v5615_v45, 16  ;;  %s589_s25 = sadd.s32 32767, %s588_s29  ;;  %p586_p7 = scmp.ne.f32.partialorder %s5728_s19, %s5728_s19 }
  0x36   : > { %v5668_v23 = vcombine.low %v731_v16, %v732_v17  ;;  %v693_v5 = vadd.bf16 %v5595_v27, %v650_v19  ;;  %v694_v29 = vadd.bf16 %v5595_v27, %v651_v21  ;;  %v652_v34 = vmul.bf16 %v5584_v20, %v609_v30  ;;  %s5823_s26 = sadd.s32 %s589_s25, %s5728_s19  ;;  %s535_s28 = sadd.s32 %s5840_s20, %s5553_s18 }
  0x37   : > { %4643 = vmatprep.mubr.msk.bf16.mxu1 %vm1102_vm1, %v5666_v22  ;;  %v5696_v33 = vcombine.low %v691_v25, %v692_v26  ;;  %v653_v35 = vmul.bf16 %v5584_v20, %v610_v31  ;;  %v870_v37 = vshrl.u32 %v5615_v45, 16  ;;  %v880_v38 = vshll.u32 %v5622_v51, 16  ;;  %v5796_v25 = vld [vmem:[%s7059_s4 + $0xe] sm:$0x3]  ;;  %s591_s21 = sand.u32 4294901760, %s5823_s26 }
  0x38   : > { %4644 = vmatmul.mubr.msk.bf16.vlgmr.msra.gmra.mrb[0].mxu1 %vm1102_vm1, %v5668_v23  ;;  %v5700_v36 = vcombine.low %v693_v5, %v694_v29  ;;  %v1032_v39 = vrot.slane %v873_v32, 1  ;;  %v695_v40 = vadd.bf16 %v5595_v27, %v652_v34  ;;  %v888_v44 = vshll.u32 %v5633_v55, 16  ;;  %v613_v5 = vld [vmem:[%s5572_s17 + $0x48] sm:$0xf]  ;;  %v614_v29 = vld [vmem:[%s5572_s17 + $0x4c] sm:$0xf] }
  0x39   : > { %4784 = vmatmul.mubr.msk.bf16.gmra.mrb[4].mxu0 %vm1102_vm1, %v5658_v11  ;;  %4676 = vmatpush3.bf16.msra.mxu1 %v1349_v24  ;;  %v696_v41 = vadd.bf16 %v5595_v27, %v653_v35  ;;  %v1034_v43 = vrot.slane %v880_v38, 1  ;;  %v877_v49 = vshrl.u32 %v5622_v51, 16  ;;  %v885_v52 = vshrl.u32 %v5633_v55, 16  ;;  %v615_v34 = vld [vmem:[%s5572_s17 + $0x50] sm:$0xf]  ;;  %s7184_s21 = smov (%p586_p7, %s591_s21), 2143289344 }
  0x3a   : > { %4787 = vmatprep.mubr.msk.bf16.mxu0 %vm1102_vm1, %v5662_v18  ;;  %4647 = vmatprep.mubr.msk.bf16.mxu1 %vm1102_vm1, %v5615_v45  ;;  %v1033_v42 = vor.u32 %v1032_v39, %v870_v37  ;;  %v7079_v53 = vshll.u32 %v5658_v11, 16  ;;  %v1037_v54 = vrot.slane %v888_v44, 1  ;;  %v664_v56 = vmul.bf16 %v5584_v20, %v621_v47  ;;  %v616_v35 = vld [vmem:[%s5572_s17 + $0x54] sm:$0xf]  ;;  %s594_s19 = sshrl.u32 %s7184_s21, 16 }
  0x3b   : > { %5207 = vmatprep.subr.msk.bf16.mxu1 %vm1135_vm0, %v5681_v28  ;;  %v5722_v46 = vcombine.low %v695_v40, %v696_v41  ;;  %v665_v57 = vmul.bf16 %v5584_v20, %v622_v48  ;;  %v1036_v59 = vor.u32 %v1034_v43, %v877_v49  ;;  %v7078_v62 = vshll.u32 %v5662_v18, 16  ;;  %v623_v40 = vld [vmem:[%s5572_s17 + $0x70] sm:$0xf]  ;;  %v624_v41 = vld [vmem:[%s5572_s17 + $0x74] sm:$0xf]  ;;  %s745_s25 = sshll.u32 %s594_s19, 16 }
  0x3c   : > { %v5731_v50 = vsel %vm1026_vm2, %v1033_v42, %v1034_v43  ;;  %v707_v63 = vadd.bf16 %v5595_v27, %v664_v56  ;;  %v1038_v4 = vor.u32 %v1037_v54, %v885_v52  ;;  %v1039_v6 = vrot.slane %v7079_v53, 1  ;;  %v625_v48 = vld [vmem:[%s5572_s17 + $0x78] sm:$0xf]  ;;  %v626_v54 = vld [vmem:[%s5572_s17 + $0x7c] sm:$0xf]  ;;  %s746_s26 = sor.u32 %s745_s25, %s594_s19  ;;  %s4250_s19 = sshll.u32 %s5368_s12, 5 }
  0x3d   : > { %v708_v1 = vadd.bf16 %v5595_v27, %v665_v57  ;;  %v892_v8 = vshrl.u32 %v5658_v11, 16  ;;  %v654_v12 = vmul.bf16 %v5584_v20, %v611_v60  ;;  %v655_v13 = vmul.bf16 %v5584_v20, %v612_v61  ;;  %p545_p9 = scmp.lt.s32.totalorder %s4250_s19, 127 }
  0x3e   : > { %v5780_v14 = vsel %vm5761_vm4, %v1036_v59, 0  ;;  %v900_v15 = vshrl.u32 %v5662_v18, 16  ;;  %v7075_v16 = vshll.u32 %v5696_v33, 16  ;;  %v1042_v17 = vrot.slane %v7078_v62, 1 }
  0x3f   : > { %v5770_v9 = vcombine.low %v707_v63, %v708_v1  ;;  %v2377_v19 = vsel %vm1135_vm0, %v5640_v58, 0  ;;  %v5789_v21 = vsel %vm1026_vm2, %v1038_v4, %v1039_v6  ;;  %v1041_v24 = vor.u32 %v1039_v6, %v892_v8  ;;  %v617_v63 = vld [vmem:[%s5572_s17 + $0x58] sm:$0xf]  ;;  %s7186_s19 = smov (!%p545_p9, %s4250_s19), 127 }
  0x40   : > { %4648 = vmatmul.mubr.msk.bf16.gmra.mrb[4].mxu1 %vm1102_vm1, %v5622_v51  ;;  %v697_v58 = vadd.bf16 %v5595_v27, %v654_v12  ;;  %v698_v26 = vadd.bf16 %v5595_v27, %v655_v13  ;;  %v1043_v30 = vor.u32 %v1042_v17, %v900_v15  ;;  %v1044_v31 = vrot.slane %v7075_v16, 1  ;;  %s548_s29 = sadd.s32 %s5553_s18, %s7186_s19 }
  0x41   : > { %4788 = vmatmul.mubr.msk.bf16.gmra.mrb[8].mxu0 %vm1102_vm1, %v5696_v33  ;;  %4651 = vmatprep.mubr.msk.bf16.mxu1 %vm1102_vm1, %v5633_v55  ;;  %v7072_v39 = vshll.u32 %v5700_v36, 16  ;;  %v5827_v42 = vsel %vm5761_vm4, %v1041_v24, 0  ;;  %v656_v43 = vmul.bf16 %v5584_v20, %v613_v5  ;;  %v657_v47 = vmul.bf16 %v5584_v20, %v614_v29  ;;  %s4252_s24 = sshll.u32 %s548_s29, 2  ;;  %s6745_s29 = scalar_lea.vmem %s7063_s8, %s4232_s14 }
  0x42   : > { %4791 = vmatprep.mubr.msk.bf16.mxu0 %vm1102_vm1, %v5700_v36  ;;  %v5835_v56 = vcombine.low %v697_v58, %v698_v26  ;;  %v7077_v57 = vshrl.u32 %v5696_v33, 16  ;;  %v658_v59 = vmul.bf16 %v5584_v20, %v615_v34  ;;  %v659_v60 = vmul.bf16 %v5584_v20, %v616_v35  ;;  %v618_v26 = vld [vmem:[%s5572_s17 + $0x5c] sm:$0xf]  ;;  %v620_v34 = vld [vmem:[%s5572_s17 + $0x64] sm:$0xf]  ;;  %s494_s14 = sand.u32 1, %s5360_s10  }
  0x43   : > { %v5845_v61 = vsel %vm1026_vm2, %v1043_v30, %v1044_v31  ;;  %v7076_v1 = vshrl.u32 %v5700_v36, 16  ;;  %v7069_v4 = vshll.u32 %v5722_v46, 16  ;;  %v666_v6 = vmul.bf16 %v5584_v20, %v623_v40  ;;  %v619_v30 = vld [vmem:[%s5572_s17 + $0x60] sm:$0xf]  ;;  %s4249_s17 = sshll.u32 %s535_s28, 2  ;;  %s4228_s15 = sshll.u32 %s494_s14, 1 }
  0x44   : > { %v1047_v12 = vrot.slane %v7072_v39, 1  ;;  %v667_v13 = vmul.bf16 %v5584_v20, %v624_v41  ;;  %v668_v17 = vmul.bf16 %v5584_v20, %v625_v48  ;;  %v699_v24 = vadd.bf16 %v5595_v27, %v656_v43  ;;  %s537_s27 = scalar_lea.vmem %s7057_s2, %s4249_s17  ;;  %s5388_s17 = smov [#allocation2]  }
  0x45   : > { %v700_v58 = vadd.bf16 %v5595_v27, %v657_v47  ;;  %v709_v5 = vadd.bf16 %v5595_v27, %v666_v6  ;;  %v660_v29 = vmul.bf16 %v5584_v20, %v617_v63  ;;  %v1046_v43 = vor.u32 %v1044_v31, %v7077_v57  ;;  %s5294_s19 = sshll.u32 %s5388_s17, 4  ;;  %s5295_s19 = int_to_ptr.vmem [resolvable:$false] %s5294_s19 }
  0x46   : > { %v710_v35 = vadd.bf16 %v5595_v27, %v667_v13  ;;  %v711_v40 = vadd.bf16 %v5595_v27, %v668_v17  ;;  %v701_v47 = vadd.bf16 %v5595_v27, %v658_v59  ;;  %v702_v48 = vadd.bf16 %v5595_v27, %v659_v60 }
  0x47   : > { %v1048_v63 = vor.u32 %v1047_v12, %v7076_v1  ;;  %v7070_v6 = vshll.u32 %v5835_v56, 16  ;;  %v661_v31 = vmul.bf16 %v5584_v20, %v618_v26  ;;  %v7071_v59 = vshrl.u32 %v5722_v46, 16 }
  0x48   : > { %4652 = vmatmul.mubr.msk.bf16.gmra.mrb[8].mxu1 %vm1102_vm1, %v5658_v11  ;;  %v5891_v13 = vcombine.low %v709_v5, %v710_v35  ;;  %v662_v60 = vmul.bf16 %v5584_v20, %v619_v30  ;;  %v5904_v12 = vsel %vm5761_vm4, %v1046_v43, 0  ;;  %v5906_v5 = vcombine.low %v701_v47, %v702_v48  ;;  %v733_v43 = vld [vmem:[%s537_s27] sm:$0xf]  ;;  %v734_v47 = vld [vmem:[%s537_s27 + $0x4] sm:$0xf] }
  0x49   : > { %4792 = vmatmul.mubr.msk.bf16.gmra.mrb[12].mxu0 %vm1102_vm1, %v5722_v46  ;;  %4655 = vmatprep.mubr.msk.bf16.mxu1 %vm1102_vm1, %v5662_v18  ;;  %v703_v35 = vadd.bf16 %v5595_v27, %v660_v29  ;;  %v738_v16 = vmul.bf16 %v5584_v20, %v734_v47  ;;  %v747_v57 = vstv %s746_s26  ;;  %v7083_v47 = vshll.u32 %v5666_v22, 16  ;;  %s6253_s26 = scalar_lea.vmem %s7058_s3, %s4252_s24  ;;  %s4482_s24 = sshll.u32 %s5372_s13, 2 }
  0x4a   : > { %4813 = vmatprep.mubr.msk.bf16.mxu0 %vm1102_vm1, %v5731_v50  ;;  %v705_v29 = vadd.bf16 %v5595_v27, %v662_v60  ;;  %v736_v60 = vld [vmem:[%s537_s27 + $0xc] sm:$0xf]  ;;  %v894_v51 = vrot.slane %v892_v8, 7 }
  0x4b   : > { %v742_v62 = vadd.bf16 %v5595_v27, %v738_v16 }
  0x50   : > { %4656 = vmatmul.mubr.msk.bf16.gmra.mrb[12].mxu1 %vm1102_vm1, %v5696_v33 }
  0x51   : > { %4814 = vmatmul.mubr.msk.bf16.vlgmr.msra.gmra.mrb[0].mxu0 %vm1102_vm1, %v5780_v14  ;;  %4659 = vmatprep.mubr.msk.bf16.mxu1 %vm1102_vm1, %v5700_v36 }
  0x52   : > { %4846 = vmatpush3.bf16.msra.mxu0 %v2377_v19  ;;  %4817 = vmatprep.mubr.msk.bf16.mxu0 %vm1102_vm1, %v5789_v21  ;;  %v669_v19 = vmul.bf16 %v5584_v20, %v626_v54  ;;  %v1049_v54 = vrot.slane %v7069_v4, 1  ;;  %v5899_v4 = vcombine.low %v699_v24, %v700_v58  ;;  %v1052_v24 = vrot.slane %v7070_v6, 1 }
  0x53   : > { %5213 = vmatprep.subr.msk.bf16.mxu0 %vm1135_vm0, %v5796_v25  ;;  %v704_v58 = vadd.bf16 %v5595_v27, %v661_v31  ;;  %v735_v31 = vld [vmem:[%s537_s27 + $0x8] sm:$0xf]  ;;  %s4018_s27 = sadd.s32 %s5368_s12, %s4482_s24  ;;  %s4003_s12 = scalar_lea.sflag [#allocation3], %s494_s14 }
  0x54   : > { %v712_v41 = vadd.bf16 %v5595_v27, %v669_v19  ;;  %v663_v19 = vmul.bf16 %v5584_v20, %v620_v34  ;;  %v5910_v26 = vsel %vm1026_vm2, %v1048_v63, %v1049_v54  ;;  %v7074_v30 = vshll.u32 %v5899_v4, 16  ;;  %s4483_s25 = sshll.u32 %s4018_s27, 5 }
  0x55   : > { %v1051_v34 = vor.u32 %v1049_v54, %v7071_v59  ;;  %v7081_v63 = vshll.u32 %v5906_v5, 16  ;;  %v5938_v6 = vcombine.low %v703_v35, %v704_v58  ;;  %v739_v35 = vmul.bf16 %v5584_v20, %v735_v31  ;;  %s7001_s28 = scalar_lea.hbm %s7064_s9, %s4483_s25 }
  0x56   : > { %v5893_v17 = vcombine.low %v711_v40, %v712_v41  ;;  %v7073_v40 = vshrl.u32 %v5835_v56, 16  ;;  %v706_v41 = vadd.bf16 %v5595_v27, %v663_v19  ;;  %v1054_v54 = vrot.slane %v7074_v30, 1 }
  0x57   : > { %v7080_v19 = vshrl.u32 %v5666_v22, 16  ;;  %v5942_v59 = vsel %vm5761_vm4, %v1051_v34, 0  ;;  %v737_v30 = vmul.bf16 %v5584_v20, %v733_v43  ;;  %v7085_v1 = vshll.u32 %v5938_v6, 16 }
  0x58   : > { %4660 = vmatmul.mubr.msk.bf16.gmra.mrb[16].mxu1 %vm1102_vm1, %v5722_v46  ;;  %v1053_v48 = vor.u32 %v1052_v24, %v7073_v40  ;;  %v5944_v39 = vcombine.low %v705_v29, %v706_v41  ;;  %v937_v24 = vshrl.u32 %v5899_v4, 16  ;;  %v945_v40 = vshrl.u32 %v5906_v5, 16 }
  0x59   : > { %4818 = vmatmul.mubr.msk.bf16.gmra.mrb[4].mxu0 %vm1102_vm1, %v5827_v42  ;;  %4663 = vmatprep.mubr.msk.bf16.mxu1 %vm1102_vm1, %v5835_v56  ;;  %v740_v58 = vmul.bf16 %v5584_v20, %v736_v60  ;;  %v1057_v29 = vrot.slane %v7081_v63, 1  ;;  %v741_v41 = vadd.bf16 %v5595_v27, %v737_v30  ;;  %v857_v43 = vrot.slane %v7080_v19, 7 }
  0x5a   : > { %4821 = vmatprep.mubr.msk.bf16.mxu0 %vm1102_vm1, %v5845_v61  ;;  %v5954_v34 = vsel %vm1026_vm2, %v1053_v48, %v1054_v54  ;;  %v743_v53 = vadd.bf16 %v5595_v27, %v739_v35  ;;  %v750_v48 = vmul.bf16 %v747_v57, %v742_v62  ;;  %v7082_v30 = vshrl.u32 %v5668_v23, 16 }
  0x5b   : > { %v744_v31 = vadd.bf16 %v5595_v27, %v740_v58  ;;  %v749_v20 = vmul.bf16 %v747_v57, %v741_v41  ;;  %v1056_v16 = vor.u32 %v1054_v54, %v937_v24  ;;  %v1058_v35 = vor.u32 %v1057_v29, %v945_v40 }
  0x5c   : > { %v751_v60 = vmul.bf16 %v747_v57, %v743_v53  ;;  %v1059_v62 = vrot.slane %v7085_v1, 1  ;;  %v7084_v58 = vshll.u32 %v5944_v39, 16  ;;  %v860_v19 = vor.u32 %v7083_v47, %v857_v43  ;;  %v3030_v53 = vld [vmem:[%s6253_s26 + $0x2c] sm:$0xf] }
  0x5d   : > { %v752_v27 = vmul.bf16 %v747_v57, %v744_v31  ;;  %v5981_v41 = vcombine.low %v749_v20, %v750_v48  ;;  %v864_v57 = vrot.slane %v7082_v30, 7  ;;  %v7086_v54 = vshll.u32 %v5668_v23, 16 }
  0x5e   : > { %v5998_v29 = vsel %vm5761_vm4, %v1056_v16, 0  ;;  %v952_v31 = vshrl.u32 %v5938_v6, 16  ;;  %v6002_v20 = vsel %vm1026_vm2, %v1058_v35, %v1059_v62  ;;  %v7088_v48 = vshrl.u32 %v5944_v39, 16 }
  0x5f   : > { %v5985_v63 = vcombine.low %v751_v60, %v752_v27  ;;  %v7087_v60 = vshll.u32 %v5770_v9, 16  ;;  %v1062_v27 = vrot.slane %v7084_v58, 1  ;;  %v1016_v30 = vsel %vm5989_vm7, 0, %v860_v19 }
  0x60   : > { %4664 = vmatmul.mubr.msk.bf16.gmra.mrb[20].mxu1 %vm1102_vm1, %v5899_v4  ;;  %v872_v47 = vrot.slane %v870_v37, 7  ;;  %v867_v16 = vor.u32 %v7086_v54, %v864_v57  ;;  %v1061_v35 = vor.u32 %v1059_v62, %v952_v31  ;;  %v7091_v58 = vshll.u32 %v5891_v13, 16 }
  0x61   : > { %4822 = vmatmul.mubr.msk.bf16.gmra.mrb[8].mxu0 %vm1102_vm1, %v5904_v12  ;;  %4667 = vmatprep.mubr.msk.bf16.mxu1 %vm1102_vm1, %v5906_v5  ;;  %v1063_v37 = vor.u32 %v1062_v27, %v7088_v48  ;;  %v1064_v19 = vrot.slane %v7087_v60, 1  ;;  %v7093_v62 = vshrl.u32 %v5770_v9, 16  ;;  %v7092_v60 = vshrl.u32 %v5891_v13, 16 }
  0x62   : > { %4825 = vmatprep.mubr.msk.bf16.mxu0 %vm1102_vm1, %v5910_v26  ;;  %v875_v1 = vor.u32 %v873_v32, %v872_v47  ;;  %v868_v57 = vsel %vm853_vm5, %v857_v43, %v867_v16  ;;  %v6033_v54 = vsel %vm5761_vm4, %v1061_v35, 0  ;;  %v7089_v48 = vshll.u32 %v5893_v17, 16  ;;  %v6058_v16 = vld [vmem:[%s7059_s4 + $0x6] sm:$0x3] }
  0x63   : > { %v6039_v27 = vsel %vm1026_vm2, %v1063_v37, %v1064_v19  ;;  %v1067_v45 = vrot.slane %v7091_v58, 1  ;;  %v1563_v32 = vsel %vm1135_vm0, %v5681_v28, 0  ;;  %v1066_v28 = vor.u32 %v1064_v19, %v7093_v62 }
  0x64   : > { %v6049_v43 = vsel %vm5989_vm7, 0, %v875_v1  ;;  %v1069_v35 = vrot.slane %v7089_v48, 1 }
  0x65   : > { %v1068_v1 = vor.u32 %v1067_v45, %v7092_v60  ;;  %v6079_v19 = vsel %vm5761_vm4, %v1066_v28, 0  ;;  %v902_v45 = vrot.slane %v900_v15, 7  ;;  %v7116_v15 = vshll.u32 %v5662_v18, 16 }
  0x66   : > { %v7123_v60 = vshrl.u32 %v5835_v56, 16 }
  0x67   : > { %v905_v28 = vor.u32 %v7116_v15, %v902_v45 }
  0x68   : > { %4668 = vmatmul.mubr.msk.bf16.gmra.mrb[24].mxu1 %vm1102_vm1, %v5938_v6  ;;  %v932_v62 = vrot.slane %v7123_v60, 7  ;;  %v7125_v60 = vshll.u32 %v5835_v56, 16 }
  0x69   : > { %4826 = vmatmul.mubr.msk.bf16.gmra.mrb[12].mxu0 %vm1102_vm1, %v5942_v59  ;;  %4671 = vmatprep.mubr.msk.bf16.mxu1 %vm1102_vm1, %v5944_v39 }
  0x6a   : > { %4829 = vmatprep.mubr.msk.bf16.mxu0 %vm1102_vm1, %v5954_v34 }
  0x70   : > { %4672 = vmatmul.mubr.msk.bf16.gmra.mrb[28].mxu1 %vm1102_vm1, %v5770_v9 }
  0x71   : > { %4830 = vmatmul.mubr.msk.bf16.gmra.mrb[16].mxu0 %vm1102_vm1, %v5998_v29  ;;  %4677 = vmatprep.mubr.msk.bf16.mxu1 %vm1102_vm1, %v1016_v30  ;;  %v879_v30 = vrot.slane %v877_v49, 7  ;;  %v887_v49 = vrot.slane %v885_v52, 7 }
  0x72   : > { %4833 = vmatprep.mubr.msk.bf16.mxu0 %vm1102_vm1, %v6002_v20 }
  0x73   : > { %v882_v52 = vor.u32 %v880_v38, %v879_v30  ;;  %v890_v37 = vor.u32 %v888_v44, %v887_v49  ;;  %v6088_v30 = vsel %vm1026_vm2, %v1068_v1, %v1069_v35  ;;  %v7118_v1 = vshrl.u32 %v5696_v33, 16 }
  0x74   : > { %7114 = vst [vmem:[#allocation12_spill] sm:$0xff] %v6088_v30 }
  0x75   : > { %v6085_v38 = vsel %vm853_vm5, %v872_v47, %v882_v52  ;;  %v6092_v44 = vsel %vm5989_vm7, 0, %v890_v37  ;;  %v7115_v47 = vshll.u32 %v5658_v11, 16  ;;  %v909_v37 = vrot.slane %v7118_v1, 7 }
  0x76   : > { %v2579_v1 = vsel %vm1135_vm0, %v5796_v25, 0  ;;  %v7124_v25 = vshll.u32 %v5722_v46, 16 }
  0x78   : > { %4678 = vmatmul.mubr.msk.bf16.vlgmr.msra.gmra.mrb[0].mxu1 %vm1102_vm1, %v868_v57  ;;  %v7090_v57 = vshrl.u32 %v5893_v17, 16 }
  0x79   : > { %4834 = vmatmul.mubr.msk.bf16.gmra.mrb[20].mxu0 %vm1102_vm1, %v6033_v54  ;;  %4710 = vmatpush3.bf16.msra.mxu1 %v1563_v32  ;;  %v897_v32 = vor.u32 %v7115_v47, %v894_v51  ;;  %v7121_v47 = vshll.u32 %v5700_v36, 16 }
  0x7a   : > { %4837 = vmatprep.mubr.msk.bf16.mxu0 %vm1102_vm1, %v6039_v27  ;;  %4681 = vmatprep.mubr.msk.bf16.mxu1 %vm1102_vm1, %v6049_v43  ;;  %v1071_v8 = vor.u32 %v1069_v35, %v7090_v57  ;;  %v6121_v35 = vsel %vm5989_vm7, 0, %v905_v28  ;;  %v7119_v57 = vshrl.u32 %v5700_v36, 16 }
  0x7b   : > { %5208 = vmatprep.subr.msk.bf16.mxu1 %vm1135_vm0, %v6058_v16  ;;  %v6117_v48 = vsel %vm853_vm5, %v887_v49, %v897_v32  ;;  %v7120_v49 = vshll.u32 %v5696_v33, 16 }
  0x7c   : > { %v6112_v52 = vsel %vm5761_vm4, %v1071_v8, 0  ;;  %v917_v51 = vrot.slane %v7119_v57, 7  ;;  %v7122_v57 = vshrl.u32 %v5722_v46, 16 }
  0x7d   : > { %7117 = vst [vmem:[#allocation13_spill] sm:$0xff] %v6112_v52  ;;  %v912_v8 = vor.u32 %v7120_v49, %v909_v37  ;;  %v6155_v37 = vld [vmem:[%s7059_s4 + $0x10] sm:$0x3]  ;;  %v935_v49 = vor.u32 %v7125_v60, %v932_v62  ;;  %v7128_v60 = vshrl.u32 %v5944_v39, 16 }
  0x7e   : > { %v920_v32 = vor.u32 %v7121_v47, %v917_v51  ;;  %v924_v15 = vrot.slane %v7122_v57, 7  ;;  %v947_v57 = vrot.slane %v945_v40, 7  ;;  %v954_v40 = vrot.slane %v952_v31, 7 }
  0x7f   : > { %v6140_v28 = vsel %vm853_vm5, %v902_v45, %v912_v8  ;;  %v939_v8 = vrot.slane %v937_v24, 7  ;;  %v7126_v24 = vshll.u32 %v5899_v4, 16  ;;  %v7129_v31 = vshll.u32 %v5938_v6, 16 }
  0x80   : > { %4682 = vmatmul.mubr.msk.bf16.gmra.mrb[4].mxu1 %vm1102_vm1, %v6085_v38  ;;  %v6146_v58 = vsel %vm5989_vm7, 0, %v920_v32  ;;  %v927_v45 = vor.u32 %v7124_v25, %v924_v15  ;;  %v6176_v32 = vsel %vm5989_vm7, 0, %v935_v49  ;;  %v7127_v15 = vshll.u32 %v5906_v5, 16 }
  0x81   : > { %4838 = vmatmul.mubr.msk.bf16.gmra.mrb[24].mxu0 %vm1102_vm1, %v6079_v19  ;;  %4685 = vmatprep.mubr.msk.bf16.mxu1 %vm1102_vm1, %v6092_v44  ;;  %v962_v49 = vrot.slane %v7128_v60, 7  ;;  %v7132_v60 = vshll.u32 %v5666_v22, 16 }
  0x82   : > { %4841 = vmatprep.mubr.msk.bf16.mxu0 %vm1102_vm1, %v6088_v30  ;;  %v6172_v47 = vsel %vm853_vm5, %v917_v51, %v927_v45  ;;  %v942_v51 = vor.u32 %v7126_v24, %v939_v8  ;;  %v7130_v8 = vshll.u32 %v5944_v39, 16 }
  0x83   : > { %v1027_v7 = vrot.slane %v7132_v60, 1 }
  0x84   : > { %v6195_v25 = vsel %vm853_vm5, %v932_v62, %v942_v51  ;;  %v957_v62 = vor.u32 %v7129_v31, %v954_v40  ;;  %v965_v24 = vor.u32 %v7130_v8, %v962_v49  ;;  %v7131_v51 = vshrl.u32 %v5770_v9, 16 }
  0x85   : > { %v7135_v31 = vshrl.u32 %v5666_v22, 16  ;;  %v7136_v8 = vshll.u32 %v5668_v23, 16  ;;  %v3019_v22 = vld [vmem:[%s6253_s26] sm:$0xf] }
  0x86   : > { %v6224_v10 = vsel %vm5989_vm7, 0, %v965_v24 }
  0x87   : > { %7133 = vst [vmem:[#allocation14_spill] sm:$0xff] %v6224_v10  ;;  %v1029_v24 = vrot.slane %v7136_v8, 1  ;;  %v3020_v8 = vld [vmem:[%s6253_s26 + $0x4] sm:$0xf] }
  0x88   : > { %4686 = vmatmul.mubr.msk.bf16.gmra.mrb[8].mxu1 %vm1102_vm1, %v6117_v48 }
  0x89   : > { %4842 = vmatmul.mubr.msk.bf16.gmra.mrb[28].mxu0 %vm1102_vm1, %v6112_v52  ;;  %4689 = vmatprep.mubr.msk.bf16.mxu1 %vm1102_vm1, %v6121_v35  ;;  %v7137_v52 = vshrl.u32 %v5891_v13, 16 }
  0x8a   : > { %4847 = vmatprep.mubr.msk.bf16.mxu0 %vm1102_vm1, %v6092_v44 }
  0x8b   : > { %v977_v30 = vrot.slane %v7137_v52, 7  ;;  %v7138_v52 = vshrl.u32 %v5668_v23, 16 }
  0x90   : > { %4690 = vmatmul.mubr.msk.bf16.gmra.mrb[12].mxu1 %vm1102_vm1, %v6140_v28 }
  0x91   : > { %4848 = vmatmul.mubr.msk.bf16.vlgmr.msra.gmra.mrb[0].mxu0 %vm1102_vm1, %v6117_v48  ;;  %4693 = vmatprep.mubr.msk.bf16.mxu1 %vm1102_vm1, %v6146_v58 }
  0x92   : > { %4880 = vmatpush3.bf16.msra.mxu0 %v2579_v1  ;;  %4851 = vmatprep.mubr.msk.bf16.mxu0 %vm1102_vm1, %v6121_v35  ;;  %v950_v1 = vor.u32 %v7127_v15, %v947_v57  ;;  %v969_v15 = vrot.slane %v7131_v51, 7  ;;  %v5386_v51 = vmov 0  }
  0x93   : > { %5214 = vmatprep.subr.msk.bf16.mxu0 %vm1135_vm0, %v6155_v37  ;;  %5289 = vset.pattern.permute.xlu1 %v5386_v51 }
  0x94   : > { %v6199_v45 = vsel %vm5989_vm7, 0, %v950_v1  ;;  %v6218_v1 = vsel %vm853_vm5, %v947_v57, %v957_v62  ;;  %v7134_v57 = vshll.u32 %v5770_v9, 16  ;;  %v1028_v62 = vor.u32 %v1027_v7, %v7135_v31  ;;  %5288 = vset.pattern.permute.xlu0 %v5386_v51  ;;  %v3021_v7 = vld [vmem:[%s6253_s26 + $0x8] sm:$0xf] }
  0x95   : > { %v990_v31 = vshrl.u32 %v5981_v41, 16  ;;  %3079 = vperm.xlu1 %5289, %v3021_v7   ;;  %3055 = vperm.xlu0 %5288, %v3019_v22   ;;  %v7140_v51 = vshrl.u32 %v5893_v17, 16  ;;  %v993_v7 = vshll.u32 %v5981_v41, 16  ;;  %v1767_v22 = vsel %vm1135_vm0, %v6058_v16, 0 }
  0x96   : > { %v972_v40 = vor.u32 %v7134_v57, %v969_v15  ;;  %v1030_v15 = vsel %vm1026_vm2, %v1028_v62, %v1029_v24  ;;  %v7139_v57 = vshll.u32 %v5891_v13, 16  ;;  %v3022_v62 = vld [vmem:[%s6253_s26 + $0xc] sm:$0xf] }
  0x98   : > { %4694 = vmatmul.mubr.msk.bf16.gmra.mrb[16].mxu1 %vm1102_vm1, %v6172_v47  ;;  %v6242_v60 = vsel %vm853_vm5, %v962_v49, %v972_v40  ;;  %v1031_v49 = vor.u32 %v1029_v24, %v7138_v52  ;;  %v980_v40 = vor.u32 %v7139_v57, %v977_v30  ;;  %v7141_v52 = vshll.u32 %v5893_v17, 16 }
  0x99   : > { %4852 = vmatmul.mubr.msk.bf16.gmra.mrb[4].mxu0 %vm1102_vm1, %v6140_v28  ;;  %4697 = vmatprep.mubr.msk.bf16.mxu1 %vm1102_vm1, %v6176_v32  ;;  %v997_v57 = vshrl.u32 %v5985_v63, 16 }
  0x9a   : > { %4855 = vmatprep.mubr.msk.bf16.mxu0 %vm1102_vm1, %v6146_v58  ;;  %v1089_v23 = vsel %vm5761_vm4, %v1031_v49, 0  ;;  %v6275_v24 = vsel %vm5989_vm7, 0, %v980_v40  ;;  %3091 = vperm.xlu1 %5289, %v3022_v62   ;;  %v3024_v40 = vld [vmem:[%s6253_s26 + $0x14] sm:$0xf]  ;;  %v3023_v62 = vld [vmem:[%s6253_s26 + $0x10] sm:$0xf] }
  0x9b   : > { %3067 = vperm.xlu0 %5288, %v3020_v8   ;;  %v3026_v8 = vld [vmem:[%s6253_s26 + $0x1c] sm:$0xf] }
  0x9e   : > { %3115 = vperm.xlu1 %5289, %v3024_v40   ;;  %v3032_v40 = vld [vmem:[%s6253_s26 + $0x34] sm:$0xf] }
  0x9f   : > { %3103 = vperm.xlu0 %5288, %v3023_v62   ;;  %v3031_v62 = vld [vmem:[%s6253_s26 + $0x30] sm:$0xf] }
  0xa0   : > { %4698 = vmatmul.mubr.msk.bf16.gmra.mrb[20].mxu1 %vm1102_vm1, %v6195_v25 }
  0xa1   : > { %4856 = vmatmul.mubr.msk.bf16.gmra.mrb[8].mxu0 %vm1102_vm1, %v6172_v47  ;;  %4701 = vmatprep.mubr.msk.bf16.mxu1 %vm1102_vm1, %v6199_v45 }
  0xa2   : > { %4859 = vmatprep.mubr.msk.bf16.mxu0 %vm1102_vm1, %v6176_v32  ;;  %3139 = vperm.xlu1 %5289, %v3026_v8   ;;  %v2783_v8 = vsel %vm1135_vm0, %v6155_v37, 0  ;;  %v3038_v37 = vld [vmem:[%s6253_s26 + $0x4c] sm:$0xf] }
  0xa8   : > { %4702 = vmatmul.mubr.msk.bf16.gmra.mrb[24].mxu1 %vm1102_vm1, %v6218_v1 }
  0xa9   : > { %4860 = vmatmul.mubr.msk.bf16.gmra.mrb[12].mxu0 %vm1102_vm1, %v6195_v25  ;;  %4705 = vmatprep.mubr.msk.bf16.mxu1 %vm1102_vm1, %v6224_v10 }
  0xaa   : > { %4863 = vmatprep.mubr.msk.bf16.mxu0 %vm1102_vm1, %v6199_v45 }
  0xb0   : > { %4706 = vmatmul.mubr.msk.bf16.gmra.mrb[28].mxu1 %vm1102_vm1, %v6242_v60 }
  0xb1   : > { %4864 = vmatmul.mubr.msk.bf16.gmra.mrb[16].mxu0 %vm1102_vm1, %v6218_v1  ;;  %4711 = vmatprep.mubr.msk.bf16.mxu1 %vm1102_vm1, %v1030_v15  ;;  %v992_v15 = vrot.slane %v990_v31, 7 }
  0xb2   : > { %4867 = vmatprep.mubr.msk.bf16.mxu0 %vm1102_vm1, %v6224_v10  ;;  %v984_v10 = vrot.slane %v7140_v51, 7  ;;  %v999_v51 = vrot.slane %v997_v57, 7 }
  0xb3   : > { %v995_v16 = vor.u32 %v993_v7, %v992_v15 }
  0xb4   : > { %v987_v49 = vor.u32 %v7141_v52, %v984_v10  ;;  %v3027_v52 = vld [vmem:[%s6253_s26 + $0x20] sm:$0xf] }
  0xb6   : > { %v6300_v10 = vsel %vm853_vm5, %v977_v30, %v987_v49  ;;  %v3028_v30 = vld [vmem:[%s6253_s26 + $0x24] sm:$0xf] }
  0xb7   : > { %3163 = vperm.xlu1 %5289, %v3028_v30   ;;  %v3046_v30 = vld [vmem:[%s6253_s26 + $0x6c] sm:$0xf] }
  0xb8   : > { %4712 = vmatmul.mubr.msk.bf16.vlgmr.msra.gmra.mrb[0].mxu1 %vm1102_vm1, %v1089_v23  ;;  %v3025_v23 = vld [vmem:[%s6253_s26 + $0x18] sm:$0xf] }
  0xb9   : > { %4868 = vmatmul.mubr.msk.bf16.gmra.mrb[20].mxu0 %vm1102_vm1, %v6242_v60  ;;  %4744 = vmatpush3.bf16.msra.mxu1 %v1767_v22  ;;  %v1025_v22 = vsel %vm5989_vm7, 0, %v995_v16  ;;  %v3033_v16 = vld [vmem:[%s6253_s26 + $0x38] sm:$0xf] }
  0xba   : > { %4871 = vmatprep.mubr.msk.bf16.mxu0 %vm1102_vm1, %v6275_v24  ;;  %4715 = vmatprep.mubr.msk.bf16.mxu1 %vm1102_vm1, %v5731_v50  ;;  %v1000_v50 = vshll.u32 %v5985_v63, 16 }
  0xbb   : > { %5210 = vmatprep.subr.msk.bf16.mxu1 %vm1135_vm0, %v5513_v0  ;;  %3127 = vperm.xlu0 %5288, %v3025_v23   ;;  %v3040_v23 = vld [vmem:[%s6253_s26 + $0x54] sm:$0xf] }
  0xbc   : > { %v1002_v0 = vor.u32 %v1000_v50, %v999_v51  ;;  %3187 = vperm.xlu1 %5289, %v3030_v53   ;;  %v3035_v51 = vld [vmem:[%s6253_s26 + $0x40] sm:$0xf]  ;;  %v3047_v53 = vld [vmem:[%s6253_s26 + $0x70] sm:$0xf] }
  0xbe   : > { %v1003_v49 = vsel %vm853_vm5, %v992_v15, %v1002_v0  ;;  %v3034_v15 = vld [vmem:[%s6253_s26 + $0x3c] sm:$0xf]  ;;  %v3041_v0 = vld [vmem:[%s6253_s26 + $0x58] sm:$0xf] }
  0xbf   : > { %3151 = vperm.xlu0 %5288, %v3027_v52   ;;  %v3045_v52 = vld [vmem:[%s6253_s26 + $0x68] sm:$0xf] }
  0xc0   : > { %4716 = vmatmul.mubr.msk.bf16.gmra.mrb[4].mxu1 %vm1102_vm1, %v5780_v14  ;;  %v3029_v14 = vld [vmem:[%s6253_s26 + $0x28] sm:$0xf]  ;;  %3211 = vperm.xlu1 %5289, %v3032_v40  }
  0xc1   : > { %4872 = vmatmul.mubr.msk.bf16.gmra.mrb[24].mxu0 %vm1102_vm1, %v6300_v10  ;;  %4719 = vmatprep.mubr.msk.bf16.mxu1 %vm1102_vm1, %v5789_v21 }
  0xc2   : > { %4875 = vmatprep.mubr.msk.bf16.mxu0 %vm1102_vm1, %v1025_v22  ;;  %v3042_v22 = vld [vmem:[%s6253_s26 + $0x5c] sm:$0xf] }
  0xc3   : > { %3175 = vperm.xlu0 %5288, %v3029_v14   ;;  %v3049_v14 = vld [vmem:[%s6253_s26 + $0x78] sm:$0xf] }
  0xc4   : > { %3235 = vperm.xlu1 %5289, %v3034_v15  }
  0xc7   : > { %3199 = vperm.xlu0 %5288, %v3031_v62  }
  0xc8   : > { %4720 = vmatmul.mubr.msk.bf16.gmra.mrb[8].mxu1 %vm1102_vm1, %v5827_v42 }
  0xc9   : > { %4876 = vmatmul.mubr.msk.bf16.gmra.mrb[28].mxu0 %vm1102_vm1, %v1003_v49  ;;  %4723 = vmatprep.mubr.msk.bf16.mxu1 %vm1102_vm1, %v5845_v61  ;;  %v3050_v49 = vld [vmem:[%s6253_s26 + $0x7c] sm:$0xf] }
  0xca   : > { %4881 = vmatprep.mubr.msk.bf16.mxu0 %vm1102_vm1, %v5633_v55  ;;  %v3036_v55 = vld [vmem:[%s6253_s26 + $0x44] sm:$0xf] }
  0xcb   : > { %3223 = vperm.xlu0 %5288, %v3033_v16   ;;  %3259 = vperm.xlu1 %5289, %v3036_v55  }
  0xcf   : > { %3247 = vperm.xlu0 %5288, %v3035_v51   ;;  %3283 = vperm.xlu1 %5289, %v3038_v37  }
  0xd0   : > { %4724 = vmatmul.mubr.msk.bf16.gmra.mrb[12].mxu1 %vm1102_vm1, %v5904_v12 }
  0xd1   : > { %4882 = vmatmul.mubr.msk.bf16.vlgmr.msra.gmra.mrb[0].mxu0 %vm1102_vm1, %v5658_v11  ;;  %4727 = vmatprep.mubr.msk.bf16.mxu1 %vm1102_vm1, %v5910_v26  ;;  %v3037_v11 = vld [vmem:[%s6253_s26 + $0x48] sm:$0xf] }
  0xd2   : > { %4914 = vmatpush3.bf16.msra.mxu0 %v2783_v8  ;;  %4885 = vmatprep.mubr.msk.bf16.mxu0 %vm1102_vm1, %v5662_v18  ;;  %v3039_v18 = vld [vmem:[%s6253_s26 + $0x50] sm:$0xf] }
  0xd3   : > { %3271 = vperm.xlu0 %5288, %v3037_v11   ;;  %3307 = vperm.xlu1 %5289, %v3040_v23  }
  0xd7   : > { %3295 = vperm.xlu0 %5288, %v3039_v18   ;;  %3331 = vperm.xlu1 %5289, %v3042_v22  }
  0xd8   : > { %4728 = vmatmul.mubr.msk.bf16.gmra.mrb[16].mxu1 %vm1102_vm1, %v5942_v59 }
  0xd9   : > { %4886 = vmatmul.mubr.msk.bf16.gmra.mrb[4].mxu0 %vm1102_vm1, %v5696_v33  ;;  %4731 = vmatprep.mubr.msk.bf16.mxu1 %vm1102_vm1, %v5954_v34  ;;  %v3044_v33 = vld [vmem:[%s6253_s26 + $0x64] sm:$0xf] }
  0xda   : > { %4889 = vmatprep.mubr.msk.bf16.mxu0 %vm1102_vm1, %v5700_v36  ;;  %v3043_v36 = vld [vmem:[%s6253_s26 + $0x60] sm:$0xf] }
  0xdb   : > { %3319 = vperm.xlu0 %5288, %v3041_v0   ;;  %3355 = vperm.xlu1 %5289, %v3044_v33  }
  0xdf   : > { %3343 = vperm.xlu0 %5288, %v3043_v36   ;;  %3379 = vperm.xlu1 %5289, %v3046_v30  }
  0xe0   : > { %4732 = vmatmul.mubr.msk.bf16.gmra.mrb[20].mxu1 %vm1102_vm1, %v5998_v29 }
  0xe1   : > { %4890 = vmatmul.mubr.msk.bf16.gmra.mrb[8].mxu0 %vm1102_vm1, %v5722_v46  ;;  %4735 = vmatprep.mubr.msk.bf16.mxu1 %vm1102_vm1, %v6002_v20  ;;  %v3048_v46 = vld [vmem:[%s6253_s26 + $0x74] sm:$0xf]  ;;  %s496_s26 = scalar_lea.vmem [#allocation2], %s4228_s15 }
  0xe2   : > { %4893 = vmatprep.mubr.msk.bf16.mxu0 %vm1102_vm1, %v5835_v56  ;;  %s4022_s18 = sshll.u32 %s496_s26, 4  ;;  %s7003_s18 = int_to_ptr.vmem [resolvable:$true] %s4022_s18 }
  0xe3   : > { %3367 = vperm.xlu0 %5288, %v3045_v52   ;;  %3403 = vperm.xlu1 %5289, %v3048_v46   ;;  %s5290_s13 = scalar_lea.vmem %s7003_s18, 32  ;;  %p5297_p13 = scmp.lt.s32.totalorder %s7003_s18, %s5295_s19 }
  0xe4   : > { %p5291_p10 = scmp.ne.s32.totalorder %s7003_s18, %s5290_s13 }
  0xe6   : > { %p5292_p11 = pnand %p5291_p10, %p5490_p3 }
  0xe7   : > { %3391 = vperm.xlu0 %5288, %v3047_v53   ;;  %3427 = vperm.xlu1 %5289, %v3050_v49  }
  0xe8   : > { %4736 = vmatmul.mubr.msk.bf16.gmra.mrb[24].mxu1 %vm1102_vm1, %v6033_v54  ;;  %p5293_p12 = pneg %p5292_p11 }
  0xe9   : > { %4894 = vmatmul.mubr.msk.bf16.gmra.mrb[12].mxu0 %vm1102_vm1, %v5899_v4  ;;  %4739 = vmatprep.mubr.msk.bf16.mxu1 %vm1102_vm1, %v6039_v27 }
  0xea   : > { %4897 = vmatprep.mubr.msk.bf16.mxu0 %vm1102_vm1, %v5906_v5 }
  0xeb   : > { %3415 = vperm.xlu0 %5288, %v3049_v14  }
  0xf0   : > { %4740 = vmatmul.mubr.msk.bf16.gmra.mrb[28].mxu1 %vm1102_vm1, %v6079_v19 }
  0xf1   : > { %4898 = vmatmul.mubr.msk.bf16.gmra.mrb[16].mxu0 %vm1102_vm1, %v5938_v6  ;;  %4745 = vmatprep.mubr.msk.bf16.mxu1 %vm1102_vm1, %v6049_v43 }
  0xf2   : > { %4901 = vmatprep.mubr.msk.bf16.mxu0 %vm1102_vm1, %v5944_v39 }
  0xf8   : > { %4746 = vmatmul.mubr.msk.bf16.vlgmr.msra.gmra.mrb[0].mxu1 %vm1102_vm1, %v6085_v38 }
  0xf9   : > { %4902 = vmatmul.mubr.msk.bf16.gmra.mrb[20].mxu0 %vm1102_vm1, %v5770_v9  ;;  %4948 = vmatpush3.bf16.msra.mxu1 %v5526_v3  ;;  %v7142_v3 = vld [vmem:[#allocation14_spill] sm:$0xff] }
  0xfa   : > { %4905 = vmatprep.mubr.msk.bf16.mxu0 %vm1102_vm1, %v5891_v13  ;;  %4749 = vmatprep.mubr.msk.bf16.mxu1 %vm1102_vm1, %v6092_v44  ;;  %v3051_v44 = vld [vmem:[%s7061_s6] sm:$0x1] }
 0x100   : > { %4750 = vmatmul.mubr.msk.bf16.gmra.mrb[4].mxu1 %vm1102_vm1, %v6117_v48  ;;  %v7144_v48 = vld [vmem:[#allocation13_spill] sm:$0xff] }
 0x101   : > { %4906 = vmatmul.mubr.msk.bf16.gmra.mrb[24].mxu0 %vm1102_vm1, %v5893_v17  ;;  %4753 = vmatprep.mubr.msk.bf16.mxu1 %vm1102_vm1, %v6121_v35 }
 0x102   : > { %4909 = vmatprep.mubr.msk.bf16.mxu0 %vm1102_vm1, %v5981_v41 }
 0x108   : > { %4754 = vmatmul.mubr.msk.bf16.gmra.mrb[8].mxu1 %vm1102_vm1, %v6140_v28 }
 0x109   : > { %4910 = vmatmul.mubr.msk.bf16.gmra.mrb[28].mxu0 %vm1102_vm1, %v5985_v63  ;;  %4757 = vmatprep.mubr.msk.bf16.mxu1 %vm1102_vm1, %v6146_v58 }
 0x10a   : > { %4915 = vmatprep.mubr.msk.bf16.mxu0 %vm1102_vm1, %v5789_v21 }
 0x110   : > { %4758 = vmatmul.mubr.msk.bf16.gmra.mrb[12].mxu1 %vm1102_vm1, %v6172_v47  ;;  %v5387_v47 = vmov 839922192  }
 0x111   : > { %4916 = vmatmul.mubr.msk.bf16.vlgmr.msra.gmra.mrb[0].mxu0 %vm1102_vm1, %v5827_v42  ;;  %4761 = vmatprep.mubr.msk.bf16.mxu1 %vm1102_vm1, %v6176_v32  ;;  %v3059_v32 = vunpack.c.l.s4 %v5387_v47 }
 0x112   : > { %4919 = vmatprep.mubr.msk.bf16.mxu0 %vm1102_vm1, %v5845_v61 }
 0x114   : > { %v6454_v21 = vpop.permute.xlu1 %3079  ;;  %v6458_v42 = vpop.permute.xlu0 %3055 }
 0x118   : > { %4762 = vmatmul.mubr.msk.bf16.gmra.mrb[16].mxu1 %vm1102_vm1, %v6195_v25 }
 0x119   : > { %4920 = vmatmul.mubr.msk.bf16.gmra.mrb[4].mxu0 %vm1102_vm1, %v5904_v12  ;;  %4765 = vmatprep.mubr.msk.bf16.mxu1 %vm1102_vm1, %v6199_v45  ;;  %v6460_v61 = vpop.permute.xlu1 %3091 }
 0x11a   : > { %4923 = vmatprep.mubr.msk.bf16.mxu0 %vm1102_vm1, %v5910_v26  ;;  %v6464_v12 = vpop.permute.xlu0 %3067  ;;  %v7143_v26 = vld [vmem:[#allocation12_spill] sm:$0xff] }
 0x11d   : > { %v6478_v58 = vpop.permute.xlu1 %3115 }
 0x120   : > { %4766 = vmatmul.mubr.msk.bf16.gmra.mrb[20].mxu1 %vm1102_vm1, %v6218_v1 }
 0x121   : > { %4924 = vmatmul.mubr.msk.bf16.gmra.mrb[8].mxu0 %vm1102_vm1, %v5942_v59  ;;  %4769 = vmatprep.mubr.msk.bf16.mxu1 %vm1102_vm1, %v7142_v3  ;;  %v1072_v59 = vrot.slane %v993_v7, 1 }
 0x122   : > { %4927 = vmatprep.mubr.msk.bf16.mxu0 %vm1102_vm1, %v5954_v34  ;;  %v1074_v34 = vrot.slane %v1000_v50, 1 }
 0x128   : > { %4770 = vmatmul.mubr.msk.bf16.gmra.mrb[24].mxu1 %vm1102_vm1, %v6242_v60  ;;  %v3060_v60 = vunpack.c.0.s8 %v3059_v32 }
 0x129   : > { %4928 = vmatmul.mubr.msk.bf16.gmra.mrb[12].mxu0 %vm1102_vm1, %v5998_v29  ;;  %4773 = vmatprep.mubr.msk.bf16.mxu1 %vm1102_vm1, %v6275_v24 }
 0x12a   : > { %4931 = vmatprep.mubr.msk.bf16.mxu0 %vm1102_vm1, %v6002_v20  ;;  %v6483_v20 = vpop.permute.xlu1 %3139 }
 0x130   : > { %4774 = vmatmul.mubr.msk.bf16.gmra.mrb[28].mxu1 %vm1102_vm1, %v6300_v10 }
 0x131   : > { %4932 = vmatmul.mubr.msk.bf16.gmra.mrb[16].mxu0 %vm1102_vm1, %v6033_v54  ;;  %4795 = vmatprep.mubr.msk.bf16.mxu1 %vm1102_vm1, %v5835_v56  ;;  %v1073_v56 = vor.u32 %v1072_v59, %v990_v31  ;;  %v6480_v54 = vpop.permute.xlu0 %3103  ;;  %v7145_v31 = vld [vmem:[#allocation11_spill] sm:$0xff] }
 0x132   : > { %4935 = vmatprep.mubr.msk.bf16.mxu0 %vm1102_vm1, %v6039_v27 }
 0x133   : > { %v1075_v29 = vsel %vm1026_vm2, %v1073_v56, %v1074_v34 }
 0x136   : > { %v6496_v41 = vpop.permute.xlu1 %3163 }
 0x138   : > { %4796 = vmatmul.mubr.msk.bf16.vlgmr.msra.gmra.mrb[16].mxu1 %vm1102_vm1, %v5899_v4 }
 0x139   : > { %4936 = vmatmul.mubr.msk.bf16.gmra.mrb[20].mxu0 %vm1102_vm1, %v6079_v19  ;;  %4799 = vmatprep.mubr.msk.bf16.mxu1 %vm1102_vm1, %v5906_v5  ;;  %v1076_v5 = vor.u32 %v1074_v34, %v997_v57  ;;  %v7146_v57 = vld [vmem:[#allocation10_spill] sm:$0xff] }
 0x13a   : > { %4939 = vmatprep.mubr.msk.bf16.mxu0 %vm1102_vm1, %v7143_v26  ;;  %v6485_v4 = vpop.permute.xlu0 %3127  ;;  %v6540_v10 = vsub.s32 %v3060_v60, %v7146_v57 }
 0x13b   : > { %v1098_v43 = vsel %vm5761_vm4, %v1076_v5, 0  ;;  %v6502_v19 = vpop.permute.xlu1 %3187 }
 0x13c   : > { %v3088_v57 = vrot.slane %v6454_v21, %v6540_v10 }
 0x13e   : > { %v6498_v27 = vpop.permute.xlu0 %3151 }
 0x140   : > { %4800 = vmatmul.mubr.msk.bf16.gmra.mrb[20].mxu1 %vm1102_vm1, %v5938_v6 }
 0x141   : > { %4940 = vmatmul.mubr.msk.bf16.gmra.mrb[24].mxu0 %vm1102_vm1, %v7144_v48  ;;  %4803 = vmatprep.mubr.msk.bf16.mxu1 %vm1102_vm1, %v5944_v39  ;;  %v6511_v39 = vpop.permute.xlu1 %3211 }
 0x142   : > { %4943 = vmatprep.mubr.msk.bf16.mxu0 %vm1102_vm1, %v1075_v29  ;;  %v6504_v38 = vpop.permute.xlu0 %3175 }
 0x145   : > { %v6515_v63 = vpop.permute.xlu1 %3235 }
 0x146   : > { %v6513_v6 = vpop.permute.xlu0 %3199 }
 0x148   : > { %4804 = vmatmul.mubr.msk.bf16.gmra.mrb[24].mxu1 %vm1102_vm1, %v5770_v9 }
 0x149   : > { %4944 = vmatmul.mubr.msk.bf16.gmra.mrb[28].mxu0 %vm1102_vm1, %v1098_v43  ;;  %4807 = vmatprep.mubr.msk.bf16.mxu1 %vm1102_vm1, %v5891_v13  ;;  %v3052_v13 = vpack.c.bf16 %v3051_v44, %v3051_v44 }
 0x14a   : > { %v6517_v2 = vpop.permute.xlu0 %3223  ;;  %v6524_v35 = vpop.permute.xlu1 %3259 }
 0x14b   : > { %v3438_v45 = vpack.i.b16 %v3052_v13, %v3052_v13 }
 0x14d   : > { %v3443_v24 = vrot.slane %v3438_v45, %v7145_v31 }
 0x14e   : > { %v6526_v9 = vpop.permute.xlu0 %3247  ;;  %v6528_v28 = vpop.permute.xlu1 %3283 }
 0x14f   : > { %v6544_v40 = vcombine.low %v3443_v24, %v3443_v24 }
 0x150   : > { %4808 = vmatmul.mubr.msk.bf16.gmra.mrb[28].mxu1 %vm1102_vm1, %v5893_v17 }
 0x152   : > { %v6530_v25 = vpop.permute.xlu0 %3271  ;;  %v6532_v1 = vpop.permute.xlu1 %3307 }
 0x156   : > { %v6534_v17 = vpop.permute.xlu0 %3295  ;;  %v6537_v7 = vpop.permute.xlu1 %3331 }
 0x15a   : > { %v6542_v50 = vpop.permute.xlu0 %3319  ;;  %v3356_v62 = vpop.permute.xlu1 %3355 }
 0x15b   : > { %v3364_v15 = vrot.slane %v3356_v62, %v6540_v10  ;;  %v3064_v62 = vrot.slane %v6458_v42, %v6540_v10 }
 0x15d   : > { %v6549_v55 = vmul.bf16 %v6544_v40, %v3364_v15  ;;  %v3100_v15 = vrot.slane %v6460_v61, %v6540_v10  ;;  %v6611_v21 = vmul.bf16 %v6544_v40, %v3064_v62  ;;  %v3160_v62 = vrot.slane %v6498_v27, %v6540_v10 }
 0x15e   : > { %v3344_v16 = vpop.permute.xlu0 %3343  ;;  %v3380_v37 = vpop.permute.xlu1 %3379 }
 0x15f   : > { %v3352_v8 = vrot.slane %v3344_v16, %v6540_v10  ;;  %v3388_v11 = vrot.slane %v3380_v37, %v6540_v10  ;;  %v3076_v16 = vrot.slane %v6464_v12, %v6540_v10  ;;  %v6606_v37 = vmul.bf16 %v6544_v40, %v3088_v57 }
 0x160   : > { %v6614_v42 = vmul.bf16 %v6544_v40, %v3100_v15  ;;  %v3124_v12 = vrot.slane %v6478_v58, %v6540_v10  ;;  %v3196_v15 = vrot.slane %v6502_v19, %v6540_v10  ;;  %v3232_v19 = vrot.slane %v6517_v2, %v6540_v10 }
 0x161   : > { %v6552_v51 = vmul.bf16 %v6544_v40, %v3352_v8  ;;  %v6559_v0 = vmul.bf16 %v6544_v40, %v3388_v11  ;;  %v2994_v8 = vld [vmem:[%s7060_s5] sm:$0x1]  ;;  %v6617_v61 = vmul.bf16 %v6544_v40, %v3076_v16  ;;  %v3184_v16 = vrot.slane %v6504_v38, %v6540_v10 }
 0x162   : > { %v3368_v23 = vpop.permute.xlu0 %3367  ;;  %v3404_v36 = vpop.permute.xlu1 %3403  ;;  %v6636_v58 = vmul.bf16 %v6544_v40, %v3124_v12  ;;  %v3268_v38 = vrot.slane %v6524_v35, %v6540_v10 }
 0x163   : > { %v3376_v22 = vrot.slane %v3368_v23, %v6540_v10  ;;  %v3412_v30 = vrot.slane %v3404_v36, %v6540_v10 }
 0x165   : > { %v6562_v33 = vmul.bf16 %v6544_v40, %v3376_v22  ;;  %v6569_v49 = vmul.bf16 %v6544_v40, %v3412_v30  ;;  %v3112_v22 = vrot.slane %v6480_v54, %v6540_v10  ;;  %v2995_v30 = vpack.c.bf16 %v2994_v8, %v2994_v8 }
 0x166   : > { %v3392_v52 = vpop.permute.xlu0 %3391  ;;  %v3428_v3 = vpop.permute.xlu1 %3427  ;;  %v3136_v54 = vrot.slane %v6485_v4, %v6540_v10  ;;  %v3220_v4 = vrot.slane %v6511_v39, %v6540_v10 }
 0x167   : > { %v3400_v53 = vrot.slane %v3392_v52, %v6540_v10  ;;  %v3436_v59 = vrot.slane %v3428_v3, %v6540_v10  ;;  %v3148_v52 = vrot.slane %v6483_v20, %v6540_v10  ;;  %v4434_v3 = vcombine.low %v6606_v37, %v6614_v42 }
 0x168   : > { %v3172_v20 = vrot.slane %v6496_v41, %v6540_v10  ;;  %v3208_v41 = vrot.slane %v6513_v6, %v6540_v10  ;;  %v3244_v37 = vrot.slane %v6515_v63, %v6540_v10 }
 0x169   : > { %v6572_v14 = vmul.bf16 %v6544_v40, %v3400_v53  ;;  %v6579_v29 = vmul.bf16 %v6544_v40, %v3436_v59  ;;  %v4433_v59 = vcombine.low %v6611_v21, %v6617_v61  ;;  %v6646_v57 = vmul.bf16 %v6544_v40, %v3148_v52 }
 0x16a   : > { %v3416_v26 = vpop.permute.xlu0 %3415  ;;  %v3256_v61 = vrot.slane %v6526_v9, %v6540_v10  ;;  %v6674_v63 = vmul.bf16 %v6544_v40, %v3172_v20  ;;  %v6682_v52 = vmul.bf16 %v6544_v40, %v3160_v62  ;;  %v6685_v9 = vmul.bf16 %v6544_v40, %v3196_v15 }
 0x16b   : > { %v3424_v34 = vrot.slane %v3416_v26, %v6540_v10  ;;  %v6639_v26 = vmul.bf16 %v6544_v40, %v3112_v22  ;;  %v6671_v22 = vmul.bf16 %v6544_v40, %v3136_v54  ;;  %v6702_v62 = vmul.bf16 %v6544_v40, %v3232_v19 }
 0x16c   : > { %v6705_v15 = vmul.bf16 %v6544_v40, %v3268_v38  ;;  %v3280_v19 = vrot.slane %v6530_v25, %v6540_v10 }
 0x16d   : > { %v6582_v48 = vmul.bf16 %v6544_v40, %v3424_v34  ;;  %v2997_v34 = vpack.i.b16 %v2995_v30, %v2995_v30 }
 0x16f   : > { %v6679_v2 = vrot.slane %v2997_v34, %v7145_v31  ;;  %v6699_v31 = vmul.bf16 %v6544_v40, %v3244_v37 }
 0x1cb   : > { %v4747_v43 = vpop.f32.mrb[0].mxu1 }
 0x1cc   : > { %v1803_v44 = vpop.f32.mrb[1].mxu1 }
 0x1cd   : > { %v4748_v13 = vpop.f32.mrb[2].mxu1 }
 0x1ce   : > { %v1806_v47 = vpop.f32.mrb[3].mxu1 }
 0x1d3   : > { %v6586_v32 = vpop.f32.mrb[4].mxu1 }
 0x1d4   : > { %v6588_v45 = vpop.f32.mrb[5].mxu1 }
 0x1d5   : > { %v6590_v60 = vpop.f32.mrb[6].mxu1 }
 0x1d6   : > { %v6592_v24 = vpop.f32.mrb[7].mxu1 }
 0x1db   : > { %v6608_v11 = vpop.f32.mrb[8].mxu1 }
 0x1dc   : > { %v6621_v23 = vpop.f32.mrb[9].mxu1 }
 0x1dd   : > { %v6625_v36 = vpop.f32.mrb[10].mxu1 }
 0x1de   : > { %v6629_v53 = vpop.f32.mrb[11].mxu1 }
 0x1e3   : > { %v6660_v21 = vpop.f32.mrb[12].mxu1 }
 0x1e4   : > { %v4917_v8 = vpop.f32.mrb[0].mxu0  ;;  %v6668_v39 = vpop.f32.mrb[13].mxu1 }
 0x1e5   : > { %v4949_v42 = vadd.f32 %v4917_v8, %v4747_v43  ;;  %v2819_v27 = vpop.f32.mrb[1].mxu0  ;;  %v6676_v43 = vpop.f32.mrb[14].mxu1  ;;  %v6693_v8 = vmul.bf16 %v6544_v40, %v3220_v4  ;;  %v4435_v4 = vcombine.low %v6639_v26, %v6636_v58 }
 0x1e6   : > { %v4950_v12 = vadd.f32 %v2819_v27, %v1803_v44  ;;  %v4918_v6 = vpop.f32.mrb[2].mxu0  ;;  %v6688_v44 = vmul.bf16 %v6544_v40, %v3184_v16  ;;  %v6690_v54 = vpop.f32.mrb[15].mxu1  ;;  %v6708_v16 = vmul.bf16 %v6544_v40, %v3256_v61 }
 0x1e7   : > { %v4951_v30 = vadd.f32 %v4918_v6, %v4748_v13  ;;  %v2822_v35 = vpop.f32.mrb[3].mxu0  ;;  %v6696_v13 = vmul.bf16 %v6544_v40, %v3208_v41  ;;  %v3292_v41 = vrot.slane %v6528_v28, %v6540_v10 }
 0x1e8   : > { %v4952_v20 = vadd.f32 %v2822_v35, %v1806_v47 }
 0x1e9   : > { %v2979_v34 = vpack.c.bf16 %v4951_v30, %v4949_v42  ;;  %v4436_v42 = vcombine.low %v6671_v22, %v6646_v57 }
 0x1ea   : > { %v2978_v47 = vpack.c.bf16 %v4952_v20, %v4950_v12 }
 0x1eb   : > { %v3004_v37 = vadd.bf16 %v6679_v2, %v2979_v34 }
 0x1ec   : > { %v3003_v38 = vadd.bf16 %v6679_v2, %v2978_v47  ;;  %v4921_v61 = vpop.f32.mrb[4].mxu0  ;;  %v6733_v47 = vmul.bf16 %v6544_v40, %v3292_v41 }
 0x1ed   : > { %v3577_v6 = vadd.bf16 %v4434_v3, %v3004_v37  ;;  %v4953_v30 = vadd.f32 %v4921_v61, %v6586_v32  ;;  %v2835_v57 = vpop.f32.mrb[5].mxu0  ;;  %v6737_v37 = vmul.bf16 %v6544_v40, %v3280_v19 }
 0x1ee   : > { %v3576_v35 = vadd.bf16 %v4433_v59, %v3003_v38  ;;  %v4954_v20 = vadd.f32 %v2835_v57, %v6588_v45  ;;  %v4922_v34 = vpop.f32.mrb[6].mxu0 }
 0x1ef   : > { %vm3593_vm8 = vcmp.ge.bf16.partialorder %v3577_v6, 0  ;;  %v3609_v56 = vmul.bf16 1045249613, %v3577_v6  ;;  %v4955_v3 = vadd.f32 %v4922_v34, %v6590_v60  ;;  %v2838_v32 = vpop.f32.mrb[7].mxu0 }
 0x1f0   : > { %vm3592_vm9 = vcmp.ge.bf16.partialorder %v3576_v35, 0  ;;  %v3608_v61 = vmul.bf16 1045249613, %v3576_v35  ;;  %v4956_v5 = vadd.f32 %v2838_v32, %v6592_v24 }
 0x1f1   : > { %v3625_v45 = vsel %vm3593_vm8, %v3577_v6, %v3609_v56  ;;  %v2981_v60 = vpack.c.bf16 %v4955_v3, %v4953_v30 }
 0x1f2   : > { %v3642_v59 = vunpack.c.l.bf16 %v3625_v45  ;;  %v3643_v41 = vunpack.c.h.bf16 %v3625_v45  ;;  %v4451_v19 = vcombine.low %v3625_v45, %v3625_v45  ;;  %v4452_v38 = vcombine.high %v3625_v45, %v3625_v45 }
 0x1f3   : > { %v3624_v24 = vsel %vm3592_vm9, %v3576_v35, %v3608_v61  ;;  %v3006_v34 = vadd.bf16 %v6679_v2, %v2981_v60  ;;  %v2980_v32 = vpack.c.bf16 %v4956_v5, %v4954_v20 }
 0x1f4   : > { %v3676_v6 = vsel %vm3672_vm10, %v3642_v59, 0.0  ;;  %v3678_v30 = vsel %vm3672_vm10, %v3643_v41, 0.0  ;;  %3962 = vst.msk [vmem:[%s6745_s29 + $0x8] sm:$0xf] %vm3959_vm11, %v4451_v19  ;;  %3963 = vst.msk [vmem:[%s6745_s29 + $0xc] sm:$0xf] %vm3959_vm11, %v4452_v38  ;;  %v3640_v35 = vunpack.c.l.bf16 %v3624_v24  ;;  %v3641_v61 = vunpack.c.h.bf16 %v3624_v24 }
 0x1f5   : > { %v4925_v3 = vpop.f32.mrb[8].mxu0  ;;  %v4449_v5 = vcombine.low %v3624_v24, %v3624_v24  ;;  %v4450_v20 = vcombine.high %v3624_v24, %v3624_v24  ;;  %v3744_v60 = vmul.f32 %v3642_v59, %v3642_v59  ;;  %v3745_v46 = vmul.f32 %v3643_v41, %v3643_v41 }
 0x1f6   : > { %v2851_v45 = vpop.f32.mrb[9].mxu0  ;;  %v3579_v57 = vadd.bf16 %v4436_v42, %v3006_v34  ;;  %v3005_v56 = vadd.bf16 %v6679_v2, %v2980_v32  ;;  %v3673_v18 = vsel %vm3672_vm10, %v3640_v35, 0.0  ;;  %v3674_v19 = vsel %vm3672_vm10, %v3641_v61, 0.0 }
 0x1f7   : > { %v4926_v25 = vpop.f32.mrb[10].mxu0  ;;  %v3742_v28 = vmul.f32 %v3640_v35, %v3640_v35  ;;  %v3743_v38 = vmul.f32 %v3641_v61, %v3641_v61  ;;  %3960 = vst.msk [vmem:[%s6745_s29] sm:$0xf] %vm3959_vm11, %v4449_v5  ;;  %3961 = vst.msk [vmem:[%s6745_s29 + $0x4] sm:$0xf] %vm3959_vm11, %v4450_v20  ;;  %v3675_v27 = vadd.f32 %v3674_v19, %v3673_v18  ;;  %v3777_v35 = vsel %vm3672_vm10, %v3744_v60, 0.0 }
 0x1f8   : > { %v2854_v22 = vpop.f32.mrb[11].mxu0  ;;  %vm3595_vm12 = vcmp.ge.bf16.partialorder %v3579_v57, 0  ;;  %v3611_v24 = vmul.bf16 1045249613, %v3579_v57  ;;  %v3578_v42 = vadd.bf16 %v4435_v4, %v3005_v56  ;;  %v4957_v34 = vadd.f32 %v4925_v3, %v6608_v11 }
 0x1f9   : > { %v3774_v59 = vsel %vm3672_vm10, %v3742_v28, 0.0  ;;  %v3775_v41 = vsel %vm3672_vm10, %v3743_v38, 0.0  ;;  %v4958_v32 = vadd.f32 %v2851_v45, %v6621_v23  ;;  %v3677_v61 = vadd.f32 %v3676_v6, %v3675_v27 }
 0x1fa   : > { %v3776_v5 = vadd.f32 %v3775_v41, %v3774_v59  ;;  %v3627_v18 = vsel %vm3595_vm12, %v3579_v57, %v3611_v24  ;;  %vm3594_vm13 = vcmp.ge.bf16.partialorder %v3578_v42, 0  ;;  %v3610_v26 = vmul.bf16 1045249613, %v3578_v42 }
 0x1fb   : > { %v3646_v20 = vunpack.c.l.bf16 %v3627_v18  ;;  %v4455_v19 = vcombine.low %v3627_v18, %v3627_v18  ;;  %v4456_v12 = vcombine.high %v3627_v18, %v3627_v18  ;;  %v3679_v4 = vadd.f32 %v3678_v30, %v3677_v61 }
 0x1fc   : > { %v3778_v58 = vadd.f32 %v3777_v35, %v3776_v5  ;;  %v4959_v28 = vadd.f32 %v4926_v25, %v6625_v36  ;;  %v4929_v56 = vpop.f32.mrb[12].mxu0  ;;  %v3340_v11 = vrot.slane %v6537_v7, %v6540_v10  ;;  %v3328_v23 = vrot.slane %v6542_v50, %v6540_v10 }
 0x1fd   : > { %v3779_v27 = vsel %vm3672_vm10, %v3745_v46, 0.0  ;;  %v3647_v6 = vunpack.c.h.bf16 %v3627_v18  ;;  %3966 = vst.msk [vmem:[%s6745_s29 + $0x18] sm:$0xf] %vm3959_vm11, %v4455_v19  ;;  %3967 = vst.msk [vmem:[%s6745_s29 + $0x1c] sm:$0xf] %vm3959_vm11, %v4456_v12  ;;  %v2867_v57 = vpop.f32.mrb[13].mxu0  ;;  %v3626_v3 = vsel %vm3594_vm13, %v3578_v42, %v3610_v26  ;;  %v4960_v36 = vadd.f32 %v2854_v22, %v6629_v53 }
 0x1fe   : > { %v3780_v45 = vadd.f32 %v3779_v27, %v3778_v58  ;;  %v2983_v30 = vpack.c.bf16 %v4959_v28, %v4957_v34  ;;  %v4930_v25 = vpop.f32.mrb[14].mxu0  ;;  %v3684_v7 = vsel %vm3672_vm10, %v3646_v20, 0.0  ;;  %v3748_v60 = vmul.f32 %v3646_v20, %v3646_v20 }
 0x1ff   : > { %v3644_v50 = vunpack.c.l.bf16 %v3626_v3  ;;  %v3645_v38 = vunpack.c.h.bf16 %v3626_v3  ;;  %v2870_v46 = vpop.f32.mrb[15].mxu0  ;;  %v4453_v24 = vcombine.low %v3626_v3, %v3626_v3  ;;  %v4454_v59 = vcombine.high %v3626_v3, %v3626_v3 }
 0x200   : > { %v3008_v41 = vadd.bf16 %v6679_v2, %v2983_v30  ;;  %v2982_v12 = vpack.c.bf16 %v4960_v36, %v4958_v32  ;;  %v3749_v35 = vmul.f32 %v3647_v6, %v3647_v6  ;;  %v7147_v22 = vcombine.low %v6688_v44, %v6685_v9 }
 0x201   : > { %v3680_v42 = vsel %vm3672_vm10, %v3644_v50, 0.0  ;;  %v3746_v34 = vmul.f32 %v3644_v50, %v3644_v50  ;;  %v3747_v61 = vmul.f32 %v3645_v38, %v3645_v38  ;;  %3964 = vst.msk [vmem:[%s6745_s29 + $0x10] sm:$0xf] %vm3959_vm11, %v4453_v24  ;;  %3965 = vst.msk [vmem:[%s6745_s29 + $0x14] sm:$0xf] %vm3959_vm11, %v4454_v59  ;;  %v4961_v20 = vadd.f32 %v4929_v56, %v6660_v21 }
 0x202   : > { %v3681_v53 = vadd.f32 %v3680_v42, %v3679_v4  ;;  %v3581_v5 = vadd.bf16 %v7147_v22, %v3008_v41  ;;  %v3007_v18 = vadd.bf16 %v6679_v2, %v2982_v12  ;;  %v3682_v32 = vsel %vm3672_vm10, %v3645_v38, 0.0 }
 0x203   : > { %v3781_v19 = vsel %vm3672_vm10, %v3746_v34, 0.0  ;;  %v4962_v58 = vadd.f32 %v2867_v57, %v6668_v39  ;;  %v4963_v26 = vadd.f32 %v4930_v25, %v6676_v43  ;;  %v3783_v9 = vsel %vm3672_vm10, %v3747_v61, 0.0 }
 0x204   : > { %v3683_v4 = vadd.f32 %v3682_v32, %v3681_v53  ;;  %v3782_v28 = vadd.f32 %v3781_v19, %v3780_v45  ;;  %vm3597_vm14 = vcmp.ge.bf16.partialorder %v3581_v5, 0  ;;  %v3613_v27 = vmul.bf16 1045249613, %v3581_v5  ;;  %v4933_v3 = vpop.f32.mrb[16].mxu0 }
 0x205   : > { %v7148_v44 = vcombine.low %v6682_v52, %v6674_v63  ;;  %v2985_v21 = vpack.c.bf16 %v4963_v26, %v4961_v20  ;;  %v4964_v56 = vadd.f32 %v2870_v46, %v6690_v54  ;;  %v2883_v36 = vpop.f32.mrb[17].mxu0  ;;  %v3686_v50 = vsel %vm3672_vm10, %v3647_v6, 0.0 }
 0x206   : > { %v3685_v39 = vadd.f32 %v3684_v7, %v3683_v4  ;;  %v3784_v57 = vadd.f32 %v3783_v9, %v3782_v28  ;;  %v3629_v43 = vsel %vm3597_vm14, %v3581_v5, %v3613_v27  ;;  %v4934_v45 = vpop.f32.mrb[18].mxu0  ;;  %v3785_v25 = vsel %vm3672_vm10, %v3748_v60, 0.0 }
 0x207   : > { %v3580_v30 = vadd.bf16 %v7148_v44, %v3007_v18  ;;  %v3650_v38 = vunpack.c.l.bf16 %v3629_v43  ;;  %v4459_v24 = vcombine.low %v3629_v43, %v3629_v43  ;;  %v4460_v59 = vcombine.high %v3629_v43, %v3629_v43  ;;  %v6809_v41 = vpop.f32.mrb[19].mxu0 }
 0x208   : > { %v3786_v63 = vadd.f32 %v3785_v25, %v3784_v57  ;;  %v3687_v54 = vadd.f32 %v3686_v50, %v3685_v39  ;;  %v6812_v46 = vmul.bf16 %v6544_v40, %v3340_v11  ;;  %v6815_v6 = vmul.bf16 %v6544_v40, %v3328_v23 }
 0x209   : > { %vm3596_vm15 = vcmp.ge.bf16.partialorder %v3580_v30, 0  ;;  %v3612_v52 = vmul.bf16 1045249613, %v3580_v30  ;;  %v3787_v7 = vsel %vm3672_vm10, %v3749_v35, 0.0  ;;  %v3651_v12 = vunpack.c.h.bf16 %v3629_v43  ;;  %3970 = vst.msk [vmem:[%s6745_s29 + $0x28] sm:$0xf] %vm3959_vm11, %v4459_v24 }
 0x20a   : > { %3971 = vst.msk [vmem:[%s6745_s29 + $0x2c] sm:$0xf] %vm3959_vm11, %v4460_v59  ;;  %v3788_v42 = vadd.f32 %v3787_v7, %v3786_v63  ;;  %v3010_v34 = vadd.bf16 %v6679_v2, %v2985_v21  ;;  %v2984_v61 = vpack.c.bf16 %v4964_v56, %v4962_v58  ;;  %v3692_v53 = vsel %vm3672_vm10, %v3650_v38, 0.0 }
 0x20b   : > { %v3628_v60 = vsel %vm3596_vm15, %v3580_v30, %v3612_v52  ;;  %v3752_v11 = vmul.f32 %v3650_v38, %v3650_v38  ;;  %v7149_v35 = vcombine.low %v6702_v62, %v6699_v31  ;;  %v3753_v26 = vmul.f32 %v3651_v12, %v3651_v12  ;;  %v4797_v27 = vpop.f32.mrb[16].mxu1 }
 0x20c   : > { %v3648_v22 = vunpack.c.l.bf16 %v3628_v60  ;;  %v3649_v23 = vunpack.c.h.bf16 %v3628_v60  ;;  %v4457_v5 = vcombine.low %v3628_v60, %v3628_v60  ;;  %v4458_v18 = vcombine.high %v3628_v60, %v3628_v60  ;;  %v6828_v19 = vpop.f32.mrb[20].mxu0  ;;  %v2069_v21 = vpop.f32.mrb[17].mxu1 }
 0x20d   : > { %v3583_v20 = vadd.bf16 %v7149_v35, %v3010_v34  ;;  %v3009_v32 = vadd.bf16 %v6679_v2, %v2984_v61  ;;  %v6831_v9 = vpop.f32.mrb[21].mxu0  ;;  %v7150_v62 = vcombine.low %v6696_v13, %v6693_v8  ;;  %v4965_v57 = vadd.f32 %v4933_v3, %v4797_v27  ;;  %v4798_v25 = vpop.f32.mrb[18].mxu1 }
 0x20e   : > { %v3688_v58 = vsel %vm3672_vm10, %v3648_v22, 0.0  ;;  %v3750_v4 = vmul.f32 %v3648_v22, %v3648_v22  ;;  %v3751_v28 = vmul.f32 %v3649_v23, %v3649_v23  ;;  %3968 = vst.msk [vmem:[%s6745_s29 + $0x20] sm:$0xf] %vm3959_vm11, %v4457_v5  ;;  %3969 = vst.msk [vmem:[%s6745_s29 + $0x24] sm:$0xf] %vm3959_vm11, %v4458_v18  ;;  %v4938_v56 = vpop.f32.mrb[22].mxu0  ;;  %v6842_v43 = vadd.f32 %v2883_v36, %v2069_v21 }
 0x20f   : > { %v3689_v44 = vadd.f32 %v3688_v58, %v3687_v54  ;;  %vm3599_vm0 = vcmp.ge.bf16.partialorder %v3583_v20, 0  ;;  %v3615_v31 = vmul.bf16 1045249613, %v3583_v20  ;;  %v3582_v30 = vadd.bf16 %v7150_v62, %v3009_v32  ;;  %v2902_v38 = vpop.f32.mrb[23].mxu0  ;;  %v2072_v8 = vpop.f32.mrb[19].mxu1 }
 0x210   : > { %v3690_v50 = vsel %vm3672_vm10, %v3649_v23, 0.0  ;;  %v3789_v39 = vsel %vm3672_vm10, %v3750_v4, 0.0  ;;  %v3791_v63 = vsel %vm3672_vm10, %v3751_v28, 0.0  ;;  %v4967_v3 = vadd.f32 %v4934_v45, %v4798_v25 }
 0x211   : > { %v3691_v24 = vadd.f32 %v3690_v50, %v3689_v44  ;;  %v3790_v59 = vadd.f32 %v3789_v39, %v3788_v42  ;;  %v3631_v52 = vsel %vm3599_vm0, %v3583_v20, %v3615_v31  ;;  %vm3598_vm1 = vcmp.ge.bf16.partialorder %v3582_v30, 0 }
 0x212   : > { %v3654_v13 = vunpack.c.l.bf16 %v3631_v52  ;;  %v4463_v54 = vcombine.low %v3631_v52, %v3631_v52  ;;  %v4464_v7 = vcombine.high %v3631_v52, %v3631_v52  ;;  %v3614_v61 = vmul.bf16 1045249613, %v3582_v30 }
 0x213   : > { %v3693_v60 = vadd.f32 %v3692_v53, %v3691_v24  ;;  %v3792_v34 = vadd.f32 %v3791_v63, %v3790_v59  ;;  %v3694_v36 = vsel %vm3672_vm10, %v3651_v12, 0.0  ;;  %v3793_v22 = vsel %vm3672_vm10, %v3752_v11, 0.0  ;;  %v4801_v11 = vpop.f32.mrb[20].mxu1 }
 0x214   : > { %v3795_v42 = vsel %vm3672_vm10, %v3753_v26, 0.0  ;;  %v3655_v23 = vunpack.c.h.bf16 %v3631_v52  ;;  %3974 = vst.msk [vmem:[%s6745_s29 + $0x38] sm:$0xf] %vm3959_vm11, %v4463_v54  ;;  %3975 = vst.msk [vmem:[%s6745_s29 + $0x3c] sm:$0xf] %vm3959_vm11, %v4464_v7  ;;  %v3630_v18 = vsel %vm3598_vm1, %v3582_v30, %v3614_v61  ;;  %v2987_v20 = vpack.c.bf16 %v4967_v3, %v4965_v57  ;;  %v6852_v32 = vpop.f32.mrb[24].mxu0 }
 0x215   : > { %v3794_v5 = vadd.f32 %v3793_v22, %v3792_v34  ;;  %v3695_v35 = vadd.f32 %v3694_v36, %v3693_v60  ;;  %v3700_v53 = vsel %vm3672_vm10, %v3654_v13, 0.0  ;;  %v3756_v45 = vmul.f32 %v3654_v13, %v3654_v13  ;;  %v6855_v26 = vpop.f32.mrb[25].mxu0  ;;  %v2085_v31 = vpop.f32.mrb[21].mxu1 }
 0x216   : > { %v3652_v58 = vunpack.c.l.bf16 %v3630_v18  ;;  %v3653_v12 = vunpack.c.h.bf16 %v3630_v18  ;;  %v4461_v28 = vcombine.low %v3630_v18, %v3630_v18  ;;  %v4462_v27 = vcombine.high %v3630_v18, %v3630_v18  ;;  %v6858_v62 = vpop.f32.mrb[26].mxu0  ;;  %v4802_v57 = vpop.f32.mrb[22].mxu1 }
 0x217   : > { %v3796_v4 = vadd.f32 %v3795_v42, %v3794_v5  ;;  %v3012_v44 = vadd.bf16 %v6679_v2, %v2987_v20  ;;  %v3757_v30 = vmul.f32 %v3655_v23, %v3655_v23  ;;  %v2918_v25 = vpop.f32.mrb[27].mxu0  ;;  %v7151_v59 = vcombine.low %v6737_v37, %v6733_v47  ;;  %v2088_v54 = vpop.f32.mrb[23].mxu1 }
 0x218   : > { %v3696_v21 = vsel %vm3672_vm10, %v3652_v58, 0.0  ;;  %v3754_v50 = vmul.f32 %v3652_v58, %v3652_v58  ;;  %v3755_v39 = vmul.f32 %v3653_v12, %v3653_v12  ;;  %3972 = vst.msk [vmem:[%s6745_s29 + $0x30] sm:$0xf] %vm3959_vm11, %v4461_v28  ;;  %3973 = vst.msk [vmem:[%s6745_s29 + $0x34] sm:$0xf] %vm3959_vm11, %v4462_v27  ;;  %v4968_v52 = vadd.f32 %v6809_v41, %v2072_v8 }
 0x219   : > { %v3697_v24 = vadd.f32 %v3696_v21, %v3695_v35  ;;  %v3585_v63 = vadd.bf16 %v7151_v59, %v3012_v44  ;;  %v4969_v13 = vadd.f32 %v6828_v19, %v4801_v11  ;;  %v3698_v7 = vsel %vm3672_vm10, %v3653_v12, 0.0 }
 0x21a   : > { %v3797_v60 = vsel %vm3672_vm10, %v3754_v50, 0.0  ;;  %v4970_v34 = vadd.f32 %v6831_v9, %v2085_v31  ;;  %v4971_v61 = vadd.f32 %v4938_v56, %v4802_v57  ;;  %v3799_v42 = vsel %vm3672_vm10, %v3755_v39, 0.0 }
 0x21b   : > { %v3699_v3 = vadd.f32 %v3698_v7, %v3697_v24  ;;  %v3798_v36 = vadd.f32 %v3797_v60, %v3796_v4  ;;  %vm3601_vm2 = vcmp.ge.bf16.partialorder %v3585_v63, 0  ;;  %v3617_v22 = vmul.bf16 1045249613, %v3585_v63  ;;  %v4805_v12 = vpop.f32.mrb[24].mxu1 }
 0x21c   : > { %v2986_v47 = vpack.c.bf16 %v4968_v52, %v6842_v43  ;;  %v2989_v37 = vpack.c.bf16 %v4971_v61, %v4969_v13  ;;  %v4972_v41 = vadd.f32 %v2902_v38, %v2088_v54  ;;  %v4444_v19 = vcombine.low %v6815_v6, %v6812_v46  ;;  %v6877_v35 = vpop.f32.mrb[28].mxu0 }
 0x21d   : > { %v3701_v8 = vadd.f32 %v3700_v53, %v3699_v3  ;;  %v3800_v5 = vadd.f32 %v3799_v42, %v3798_v36  ;;  %v3633_v18 = vsel %vm3601_vm2, %v3585_v63, %v3617_v22  ;;  %v3702_v9 = vsel %vm3672_vm10, %v3655_v23, 0.0  ;;  %v6881_v43 = vpop.f32.mrb[29].mxu0  ;;  %v2101_v53 = vpop.f32.mrb[25].mxu1 }
 0x21e   : > { %v3801_v56 = vsel %vm3672_vm10, %v3756_v45, 0.0  ;;  %v4467_v20 = vcombine.low %v3633_v18, %v3633_v18  ;;  %v4468_v58 = vcombine.high %v3633_v18, %v3633_v18  ;;  %v3011_v11 = vadd.bf16 %v6679_v2, %v2986_v47  ;;  %v6885_v4 = vpop.f32.mrb[30].mxu0  ;;  %v4806_v45 = vpop.f32.mrb[26].mxu1 }
 0x21f   : > { %v3802_v38 = vadd.f32 %v3801_v56, %v3800_v5  ;;  %v3703_v46 = vadd.f32 %v3702_v9, %v3701_v8  ;;  %v3014_v6 = vadd.bf16 %v6679_v2, %v2989_v37  ;;  %v3803_v28 = vsel %vm3672_vm10, %v3757_v30, 0.0  ;;  %v6892_v44 = vpop.f32.mrb[31].mxu0  ;;  %v2104_v24 = vpop.f32.mrb[27].mxu1 }
 0x220   : > { %v3658_v23 = vunpack.c.l.bf16 %v3633_v18  ;;  %v3659_v27 = vunpack.c.h.bf16 %v3633_v18  ;;  %3978 = vst.msk [vmem:[%s6745_s29 + $0x48] sm:$0xf] %vm3959_vm11, %v4467_v20  ;;  %3979 = vst.msk [vmem:[%s6745_s29 + $0x4c] sm:$0xf] %vm3959_vm11, %v4468_v58  ;;  %v7152_v31 = vcombine.low %v6708_v16, %v6705_v15  ;;  %v2988_v57 = vpack.c.bf16 %v4972_v41, %v4970_v34 }
 0x221   : > { %v3804_v50 = vadd.f32 %v3803_v28, %v3802_v38  ;;  %v3587_v39 = vadd.bf16 %v4444_v19, %v3014_v6  ;;  %v7153_v30 = vrot.slane %v6532_v1, %v6540_v10  ;;  %v7154_v63 = vrot.slane %v6534_v17, %v6540_v10 }
 0x222   : > { %v3584_v21 = vadd.bf16 %v7152_v31, %v3011_v11  ;;  %v4973_v13 = vadd.f32 %v6852_v32, %v4805_v12  ;;  %v4974_v54 = vadd.f32 %v6855_v26, %v2101_v53  ;;  %v3760_v7 = vmul.f32 %v3658_v23, %v3658_v23 }
 0x223   : > { %v3469_v59 = vmul.bf16 %v6544_v40, %v7153_v30  ;;  %v3468_v52 = vmul.bf16 %v6544_v40, %v7154_v63  ;;  %vm3603_vm4 = vcmp.ge.bf16.partialorder %v3587_v39, 0  ;;  %v3619_v16 = vmul.bf16 1045249613, %v3587_v39  ;;  %v4809_v26 = vpop.f32.mrb[28].mxu1 }
 0x224   : > { %vm3600_vm3 = vcmp.ge.bf16.partialorder %v3584_v21, 0  ;;  %v3616_v15 = vmul.bf16 1045249613, %v3584_v21  ;;  %v4975_v60 = vadd.f32 %v6858_v62, %v4806_v45  ;;  %v4976_v34 = vadd.f32 %v2918_v25, %v2104_v24  ;;  %v2117_v62 = vpop.f32.mrb[29].mxu1 }
 0x225   : > { %v3761_v1 = vmul.f32 %v3659_v27, %v3659_v27  ;;  %v3635_v3 = vsel %vm3603_vm4, %v3587_v39, %v3619_v16  ;;  %v3013_v17 = vadd.bf16 %v6679_v2, %v2988_v57  ;;  %v4443_v22 = vcombine.low %v3468_v52, %v3469_v59  ;;  %v4810_v5 = vpop.f32.mrb[30].mxu1 }
 0x226   : > { %v3632_v61 = vsel %vm3600_vm3, %v3584_v21, %v3616_v15  ;;  %v3662_v42 = vunpack.c.l.bf16 %v3635_v3  ;;  %v4471_v47 = vcombine.low %v3635_v3, %v3635_v3  ;;  %v4472_v37 = vcombine.high %v3635_v3, %v3635_v3  ;;  %v6922_v58 = vpop.f32.mrb[31].mxu1 }
 0x227   : > { %v3656_v10 = vunpack.c.l.bf16 %v3632_v61  ;;  %v3657_v40 = vunpack.c.h.bf16 %v3632_v61  ;;  %v4465_v32 = vcombine.low %v3632_v61, %v3632_v61  ;;  %v4466_v36 = vcombine.high %v3632_v61, %v3632_v61 }
 0x228   : > { %v3708_v25 = vsel %vm3672_vm10, %v3658_v23, 0.0  ;;  %v3710_v18 = vsel %vm3672_vm10, %v3659_v27, 0.0  ;;  %v3809_v9 = vsel %vm3672_vm10, %v3760_v7, 0.0  ;;  %v3811_v56 = vsel %vm3672_vm10, %v3761_v1, 0.0  ;;  %3982 = vst.msk [vmem:[%s6745_s29 + $0x58] sm:$0xf] %vm3959_vm11, %v4471_v47 }
 0x229   : > { %v3704_v41 = vsel %vm3672_vm10, %v3656_v10, 0.0  ;;  %v3758_v19 = vmul.f32 %v3656_v10, %v3656_v10  ;;  %v3759_v8 = vmul.f32 %v3657_v40, %v3657_v40  ;;  %3976 = vst.msk [vmem:[%s6745_s29 + $0x40] sm:$0xf] %vm3959_vm11, %v4465_v32  ;;  %3977 = vst.msk [vmem:[%s6745_s29 + $0x44] sm:$0xf] %vm3959_vm11, %v4466_v36  ;;  %v3706_v12 = vsel %vm3672_vm10, %v3657_v40, 0.0 }
 0x22a   : > { %v3705_v20 = vadd.f32 %v3704_v41, %v3703_v46  ;;  %3983 = vst.msk [vmem:[%s6745_s29 + $0x5c] sm:$0xf] %vm3959_vm11, %v4472_v37  ;;  %v3663_v11 = vunpack.c.h.bf16 %v3635_v3  ;;  %v3586_v6 = vadd.bf16 %v4443_v22, %v3013_v17  ;;  %v3716_v23 = vsel %vm3672_vm10, %v3662_v42, 0.0 }
 0x22b   : > { %v3805_v38 = vsel %vm3672_vm10, %v3758_v19, 0.0  ;;  %v2991_v27 = vpack.c.bf16 %v4975_v60, %v4973_v13  ;;  %v3807_v45 = vsel %vm3672_vm10, %v3759_v8, 0.0  ;;  %v2990_v31 = vpack.c.bf16 %v4976_v34, %v4974_v54 }
 0x22c   : > { %v3707_v53 = vadd.f32 %v3706_v12, %v3705_v20  ;;  %v3806_v28 = vadd.f32 %v3805_v38, %v3804_v50  ;;  %vm3602_vm5 = vcmp.ge.bf16.partialorder %v3586_v6, 0  ;;  %v3618_v46 = vmul.bf16 1045249613, %v3586_v6 }
 0x22d   : > { %v3016_v57 = vadd.bf16 %v6679_v2, %v2991_v27  ;;  %v4977_v24 = vadd.f32 %v6877_v35, %v4809_v26  ;;  %v3015_v59 = vadd.bf16 %v6679_v2, %v2990_v31  ;;  %v6932_v63 = vadd.f32 %v6881_v43, %v2117_v62 }
 0x22e   : > { %v3709_v21 = vadd.f32 %v3708_v25, %v3707_v53  ;;  %v3808_v39 = vadd.f32 %v3807_v45, %v3806_v28  ;;  %v3634_v30 = vsel %vm3602_vm5, %v3586_v6, %v3618_v46  ;;  %v4979_v50 = vadd.f32 %v6885_v4, %v4810_v5 }
 0x22f   : > { %v3660_v13 = vunpack.c.l.bf16 %v3634_v30  ;;  %v3661_v15 = vunpack.c.h.bf16 %v3634_v30  ;;  %v4469_v16 = vcombine.low %v3634_v30, %v3634_v30  ;;  %v4470_v7 = vcombine.high %v3634_v30, %v3634_v30 }
 0x230   : > { %v3810_v52 = vadd.f32 %v3809_v9, %v3808_v39  ;;  %v3711_v54 = vadd.f32 %v3710_v18, %v3709_v21  ;;  %v7155_v60 = vcombine.low %v6562_v33, %v6559_v0  ;;  %v7156_v34 = vcombine.low %v6552_v51, %v6549_v55 }
 0x231   : > { %v3764_v43 = vmul.f32 %v3662_v42, %v3662_v42  ;;  %v3712_v61 = vsel %vm3672_vm10, %v3660_v13, 0.0  ;;  %v3762_v3 = vmul.f32 %v3660_v13, %v3660_v13  ;;  %v3763_v4 = vmul.f32 %v3661_v15, %v3661_v15  ;;  %3980 = vst.msk [vmem:[%s6745_s29 + $0x50] sm:$0xf] %vm3959_vm11, %v4469_v16  ;;  %3981 = vst.msk [vmem:[%s6745_s29 + $0x54] sm:$0xf] %vm3959_vm11, %v4470_v7 }
 0x232   : > { %v3589_v35 = vadd.bf16 %v7155_v60, %v3016_v57  ;;  %v3588_v1 = vadd.bf16 %v7156_v34, %v3015_v59  ;;  %v3713_v17 = vadd.f32 %v3712_v61, %v3711_v54  ;;  %v3812_v10 = vadd.f32 %v3811_v56, %v3810_v52 }
 0x233   : > { %v3714_v0 = vsel %vm3672_vm10, %v3661_v15, 0.0  ;;  %v3813_v33 = vsel %vm3672_vm10, %v3762_v3, 0.0  ;;  %v2993_v26 = vpack.c.bf16 %v4979_v50, %v4977_v24  ;;  %v3765_v22 = vmul.f32 %v3663_v11, %v3663_v11 }
 0x234   : > { %vm3605_vm7 = vcmp.ge.bf16.partialorder %v3589_v35, 0  ;;  %v3621_v40 = vmul.bf16 1045249613, %v3589_v35  ;;  %vm3604_vm8 = vcmp.ge.bf16.partialorder %v3588_v1, 0  ;;  %v3620_v55 = vmul.bf16 1045249613, %v3588_v1 }
 0x235   : > { %v3715_v51 = vadd.f32 %v3714_v0, %v3713_v17  ;;  %v3814_v32 = vadd.f32 %v3813_v33, %v3812_v10  ;;  %v3815_v42 = vsel %vm3672_vm10, %v3763_v4, 0.0  ;;  %v3718_v19 = vsel %vm3672_vm10, %v3663_v11, 0.0 }
 0x236   : > { %v3637_v36 = vsel %vm3605_vm7, %v3589_v35, %v3621_v40  ;;  %v3636_v41 = vsel %vm3604_vm8, %v3588_v1, %v3620_v55  ;;  %v3817_v8 = vsel %vm3672_vm10, %v3764_v43, 0.0  ;;  %v3018_v18 = vadd.bf16 %v6679_v2, %v2993_v26 }
 0x237   : > { %v4475_v47 = vcombine.low %v3637_v36, %v3637_v36  ;;  %v4476_v37 = vcombine.high %v3637_v36, %v3637_v36  ;;  %v3717_v62 = vadd.f32 %v3716_v23, %v3715_v51  ;;  %v3816_v25 = vadd.f32 %v3815_v42, %v3814_v32 }
 0x238   : > { %v3666_v5 = vunpack.c.l.bf16 %v3637_v36  ;;  %v3664_v56 = vunpack.c.l.bf16 %v3636_v41  ;;  %v3665_v20 = vunpack.c.h.bf16 %v3636_v41  ;;  %v3819_v38 = vsel %vm3672_vm10, %v3765_v22, 0.0 }
 0x239   : > { %3986 = vst.msk [vmem:[%s6745_s29 + $0x68] sm:$0xf] %vm3959_vm11, %v4475_v47  ;;  %3987 = vst.msk [vmem:[%s6745_s29 + $0x6c] sm:$0xf] %vm3959_vm11, %v4476_v37  ;;  %v3818_v9 = vadd.f32 %v3817_v8, %v3816_v25  ;;  %v3719_v12 = vadd.f32 %v3718_v19, %v3717_v62  ;;  %v4473_v6 = vcombine.low %v3636_v41, %v3636_v41  ;;  %v3667_v11 = vunpack.c.h.bf16 %v3637_v36 }
 0x23a   : > { %v4474_v53 = vcombine.high %v3636_v41, %v3636_v41  ;;  %v3720_v28 = vsel %vm3672_vm10, %v3664_v56, 0.0  ;;  %v3766_v23 = vmul.f32 %v3664_v56, %v3664_v56  ;;  %v3767_v27 = vmul.f32 %v3665_v20, %v3665_v20 }
 0x23b   : > { %v3721_v45 = vadd.f32 %v3720_v28, %v3719_v12  ;;  %v3820_v46 = vadd.f32 %v3819_v38, %v3818_v9  ;;  %3984 = vst.msk [vmem:[%s6745_s29 + $0x60] sm:$0xf] %vm3959_vm11, %v4473_v6  ;;  %v7157_v31 = vcombine.low %v6582_v48, %v6579_v29  ;;  %v4980_v39 = vadd.f32 %v6892_v44, %v6922_v58 }
 0x23c   : > { %3985 = vst.msk [vmem:[%s6745_s29 + $0x64] sm:$0xf] %vm3959_vm11, %v4474_v53  ;;  %v3768_v57 = vmul.f32 %v3666_v5, %v3666_v5  ;;  %v3722_v24 = vsel %vm3672_vm10, %v3665_v20, 0.0  ;;  %v3821_v30 = vsel %vm3672_vm10, %v3766_v23, 0.0  ;;  %v3724_v13 = vsel %vm3672_vm10, %v3666_v5, 0.0 }
 0x23d   : > { %v3591_v21 = vadd.bf16 %v7157_v31, %v3018_v18  ;;  %v3723_v59 = vadd.f32 %v3722_v24, %v3721_v45  ;;  %v3822_v50 = vadd.f32 %v3821_v30, %v3820_v46  ;;  %v3769_v15 = vmul.f32 %v3667_v11, %v3667_v11 }
 0x23e   : > { %v3823_v29 = vsel %vm3672_vm10, %v3767_v27, 0.0  ;;  %v2992_v48 = vpack.c.bf16 %v4980_v39, %v6932_v63  ;;  %v3726_v16 = vsel %vm3672_vm10, %v3667_v11, 0.0  ;;  %v3825_v7 = vsel %vm3672_vm10, %v3768_v57, 0.0 }
 0x23f   : > { %vm3607_vm9 = vcmp.ge.bf16.partialorder %v3591_v21, 0  ;;  %v3623_v52 = vmul.bf16 1045249613, %v3591_v21  ;;  %v3725_v54 = vadd.f32 %v3724_v13, %v3723_v59  ;;  %v3824_v44 = vadd.f32 %v3823_v29, %v3822_v50 }
 0x240   : > { %v3017_v1 = vadd.bf16 %v6679_v2, %v2992_v48  ;;  %v3827_v61 = vsel %vm3672_vm10, %v3769_v15, 0.0  ;;  %v7158_v63 = vcombine.low %v6572_v14, %v6569_v49 }
 0x241   : > { %v3639_v58 = vsel %vm3607_vm9, %v3591_v21, %v3623_v52  ;;  %v3826_v34 = vadd.f32 %v3825_v7, %v3824_v44  ;;  %v3727_v43 = vadd.f32 %v3726_v16, %v3725_v54 }
 0x242   : > { %v4479_v60 = vcombine.low %v3639_v58, %v3639_v58  ;;  %v4480_v35 = vcombine.high %v3639_v58, %v3639_v58  ;;  %v3590_v3 = vadd.bf16 %v7158_v63, %v3017_v1  ;;  %v3670_v10 = vunpack.c.l.bf16 %v3639_v58 }
 0x243   : > { %v3828_v4 = vadd.f32 %v3827_v61, %v3826_v34  ;;  %v3671_v51 = vunpack.c.h.bf16 %v3639_v58 }
 0x244   : > { %3990 = vst.msk [vmem:[%s6745_s29 + $0x78] sm:$0xf] %vm3959_vm11, %v4479_v60  ;;  %3991 = vst.msk [vmem:[%s6745_s29 + $0x7c] sm:$0xf] %vm3959_vm11, %v4480_v35  ;;  %vm3606_vm12 = vcmp.ge.bf16.partialorder %v3590_v3, 0  ;;  %v3772_v14 = vmul.f32 %v3670_v10, %v3670_v10  ;;  %v3732_v62 = vsel %vm3672_vm10, %v3670_v10, 0.0 }
 0x245   : > { %v3622_v17 = vmul.bf16 1045249613, %v3590_v3  ;;  %v3773_v25 = vmul.f32 %v3671_v51, %v3671_v51  ;;  %v3734_v5 = vsel %vm3672_vm10, %v3671_v51, 0.0 }
 0x246   : > { %v3833_v18 = vsel %vm3672_vm10, %v3772_v14, 0.0 }
 0x247   : > { %v3638_v40 = vsel %vm3606_vm12, %v3590_v3, %v3622_v17  ;;  %v3835_v20 = vsel %vm3672_vm10, %v3773_v25, 0.0 }
 0x248   : > { %v3668_v0 = vunpack.c.l.bf16 %v3638_v40  ;;  %v3669_v2 = vunpack.c.h.bf16 %v3638_v40  ;;  %v4477_v33 = vcombine.low %v3638_v40, %v3638_v40  ;;  %v4478_v55 = vcombine.high %v3638_v40, %v3638_v40 }
 0x24a   : > { %v3728_v32 = vsel %vm3672_vm10, %v3668_v0, 0.0  ;;  %v3770_v36 = vmul.f32 %v3668_v0, %v3668_v0  ;;  %v3771_v26 = vmul.f32 %v3669_v2, %v3669_v2  ;;  %3988 = vst.msk [vmem:[%s6745_s29 + $0x70] sm:$0xf] %vm3959_vm11, %v4477_v33  ;;  %3989 = vst.msk [vmem:[%s6745_s29 + $0x74] sm:$0xf] %vm3959_vm11, %v4478_v55  ;;  %v3730_v22 = vsel %vm3672_vm10, %v3669_v2, 0.0 }
 0x24b   : > { %v3729_v49 = vadd.f32 %v3728_v32, %v3727_v43  ;;  %s5296_s29 = scalar_lea.vmem %s5295_s19, 64 }
 0x24c   : > { %v3829_v42 = vsel %vm3672_vm10, %v3770_v36, 0.0  ;;  %v3831_v41 = vsel %vm3672_vm10, %v3771_v26, 0.0  ;;  %vm3845_vm10 = vcmask 58368   ;;  %p5298_p0 = scmp.lt.s32.totalorder %s5296_s29, %s5290_s13 }
 0x24d   : > { %v3731_v47 = vadd.f32 %v3730_v22, %v3729_v49  ;;  %v3830_v37 = vadd.f32 %v3829_v42, %v3828_v4 }
 0x24e   : > { %p5299_p1 = por %p5298_p0, %p5297_p13 }
 0x24f   : > { %v3832_v19 = vadd.f32 %v3831_v41, %v3830_v37  ;;  %v3733_v8 = vadd.f32 %v3732_v62, %v3731_v47 }
 0x250   : > { %p5300_p2 = pnand %p5299_p1, %p5293_p12 }
 0x251   : > { %v3735_v9 = vadd.f32 %v3734_v5, %v3733_v8  ;;  %v3834_v56 = vadd.f32 %v3833_v18, %v3832_v19 }
 0x253   : > { %v3736_v12 = vrot.slane %v3735_v9, 4  ;;  %v3836_v38 = vadd.f32 %v3835_v20, %v3834_v56 }
 0x255   : > { %v3737_v6 = vadd.f32 %v3736_v12, %v3735_v9  ;;  %v3837_v53 = vrot.slane %v3836_v38, 4 }
 0x257   : > { %v3738_v11 = vrot.slane %v3737_v6, 2  ;;  %v3838_v28 = vadd.f32 %v3837_v53, %v3836_v38 }
 0x259   : > { %v3739_v23 = vadd.f32 %v3738_v11, %v3737_v6  ;;  %v3839_v27 = vrot.slane %v3838_v28, 2 }
 0x25b   : > { %v3740_v45 = vrot.slane %v3739_v23, 1  ;;  %v3840_v46 = vadd.f32 %v3839_v27, %v3838_v28 }
 0x25d   : > { %v3841_v31 = vrot.slane %v3840_v46, 1  ;;  %v3741_v21 = vadd.f32 %v3740_v45, %v3739_v23 }
 0x25f   : > { %v3842_v39 = vadd.f32 %v3841_v31, %v3840_v46 }
 0x261   : > { %v3844_v57 = vsel %vm1014_vm6, %v3741_v21, %v3842_v39 }
 0x262   : > { %3846 = vst.msk [vmem:[%s496_s26] sm:$0x3] %vm3845_vm10, %v3844_v57 }
 0x263   : > { %5303 = shalt.err (!%p5300_p2)
}
 0x264   : > { %s5304_s14 = scalar_lea.hbm %s7001_s28, 32  ;;  %s5308_s27 = scalar_lea.hbm %s7064_s9, 256 }
 0x265   : > { %p5305_p4 = scmp.ne.s32.totalorder %s7001_s28, %s5304_s14  ;;  %p5309_p7 = scmp.lt.u32.totalorder %s7001_s28, %s7064_s9 }
 0x266   : > { %p5310_p9 = scmp.lt.u32.totalorder %s5308_s27, %s5304_s14  ;;  %p5312_p11 = scmp.lt.u32.totalorder %s5304_s14, %s7001_s28 }
 0x267   : > { %p5306_p5 = pnand %p5305_p4, %p5490_p3 }
 0x268   : > { %p5311_p10 = por %p5310_p9, %p5309_p7 }
 0x269   : > { %p5307_p6 = pneg %p5306_p5 }
 0x26a   : > { %p5313_p12 = por %p5312_p11, %p5311_p10 }
 0x26c   : > { %p5314_p13 = pnand %p5313_p12, %p5307_p6 }
 0x26e   : > { %5317 = shalt.err (!%p5314_p13)
}
 0x26f   : > { %5215 = dma.vmem_to_hbm [thread:$0]  (%p5490_p3), %s7003_s18, 32, %s7001_s28, %s4003_s12  }
 0x270 PF: > { %p5221_p0 = scmp.ge.s32.totalorder %s5384_s16, 2  ;;  %s4047_s20 = sand.u32 1, %s5356_s30  }
 0x271   : > { %s4048_s21 = scalar_lea.sflag [#allocation3], %s4047_s20 }
 0x272   : > { %p5218_p1 = pnand %p5221_p0, %p5499_p8 }
 0x274   : > { %5351 = dma.done.wait (!%p5218_p1), %s4048_s21, 32  }
 0x275   : > { %5353 = vsyncadd (!%p5218_p1), %s4048_s21, 4294967264  ;;  %s23_s16 = sadd.s32 1, %s5384_s16   ;;  %s7159_s22 = sld [smem:[#allocation9_spill]] }
 0x276   : > { %p20_p2 = scmp.ge.s32.totalorder %s23_s16, 10   ;;  %s7160_s12 = sld [smem:[#allocation5_spill]] }
 0x277   : > { %s7161_s13 = sld [smem:[#allocation6_spill]]  ;;  %s7162_s14 = sld [smem:[#allocation7_spill]] }
 0x278   : > { %s7163_s15 = sld [smem:[#allocation8_spill]]  ;;  %s7164_s30 = smov %s5360_s10 }
 0x279   : > { %s7165_s10 = smov %s5364_s11  ;;  %22 = sbr.rel (!%p20_p2) target bundleno = 5 (0x5), region = 119 }
 0x27b   : > { %s7166_s11 = smov %s7159_s22 }
 0x280   :  { %4053 = vsyncpa [#allocation3], 1 }
 0x281   :  { %4055 = vsyncpa [#allocation3 + $0x1], 1 }

</bundles_post_ra>
